<compile_context>
chip_gen: v6e
topology: v6e:2x2x1
jax: 0.10.0
libtpu: 0.0.40
codegen_flags: <defaults>
</compile_context>

<pallas_src>
import jax
import jax.numpy as jnp
import numpy as np
from jax import lax
from jax.experimental import pallas as pl
from jax.experimental.pallas import tpu as pltpu

NUM_CLASSES = 10


# ---------------------------------------------------------------------------
# Kernel 1: fused conv3x3 + bias + ReLU + maxpool 2x2, one image per grid step.
#
# Patches are pre-grouped by 2x2 pool position in the wrapper, so the kernel
# computes one lane-dense (Cout, Ho*Wo) matmul per pool position and takes the
# elementwise max -- zero transposes / reshapes / strided slices in-kernel.
# ---------------------------------------------------------------------------
def _conv_relu_pool_kernel(p_ref, w_ref, b_ref, o_ref):
    # p_ref: (4, Kp, Ho*Wo) bf16   patches for one image, grouped by pool pos
    # w_ref: (Cout, Kp)     bf16   conv weight (Kp = 3*3*Cin padded to 32)
    # b_ref: (Cout, 1)      f32
    # o_ref: (Cout, Ho*Wo)  bf16   already PyTorch (C, H, W) flatten order
    w = w_ref[...]
    y = jnp.dot(w, p_ref[0], preferred_element_type=jnp.float32)
    for j in range(1, 4):                       # static unroll: 2x2 pool window
        y = jnp.maximum(y, jnp.dot(w, p_ref[j],
                                   preferred_element_type=jnp.float32))
    # max_j(relu(x_j + b)) == relu(max_j(x_j) + b): bias/ReLU once, after max.
    o_ref[...] = jnp.maximum(y + b_ref[...], 0.0).astype(o_ref.dtype)


def conv_relu_pool(x_nchw, w_oihw, b):
    B, Cin, H, W = x_nchw.shape
    Cout = w_oihw.shape[0]
    Ho, Wo = H // 2, W // 2
    KP = 32  # im2col contraction (3*3*Cin = 27) padded to 32

    # im2col in the wrapper, grouped by pool position, bf16 (~256 KiB/image).
    # TODO(synk): at larger batch, compute the conv in-kernel from the raw
    # (Cin, H, W) input (9 accumulated matmuls over shifted views) to avoid
    # the ~10x im2col HBM blow-up.
    x_pad = jnp.pad(x_nchw, ((0, 0), (0, 0), (1, 1), (1, 1)))
    taps = jnp.stack(
        [x_pad[:, ci, dh:dh + H, dw:dw + W]
         for ci in range(Cin) for dh in range(3) for dw in range(3)],
        axis=1)                                              # (B, 27, H, W)
    pos = [taps[:, :, pi::2, pj::2].reshape(B, Cin * 9, Ho * Wo)
           for pi in range(2) for pj in range(2)]
    patches = jnp.stack(pos, axis=1)                         # (B, 4, 27, Ho*Wo)
    patches = jnp.pad(patches, ((0, 0), (0, 0), (0, KP - Cin * 9), (0, 0)))
    patches = patches.astype(jnp.bfloat16)

    # PyTorch OIHW weight -> (Cout, Kp) matmul operand, zero-padded columns.
    w_mat = jnp.pad(w_oihw.reshape(Cout, Cin * 9),
                    ((0, 0), (0, KP - Cin * 9))).astype(jnp.bfloat16)
    b2d = b.reshape(Cout, 1)

    flops = 2 * B * 4 * Cout * KP * (Ho * Wo)
    bytes_accessed = int(patches.size * 2 + w_mat.size * 2 + b2d.size * 4
                         + B * Cout * Ho * Wo * 2)

    return pl.pallas_call(
        _conv_relu_pool_kernel,
        out_shape=jax.ShapeDtypeStruct((B, Cout, Ho * Wo), jnp.bfloat16),
        grid_spec=pltpu.PrefetchScalarGridSpec(
            num_scalar_prefetch=0,
            grid=(B,),
            in_specs=[
                pl.BlockSpec((None, 4, KP, Ho * Wo), lambda i: (i, 0, 0, 0)),
                pl.BlockSpec((Cout, KP), lambda i: (0, 0)),
                pl.BlockSpec((Cout, 1), lambda i: (0, 0)),
            ],
            out_specs=pl.BlockSpec((None, Cout, Ho * Wo), lambda i: (i, 0, 0)),
        ),
        compiler_params=pltpu.CompilerParams(
            dimension_semantics=("parallel",)),
        cost_estimate=pl.CostEstimate(flops=flops, transcendentals=0,
                                      bytes_accessed=bytes_accessed),
    )(patches, w_mat, b2d)


# ---------------------------------------------------------------------------
# Kernel 2: fused MLP head: fc1 (bf16 weights & activations, K tiled,
#           f32-accumulated) + bias + ReLU + fc2 + softmax.
# ---------------------------------------------------------------------------
def _mlp_head_kernel(x_ref, w1_ref, b1_ref, w2_ref, b2_ref, o_ref, acc_ref):
    k = pl.program_id(0)

    @pl.when(k == 0)
    def _():
        acc_ref[...] = jnp.zeros_like(acc_ref)

    # fc1 partial product: bf16 x bf16 MXU matmul, f32 accumulation.
    acc_ref[...] += jnp.dot(x_ref[...], w1_ref[...],
                            preferred_element_type=jnp.float32)

    @pl.when(k == pl.num_programs(0) - 1)
    def _():
        h = jnp.maximum(acc_ref[...] + b1_ref[...], 0.0)               # ReLU
        logits = jnp.dot(h, w2_ref[...],
                         preferred_element_type=jnp.float32) + b2_ref[...]
        m = jnp.max(logits, axis=1, keepdims=True)
        e = jnp.exp(logits - m)
        o_ref[...] = e / jnp.sum(e, axis=1, keepdims=True)             # softmax


def mlp_head(x_flat, w1_bf16, b1, w2, b2, *, tk=16384):
    # x_flat: (B, K) bf16 activations in PyTorch flatten order.
    B, K = x_flat.shape
    H1 = w1_bf16.shape[1]
    C = w2.shape[1]
    assert K % tk == 0
    b1_2d = b1.reshape(1, H1)
    b2_2d = b2.reshape(1, C)

    flops = 2 * B * K * H1 + 2 * B * H1 * C
    bytes_accessed = int(x_flat.size * 2 + w1_bf16.size * 2 + w2.size * 4
                         + (H1 + C) * 4 + B * C * 4)

    # TODO(synk): on v7x, split the fc1 K reduction across the 2 TensorCores
    # (leading "parallel" axis of size 2, per-core (B, H1) partial outputs,
    # tiny combine + fc2 + softmax epilogue) to halve the dominant 8 MiB
    # per-core w1 stream.
    # TODO(synk): quantize w1 weight-only (int8 on v5e/v6e, fp8 on v7x) to
    # halve the HBM-bound weight stream again.
    return pl.pallas_call(
        _mlp_head_kernel,
        out_shape=jax.ShapeDtypeStruct((B, C), jnp.float32),
        grid_spec=pltpu.PrefetchScalarGridSpec(
            num_scalar_prefetch=0,
            grid=(K // tk,),
            in_specs=[
                pl.BlockSpec((B, tk), lambda k: (0, k)),
                pl.BlockSpec((tk, H1), lambda k: (k, 0)),
                pl.BlockSpec((1, H1), lambda k: (0, 0)),
                pl.BlockSpec((H1, C), lambda k: (0, 0)),
                pl.BlockSpec((1, C), lambda k: (0, 0)),
            ],
            out_specs=pl.BlockSpec((B, C), lambda k: (0, 0)),
            scratch_shapes=[pltpu.VMEM((B, H1), jnp.float32)],
        ),
        compiler_params=pltpu.CompilerParams(
            dimension_semantics=("arbitrary",)),
        cost_estimate=pl.CostEstimate(flops=flops, transcendentals=B * C,
                                      bytes_accessed=bytes_accessed),
    )(x_flat, w1_bf16, b1_2d, w2, b2_2d)


# ---------------------------------------------------------------------------
# Full forward pass (glue in plain JAX, hot paths in Pallas).
# ---------------------------------------------------------------------------
@jax.jit
def gesture_forward(x_nchw, params):
    pooled = conv_relu_pool(x_nchw, params["conv_w_oihw"], params["conv_b"])
    # pooled is (B, Cout, Ho*Wo) bf16 already in PyTorch (C, H, W) flatten
    # order, so the merge to (B, 32768) is a free row-major reshape.
    flat = pooled.reshape(x_nchw.shape[0], -1)
    # TODO(synk): fuse conv_relu_pool into the MLP head (conv into a VMEM
    # scratch under @pl.when(k == 0)) to drop this 256 KiB HBM round trip and
    # one kernel launch; kept separate here so every in-kernel op stays a
    # relayout-free (sublane, lane)-aligned block.
    return mlp_head(flat, params["w1"], params["b1"], params["w2"], params["b2"])


def init_params(key):
    k = jax.random.split(key, 6)
    Cin, Cout = 3, 32
    Kfc = 32 * 32 * 32
    H1 = 128

    def u(key, shape, fan_in):
        bound = 1.0 / np.sqrt(fan_in)
        return jax.random.uniform(key, shape, jnp.float32, -bound, bound)

    conv_w = u(k[0], (Cout, Cin, 3, 3), 3 * 3 * Cin)        # OIHW like PyTorch
    conv_b = u(k[1], (Cout,), 3 * 3 * Cin)
    w1 = u(k[2], (Kfc, H1), Kfc).astype(jnp.bfloat16)       # streamed as bf16
    b1 = u(k[3], (H1,), Kfc)
    w2 = u(k[4], (H1, NUM_CLASSES), H1)
    b2 = u(k[5], (NUM_CLASSES,), H1)
    return dict(conv_w_oihw=conv_w, conv_b=conv_b, w1=w1, b1=b1, w2=w2, b2=b2)


def reference_forward(x_nchw, params):
    """Pure-JAX f32 reference for correctness checking."""
    w_hwio = jnp.transpose(params["conv_w_oihw"], (2, 3, 1, 0))
    x = jnp.transpose(x_nchw, (0, 2, 3, 1))
    y = lax.conv_general_dilated(
        x, w_hwio, window_strides=(1, 1), padding="SAME",
        dimension_numbers=("NHWC", "HWIO", "NHWC"))
    y = jnp.maximum(y + params["conv_b"], 0.0)
    y = lax.reduce_window(y, -jnp.inf, lax.max,
                          (1, 2, 2, 1), (1, 2, 2, 1), "VALID")
    flat = jnp.transpose(y, (0, 3, 1, 2)).reshape(x_nchw.shape[0], -1)
    w1 = params["w1"].astype(jnp.float32)
    h = jnp.maximum(flat @ w1 + params["b1"], 0.0)
    logits = h @ params["w2"] + params["b2"]
    return jax.nn.softmax(logits, axis=1)


if __name__ == "__main__":
    key = jax.random.PRNGKey(0)
    pkey, xkey = jax.random.split(key)
    params = init_params(pkey)

    # Input implied by the module: fc1 expects 32*32*32, so spatial is 64x64.
    x = jax.random.normal(xkey, (2, 3, 64, 64), jnp.float32)

    out = gesture_forward(x, params)
    out = jax.block_until_ready(out)

    ref = jax.block_until_ready(reference_forward(x, params))
    assert out.shape == (2, NUM_CLASSES)
    assert np.allclose(np.asarray(out), np.asarray(ref), rtol=1e-2, atol=1e-3), (
        "Pallas output deviates from JAX reference")
    assert np.allclose(np.asarray(out).sum(axis=1), 1.0, atol=1e-4)

    print("KERNEL_OK")
</pallas_src>

<mosaic_0001>
module attributes {stable_mosaic.version = 11 : i64} {
  func.func @_conv_relu_pool_kernel(%arg0: i32, %arg1: memref<1x4x32x1024xbf16, #tpu.memory_space<vmem>>, %arg2: memref<32x32xbf16, #tpu.memory_space<vmem>>, %arg3: memref<32x1xf32, #tpu.memory_space<vmem>>, %arg4: memref<1x32x1024xbf16, #tpu.memory_space<vmem>>) attributes {dimension_semantics = [#tpu.dimension_semantics<parallel>], iteration_bounds = array<i64: 2>, scalar_prefetch = 0 : i64, scratch_operands = 0 : i64, tpu.core_type = #tpu.core_type<tc>, window_params = [{transform_indices = @transform_0, window_bounds = array<i64: 1, 4, 32, 1024>}, {pipeline_mode = #tpu.pipeline_mode<synchronous>, transform_indices = @transform_1, window_bounds = array<i64: 32, 32>}, {pipeline_mode = #tpu.pipeline_mode<synchronous>, transform_indices = @transform_2, window_bounds = array<i64: 32, 1>}, {transform_indices = @transform_3, window_bounds = array<i64: 1, 32, 1024>}]} {
    %c0 = arith.constant 0 : index
    %c0_0 = arith.constant 0 : index
    %0 = vector.load %arg2[%c0, %c0_0] : memref<32x32xbf16, #tpu.memory_space<vmem>>, vector<32x32xbf16>
    %c0_1 = arith.constant 0 : index
    %c0_2 = arith.constant 0 : index
    %c0_3 = arith.constant 0 : index
    %c0_4 = arith.constant 0 : index
    %1 = vector.load %arg1[%c0_1, %c0_2, %c0_3, %c0_4] : memref<1x4x32x1024xbf16, #tpu.memory_space<vmem>>, vector<1x1x32x1024xbf16>
    %2 = vector.shape_cast %1 : vector<1x1x32x1024xbf16> to vector<32x1024xbf16>
    %cst = arith.constant dense<0.000000e+00> : vector<32x1024xf32>
    %3 = tpu.matmul %0, %2, %cst {dimension_numbers = #tpu.dot_dimension_numbers<[1], [0], [0], [1], [0, 0, 1, 1], [], []>} : vector<32x32xbf16>, vector<32x1024xbf16>, vector<32x1024xf32> -> vector<32x1024xf32>
    %c0_5 = arith.constant 0 : index
    %c1 = arith.constant 1 : index
    %c0_6 = arith.constant 0 : index
    %c0_7 = arith.constant 0 : index
    %4 = vector.load %arg1[%c0_5, %c1, %c0_6, %c0_7] : memref<1x4x32x1024xbf16, #tpu.memory_space<vmem>>, vector<1x1x32x1024xbf16>
    %5 = vector.shape_cast %4 : vector<1x1x32x1024xbf16> to vector<32x1024xbf16>
    %cst_8 = arith.constant dense<0.000000e+00> : vector<32x1024xf32>
    %6 = tpu.matmul %0, %5, %cst_8 {dimension_numbers = #tpu.dot_dimension_numbers<[1], [0], [0], [1], [0, 0, 1, 1], [], []>} : vector<32x32xbf16>, vector<32x1024xbf16>, vector<32x1024xf32> -> vector<32x1024xf32>
    %7 = arith.maximumf %3, %6 : vector<32x1024xf32>
    %c0_9 = arith.constant 0 : index
    %c2 = arith.constant 2 : index
    %c0_10 = arith.constant 0 : index
    %c0_11 = arith.constant 0 : index
    %8 = vector.load %arg1[%c0_9, %c2, %c0_10, %c0_11] : memref<1x4x32x1024xbf16, #tpu.memory_space<vmem>>, vector<1x1x32x1024xbf16>
    %9 = vector.shape_cast %8 : vector<1x1x32x1024xbf16> to vector<32x1024xbf16>
    %cst_12 = arith.constant dense<0.000000e+00> : vector<32x1024xf32>
    %10 = tpu.matmul %0, %9, %cst_12 {dimension_numbers = #tpu.dot_dimension_numbers<[1], [0], [0], [1], [0, 0, 1, 1], [], []>} : vector<32x32xbf16>, vector<32x1024xbf16>, vector<32x1024xf32> -> vector<32x1024xf32>
    %11 = arith.maximumf %7, %10 : vector<32x1024xf32>
    %c0_13 = arith.constant 0 : index
    %c3 = arith.constant 3 : index
    %c0_14 = arith.constant 0 : index
    %c0_15 = arith.constant 0 : index
    %12 = vector.load %arg1[%c0_13, %c3, %c0_14, %c0_15] : memref<1x4x32x1024xbf16, #tpu.memory_space<vmem>>, vector<1x1x32x1024xbf16>
    %13 = vector.shape_cast %12 : vector<1x1x32x1024xbf16> to vector<32x1024xbf16>
    %cst_16 = arith.constant dense<0.000000e+00> : vector<32x1024xf32>
    %14 = tpu.matmul %0, %13, %cst_16 {dimension_numbers = #tpu.dot_dimension_numbers<[1], [0], [0], [1], [0, 0, 1, 1], [], []>} : vector<32x32xbf16>, vector<32x1024xbf16>, vector<32x1024xf32> -> vector<32x1024xf32>
    %15 = arith.maximumf %11, %14 : vector<32x1024xf32>
    %c0_17 = arith.constant 0 : index
    %c0_18 = arith.constant 0 : index
    %16 = vector.load %arg3[%c0_17, %c0_18] : memref<32x1xf32, #tpu.memory_space<vmem>>, vector<32x1xf32>
    %17 = vector.broadcast %16 : vector<32x1xf32> to vector<32x1024xf32>
    %18 = arith.addf %15, %17 : vector<32x1024xf32>
    %cst_19 = arith.constant 0.000000e+00 : f32
    %19 = vector.broadcast %cst_19 : f32 to vector<32x1024xf32>
    %20 = arith.maximumf %18, %19 : vector<32x1024xf32>
    %21 = arith.truncf %20 : vector<32x1024xf32> to vector<32x1024xbf16>
    %c0_20 = arith.constant 0 : index
    %c0_21 = arith.constant 0 : index
    %c0_22 = arith.constant 0 : index
    %22 = vector.load %arg4[%c0_20, %c0_21, %c0_22] : memref<1x32x1024xbf16, #tpu.memory_space<vmem>>, vector<1x32x1024xbf16>
    %23 = vector.shape_cast %22 : vector<1x32x1024xbf16> to vector<32x1024xbf16>
    %24 = vector.shape_cast %21 : vector<32x1024xbf16> to vector<1x32x1024xbf16>
    tpu.vector_store %arg4[%c0_20, %c0_21, %c0_22], %24 {strides = array<i32>} : memref<1x32x1024xbf16, #tpu.memory_space<vmem>>, vector<1x32x1024xbf16>,
    return
  }
  func.func @transform_0(%arg0: i32) -> (i32, i32, i32, i32) {
    %c0_i32 = arith.constant 0 : i32
    %c0_i32_0 = arith.constant 0 : i32
    %c0_i32_1 = arith.constant 0 : i32
    %c0_i32_2 = arith.constant 0 : i32
    return %arg0, %c0_i32, %c0_i32_0, %c0_i32_1 : i32, i32, i32, i32
  }
  func.func @transform_1(%arg0: i32) -> (i32, i32) {
    %c0_i32 = arith.constant 0 : i32
    %c0_i32_0 = arith.constant 0 : i32
    %c0_i32_1 = arith.constant 0 : i32
    return %c0_i32, %c0_i32_0 : i32, i32
  }
  func.func @transform_2(%arg0: i32) -> (i32, i32) {
    %c0_i32 = arith.constant 0 : i32
    %c0_i32_0 = arith.constant 0 : i32
    %c0_i32_1 = arith.constant 0 : i32
    return %c0_i32, %c0_i32_0 : i32, i32
  }
  func.func @transform_3(%arg0: i32) -> (i32, i32, i32) {
    %c0_i32 = arith.constant 0 : i32
    %c0_i32_0 = arith.constant 0 : i32
    %c0_i32_1 = arith.constant 0 : i32
    return %arg0, %c0_i32, %c0_i32_0 : i32, i32, i32
  }
}

module attributes {stable_mosaic.version = 11 : i64} {
  func.func @_mlp_head_kernel(%arg0: i32, %arg1: memref<2x16384xbf16, #tpu.memory_space<vmem>>, %arg2: memref<16384x128xbf16, #tpu.memory_space<vmem>>, %arg3: memref<1x128xf32, #tpu.memory_space<vmem>>, %arg4: memref<128x10xf32, #tpu.memory_space<vmem>>, %arg5: memref<1x10xf32, #tpu.memory_space<vmem>>, %arg6: memref<2x10xf32, #tpu.memory_space<vmem>>, %arg7: memref<2x128xf32, #tpu.memory_space<vmem>>) attributes {dimension_semantics = [#tpu.dimension_semantics<arbitrary>], iteration_bounds = array<i64: 2>, scalar_prefetch = 0 : i64, scratch_operands = 1 : i64, tpu.core_type = #tpu.core_type<tc>, window_params = [{transform_indices = @transform_0, window_bounds = array<i64: 2, 16384>}, {transform_indices = @transform_1, window_bounds = array<i64: 16384, 128>}, {pipeline_mode = #tpu.pipeline_mode<synchronous>, transform_indices = @transform_2, window_bounds = array<i64: 1, 128>}, {pipeline_mode = #tpu.pipeline_mode<synchronous>, transform_indices = @transform_3, window_bounds = array<i64: 128, 10>}, {pipeline_mode = #tpu.pipeline_mode<synchronous>, transform_indices = @transform_4, window_bounds = array<i64: 1, 10>}, {pipeline_mode = #tpu.pipeline_mode<synchronous>, transform_indices = @transform_5, window_bounds = array<i64: 2, 10>}]} {
    %c0_i32 = arith.constant 0 : i32
    %0 = arith.cmpi eq, %arg0, %c0_i32 : i32
    %1 = arith.extui %0 : i1 to i32
    %c0_i32_0 = arith.constant 0 : i32
    %2 = arith.cmpi ne, %1, %c0_i32_0 : i32
    scf.if %2 {
      %cst_9 = arith.constant 0.000000e+00 : f32
      %12 = vector.broadcast %cst_9 : f32 to vector<2x128xf32>
      %c0_10 = arith.constant 0 : index
      %c0_11 = arith.constant 0 : index
      %13 = vector.load %arg7[%c0_10, %c0_11] : memref<2x128xf32, #tpu.memory_space<vmem>>, vector<2x128xf32>
      tpu.vector_store %arg7[%c0_10, %c0_11], %12 {strides = array<i32>} : memref<2x128xf32, #tpu.memory_space<vmem>>, vector<2x128xf32>,
    } else {
    }
    %c0 = arith.constant 0 : index
    %c0_1 = arith.constant 0 : index
    %3 = vector.load %arg7[%c0, %c0_1] : memref<2x128xf32, #tpu.memory_space<vmem>>, vector<2x128xf32>
    %c0_2 = arith.constant 0 : index
    %c0_3 = arith.constant 0 : index
    %4 = vector.load %arg1[%c0_2, %c0_3] : memref<2x16384xbf16, #tpu.memory_space<vmem>>, vector<2x16384xbf16>
    %c0_4 = arith.constant 0 : index
    %c0_5 = arith.constant 0 : index
    %5 = vector.load %arg2[%c0_4, %c0_5] : memref<16384x128xbf16, #tpu.memory_space<vmem>>, vector<16384x128xbf16>
    %cst = arith.constant dense<0.000000e+00> : vector<2x128xf32>
    %6 = tpu.matmul %4, %5, %cst {dimension_numbers = #tpu.dot_dimension_numbers<[1], [0], [0], [1], [0, 0, 1, 1], [], []>} : vector<2x16384xbf16>, vector<16384x128xbf16>, vector<2x128xf32> -> vector<2x128xf32>
    %7 = arith.addf %3, %6 : vector<2x128xf32>
    %c0_6 = arith.constant 0 : index
    %c0_7 = arith.constant 0 : index
    %8 = vector.load %arg7[%c0_6, %c0_7] : memref<2x128xf32, #tpu.memory_space<vmem>>, vector<2x128xf32>
    tpu.vector_store %arg7[%c0_6, %c0_7], %7 {strides = array<i32>} : memref<2x128xf32, #tpu.memory_space<vmem>>, vector<2x128xf32>,
    %c1_i32 = arith.constant 1 : i32
    %9 = arith.cmpi eq, %arg0, %c1_i32 : i32
    %10 = arith.extui %9 : i1 to i32
    %c0_i32_8 = arith.constant 0 : i32
    %11 = arith.cmpi ne, %10, %c0_i32_8 : i32
    scf.if %11 {
      %c0_9 = arith.constant 0 : index
      %c0_10 = arith.constant 0 : index
      %12 = vector.load %arg7[%c0_9, %c0_10] : memref<2x128xf32, #tpu.memory_space<vmem>>, vector<2x128xf32>
      %c0_11 = arith.constant 0 : index
      %c0_12 = arith.constant 0 : index
      %13 = vector.load %arg3[%c0_11, %c0_12] : memref<1x128xf32, #tpu.memory_space<vmem>>, vector<1x128xf32>
      %14 = vector.broadcast %13 : vector<1x128xf32> to vector<2x128xf32>
      %15 = arith.addf %12, %14 : vector<2x128xf32>
      %cst_13 = arith.constant 0.000000e+00 : f32
      %16 = vector.broadcast %cst_13 : f32 to vector<2x128xf32>
      %17 = arith.maximumf %15, %16 : vector<2x128xf32>
      %c0_14 = arith.constant 0 : index
      %c0_15 = arith.constant 0 : index
      %18 = vector.load %arg4[%c0_14, %c0_15] : memref<128x10xf32, #tpu.memory_space<vmem>>, vector<128x10xf32>
      %cst_16 = arith.constant dense<0.000000e+00> : vector<2x10xf32>
      %19 = tpu.matmul %17, %18, %cst_16 {dimension_numbers = #tpu.dot_dimension_numbers<[1], [0], [0], [1], [0, 0, 1, 1], [], []>} : vector<2x128xf32>, vector<128x10xf32>, vector<2x10xf32> -> vector<2x10xf32>
      %c0_17 = arith.constant 0 : index
      %c0_18 = arith.constant 0 : index
      %20 = vector.load %arg5[%c0_17, %c0_18] : memref<1x10xf32, #tpu.memory_space<vmem>>, vector<1x10xf32>
      %21 = vector.broadcast %20 : vector<1x10xf32> to vector<2x10xf32>
      %22 = arith.addf %19, %21 : vector<2x10xf32>
      %cst_19 = arith.constant dense<0xFF800000> : vector<2xf32>
      %23 = vector.multi_reduction <maximumf>, %22, %cst_19 [1] : vector<2x10xf32> to vector<2xf32>
      %24 = vector.shape_cast %23 : vector<2xf32> to vector<2x1xf32>
      %25 = vector.broadcast %24 : vector<2x1xf32> to vector<2x10xf32>
      %26 = arith.subf %22, %25 : vector<2x10xf32>
      %27 = math.exp %26 : vector<2x10xf32>
      %cst_20 = arith.constant dense<0.000000e+00> : vector<2xf32>
      %28 = vector.multi_reduction <add>, %27, %cst_20 [1] : vector<2x10xf32> to vector<2xf32>
      %29 = vector.shape_cast %28 : vector<2xf32> to vector<2x1xf32>
      %30 = vector.broadcast %29 : vector<2x1xf32> to vector<2x10xf32>
      %31 = arith.divf %27, %30 : vector<2x10xf32>
      %c0_21 = arith.constant 0 : index
      %c0_22 = arith.constant 0 : index
      %32 = vector.load %arg6[%c0_21, %c0_22] : memref<2x10xf32, #tpu.memory_space<vmem>>, vector<2x10xf32>
      tpu.vector_store %arg6[%c0_21, %c0_22], %31 {strides = array<i32>} : memref<2x10xf32, #tpu.memory_space<vmem>>, vector<2x10xf32>,
    } else {
    }
    return
  }
  func.func @transform_0(%arg0: i32) -> (i32, i32) {
    %c0_i32 = arith.constant 0 : i32
    %c0_i32_0 = arith.constant 0 : i32
    return %c0_i32, %arg0 : i32, i32
  }
  func.func @transform_1(%arg0: i32) -> (i32, i32) {
    %c0_i32 = arith.constant 0 : i32
    %c0_i32_0 = arith.constant 0 : i32
    return %arg0, %c0_i32 : i32, i32
  }
  func.func @transform_2(%arg0: i32) -> (i32, i32) {
    %c0_i32 = arith.constant 0 : i32
    %c0_i32_0 = arith.constant 0 : i32
    %c0_i32_1 = arith.constant 0 : i32
    return %c0_i32, %c0_i32_0 : i32, i32
  }
  func.func @transform_3(%arg0: i32) -> (i32, i32) {
    %c0_i32 = arith.constant 0 : i32
    %c0_i32_0 = arith.constant 0 : i32
    %c0_i32_1 = arith.constant 0 : i32
    return %c0_i32, %c0_i32_0 : i32, i32
  }
  func.func @transform_4(%arg0: i32) -> (i32, i32) {
    %c0_i32 = arith.constant 0 : i32
    %c0_i32_0 = arith.constant 0 : i32
    %c0_i32_1 = arith.constant 0 : i32
    return %c0_i32, %c0_i32_0 : i32, i32
  }
  func.func @transform_5(%arg0: i32) -> (i32, i32) {
    %c0_i32 = arith.constant 0 : i32
    %c0_i32_0 = arith.constant 0 : i32
    %c0_i32_1 = arith.constant 0 : i32
    return %c0_i32, %c0_i32_0 : i32, i32
  }
}

</mosaic_0001>

<bundles_post_ra>
// kernel: gesture_forward.2
= control target key start
LH: loop header
LB: loop body
LE: loop exit
PB: predicated region body
PF: predicated region fallthrough
CT: control target
= control target key end

     0   :  { %s2012_s12 = smov 0   ;;  %s2643_s0 = inlined_call_operand.vmem [shape: bf16[2,4,32,1024], index: 0, kind: input, shape index: {}]   ;;  %s2644_s1 = inlined_call_operand.vmem [shape: bf16[32,32], index: 1, kind: input, shape index: {}]   ;;  %s2645_s2 = inlined_call_operand.vmem [shape: f32[32,1], index: 2, kind: input, shape index: {}]   ;;  %s2646_s3 = inlined_call_operand.vmem [shape: bf16[2,32,1024], index: 3, kind: output, shape index: {}]  }
   0x1 LB: > { %s1779_s13 = sadd.s32 4294967295, %s1989_s12   ;;  %p1783_p0 = scmp.ge.s32.totalorder %s1989_s12, 1  ;;  %s1989_s12 = sphi %s2012_s12, %s13_s12  }
   0x2   : > { %p137_p1 = scmp.lt.s32.totalorder %s1989_s12, 3 }
   0x4   : > { %p138_p2 = pnand %p1783_p0, %p137_p1 }
   0x6   : > { %141 = sbr.rel (%p138_p2) target bundleno = 360 (0x168), region = 32 }
   0xb   : > { %p161_p3 = scmp.lt.s32.totalorder %s1779_s13, 1  ;;  %v1991_v0 = vmov 0   ;;  %v2047_v23 = vld [vmem:[%s2644_s1] sm:$0xff]   ;;  %vm282_vm0 = vcmask 261120   ;;  %v2066_v40 = vld [vmem:[%s2644_s1 + $0x8] sm:$0xff]   ;;  %v1526_v42 = vld [vmem:[%s2645_s2 + $0x10] sm:$0xff] }
   0xc   : > { %321 = vmatprep.mubr.bf16.mxu0 %v1991_v0  ;;  %374 = vmatprep.mubr.bf16.mxu1 %v1991_v0  ;;  %v1524_v41 = vld [vmem:[%s2645_s2] sm:$0xff]  ;;  %v1525_v45 = vld [vmem:[%s2645_s2 + $0x8] sm:$0xff]  ;;  %v1527_v49 = vld [vmem:[%s2645_s2 + $0x18] sm:$0xff] }
   0xd   : > { %s2751_s13 = smov (!%p161_p3, %s1779_s13), 1  ;;  %1979 = vset.pattern.permute.xlu0 %v1991_v0  ;;  %1980 = vset.pattern.permute.xlu1 %v1991_v0 }
   0xe   : > { %s1952_s14 = sshll.u32 %s2751_s13, 9  ;;  %1530 = vperm.xlu0 %1979, %v1524_v41   ;;  %1540 = vperm.xlu1 %1980, %v1526_v42   ;;  %s1953_s30 = sshll.u32 %s2751_s13, 7 }
   0xf   : > { %s2030_s17 = scalar_lea.vmem %s2643_s0, %s1952_s14  ;;  %s2523_s6 = scalar_lea.vmem %s2646_s3, %s1953_s30 }
  0x10   : > { %v184_v1 = vld [vmem:[%s2030_s17 + $0x40] sm:$0xff]  ;;  %v185_v3 = vld [vmem:[%s2030_s17 + $0x48] sm:$0xff]  ;;  %v186_v14 = vld [vmem:[%s2030_s17 + $0x50] sm:$0xff] }
  0x11   : > { %v188_v2 = vld [vmem:[%s2030_s17 + $0x60] sm:$0xff]  ;;  %v189_v5 = vld [vmem:[%s2030_s17 + $0x68] sm:$0xff]  ;;  %v190_v16 = vld [vmem:[%s2030_s17 + $0x70] sm:$0xff] }
  0x12   : > { %v1799_v4 = vcombine.high %v184_v1, %v188_v2  ;;  %v1798_v6 = vcombine.low %v184_v1, %v188_v2  ;;  %v176_v7 = vld [vmem:[%s2030_s17] sm:$0xff]  ;;  %v1801_v9 = vcombine.high %v185_v3, %v189_v5  ;;  %v1800_v10 = vcombine.low %v185_v3, %v189_v5  ;;  %v177_v12 = vld [vmem:[%s2030_s17 + $0x8] sm:$0xff]  ;;  %v187_v17 = vld [vmem:[%s2030_s17 + $0x58] sm:$0xff]  ;;  %1535 = vperm.xlu0 %1979, %v1525_v45  }
  0x13   : > { %v180_v8 = vld [vmem:[%s2030_s17 + $0x20] sm:$0xff]  ;;  %v181_v13 = vld [vmem:[%s2030_s17 + $0x28] sm:$0xff]  ;;  %v191_v18 = vld [vmem:[%s2030_s17 + $0x78] sm:$0xff]  ;;  %v1803_v21 = vcombine.high %v186_v14, %v190_v16  ;;  %v1802_v26 = vcombine.low %v186_v14, %v190_v16  ;;  %1545 = vperm.xlu1 %1980, %v1527_v49  }
  0x14   : > { %v1791_v11 = vcombine.high %v176_v7, %v180_v8  ;;  %301 = vmatprep.subr.bf16.mxu0 %v1799_v4  ;;  %v1793_v15 = vcombine.high %v177_v12, %v181_v13  ;;  %354 = vmatprep.subr.bf16.mxu1 %v1801_v9  ;;  %v1790_v19 = vcombine.low %v176_v7, %v180_v8  ;;  %v178_v24 = vld [vmem:[%s2030_s17 + $0x10] sm:$0xff]  ;;  %v179_v27 = vld [vmem:[%s2030_s17 + $0x18] sm:$0xff]  ;;  %v1822_v31 = vld [vmem:[%s2030_s17 + $0xc0] sm:$0xff] }
  0x15   : > { %302 = vmatpush1.bf16.msra.mxu0 %v1798_v6  ;;  %355 = vmatpush1.bf16.msra.mxu1 %v1800_v10  ;;  %v1792_v20 = vcombine.low %v177_v12, %v181_v13  ;;  %v1805_v22 = vcombine.high %v187_v17, %v191_v18  ;;  %v182_v25 = vld [vmem:[%s2030_s17 + $0x30] sm:$0xff]  ;;  %v183_v28 = vld [vmem:[%s2030_s17 + $0x38] sm:$0xff]  ;;  %v1804_v29 = vcombine.low %v187_v17, %v191_v18  ;;  %v1826_v32 = vld [vmem:[%s2030_s17 + $0xe0] sm:$0xff] }
  0x16   : > { %303 = vmatprep.subr.bf16.mxu0 %v1791_v11  ;;  %356 = vmatprep.subr.bf16.mxu1 %v1793_v15  ;;  %v1795_v30 = vcombine.high %v178_v24, %v182_v25  ;;  %v1797_v33 = vcombine.high %v179_v27, %v183_v28  ;;  %v1823_v34 = vld [vmem:[%s2030_s17 + $0xc8] sm:$0xff]  ;;  %v1794_v36 = vcombine.low %v178_v24, %v182_v25  ;;  %v1814_v43 = vld [vmem:[%s2030_s17 + $0x80] sm:$0xff]  ;;  %v1824_v52 = vld [vmem:[%s2030_s17 + $0xd0] sm:$0xff] }
  0x17   : > { %v1827_v35 = vld [vmem:[%s2030_s17 + $0xe8] sm:$0xff]  ;;  %v1796_v37 = vcombine.low %v179_v27, %v183_v28  ;;  %v1839_v38 = vcombine.high %v1822_v31, %v1826_v32  ;;  %v1818_v44 = vld [vmem:[%s2030_s17 + $0xa0] sm:$0xff]  ;;  %v1838_v46 = vcombine.low %v1822_v31, %v1826_v32  ;;  %v1828_v53 = vld [vmem:[%s2030_s17 + $0xf0] sm:$0xff] }
  0x18   : > { %v1841_v39 = vcombine.high %v1823_v34, %v1827_v35  ;;  %v1815_v47 = vld [vmem:[%s2030_s17 + $0x88] sm:$0xff]  ;;  %v1840_v50 = vcombine.low %v1823_v34, %v1827_v35  ;;  %v1831_v51 = vcombine.high %v1814_v43, %v1818_v44  ;;  %v1825_v55 = vld [vmem:[%s2030_s17 + $0xd8] sm:$0xff]  ;;  %v1830_v57 = vcombine.low %v1814_v43, %v1818_v44  ;;  %v1816_v61 = vld [vmem:[%s2030_s17 + $0x90] sm:$0xff] }
  0x19   : > { %304 = vmatpush1.bf16.msra.mxu0 %v1790_v19  ;;  %357 = vmatpush1.bf16.msra.mxu1 %v1792_v20  ;;  %v1819_v48 = vld [vmem:[%s2030_s17 + $0xa8] sm:$0xff]  ;;  %v1829_v56 = vld [vmem:[%s2030_s17 + $0xf8] sm:$0xff]  ;;  %v1843_v59 = vcombine.high %v1824_v52, %v1828_v53  ;;  %v1820_v62 = vld [vmem:[%s2030_s17 + $0xb0] sm:$0xff]  ;;  %v1842_v63 = vcombine.low %v1824_v52, %v1828_v53 }
  0x1a   : > { %407 = vmatprep.subr.bf16.mxu0 %v1803_v21  ;;  %460 = vmatprep.subr.bf16.mxu1 %v1805_v22  ;;  %v1833_v54 = vcombine.high %v1815_v47, %v1819_v48  ;;  %v1832_v58 = vcombine.low %v1815_v47, %v1819_v48  ;;  %v1845_v60 = vcombine.high %v1825_v55, %v1829_v56  ;;  %v1817_v1 = vld [vmem:[%s2030_s17 + $0x98] sm:$0xff]  ;;  %v1862_v5 = vld [vmem:[%s2030_s17 + $0x140] sm:$0xff]  ;;  %v1863_v8 = vld [vmem:[%s2030_s17 + $0x148] sm:$0xff] }
  0x1b   : > { %v1821_v2 = vld [vmem:[%s2030_s17 + $0xb8] sm:$0xff]  ;;  %v1844_v3 = vcombine.low %v1825_v55, %v1829_v56  ;;  %v1835_v4 = vcombine.high %v1816_v61, %v1820_v62  ;;  %v1866_v6 = vld [vmem:[%s2030_s17 + $0x160] sm:$0xff]  ;;  %v1867_v9 = vld [vmem:[%s2030_s17 + $0x168] sm:$0xff]  ;;  %v1834_v10 = vcombine.low %v1816_v61, %v1820_v62 }
  0x1c   : > { %1806 = vmatmul.mubr.msk.bf16.vlgmr.msra.gmra.mxu0 %vm282_vm0, %v2047_v23  ;;  %1808 = vmatmul.mubr.msk.bf16.vlgmr.msra.gmra.mxu1 %vm282_vm0, %v2047_v23  ;;  %v1837_v7 = vcombine.high %v1817_v1, %v1821_v2  ;;  %v1836_v11 = vcombine.low %v1817_v1, %v1821_v2  ;;  %v1879_v12 = vcombine.high %v1862_v5, %v1866_v6  ;;  %v1854_v14 = vld [vmem:[%s2030_s17 + $0x100] sm:$0xff]  ;;  %v1855_v17 = vld [vmem:[%s2030_s17 + $0x108] sm:$0xff]  ;;  %v1864_v21 = vld [vmem:[%s2030_s17 + $0x150] sm:$0xff] }
  0x1d   : > { %408 = vmatpush1.bf16.msra.mxu0 %v1802_v26  ;;  %461 = vmatpush1.bf16.msra.mxu1 %v1804_v29  ;;  %v1881_v13 = vcombine.high %v1863_v8, %v1867_v9  ;;  %v1858_v15 = vld [vmem:[%s2030_s17 + $0x120] sm:$0xff]  ;;  %v1878_v16 = vcombine.low %v1862_v5, %v1866_v6  ;;  %v1859_v18 = vld [vmem:[%s2030_s17 + $0x128] sm:$0xff]  ;;  %v1880_v19 = vcombine.low %v1863_v8, %v1867_v9  ;;  %v1868_v22 = vld [vmem:[%s2030_s17 + $0x170] sm:$0xff] }
  0x1e   : > { %331 = vmatprep.mubr.bf16.mxu0 %v1991_v0  ;;  %384 = vmatprep.mubr.bf16.mxu1 %v1991_v0  ;;  %v1871_v20 = vcombine.high %v1854_v14, %v1858_v15  ;;  %v1873_v24 = vcombine.high %v1855_v17, %v1859_v18  ;;  %v1865_v25 = vld [vmem:[%s2030_s17 + $0x158] sm:$0xff]  ;;  %v1870_v27 = vcombine.low %v1854_v14, %v1858_v15  ;;  %v1856_v31 = vld [vmem:[%s2030_s17 + $0x110] sm:$0xff]  ;;  %v1903_v42 = vld [vmem:[%s2030_s17 + $0x1c8] sm:$0xff] }
  0x1f   : > { %409 = vmatprep.subr.bf16.mxu0 %v1795_v30  ;;  %462 = vmatprep.subr.bf16.mxu1 %v1797_v33  ;;  %v1869_v26 = vld [vmem:[%s2030_s17 + $0x178] sm:$0xff]  ;;  %v1872_v28 = vcombine.low %v1855_v17, %v1859_v18  ;;  %v1883_v29 = vcombine.high %v1864_v21, %v1868_v22  ;;  %v1860_v32 = vld [vmem:[%s2030_s17 + $0x130] sm:$0xff]  ;;  %v1882_v33 = vcombine.low %v1864_v21, %v1868_v22  ;;  %v1907_v43 = vld [vmem:[%s2030_s17 + $0x1e8] sm:$0xff] }
  0x20   : > { %v1885_v30 = vcombine.high %v1865_v25, %v1869_v26  ;;  %v1857_v34 = vld [vmem:[%s2030_s17 + $0x118] sm:$0xff]  ;;  %v1874_v44 = vcombine.low %v1856_v31, %v1860_v32  ;;  %v1921_v47 = vcombine.high %v1903_v42, %v1907_v43  ;;  %v1894_v48 = vld [vmem:[%s2030_s17 + $0x180] sm:$0xff]  ;;  %v1899_v52 = vld [vmem:[%s2030_s17 + $0x1a8] sm:$0xff]  ;;  %v1920_v53 = vcombine.low %v1903_v42, %v1907_v43 }
  0x21   : > { %410 = vmatpush1.bf16.msra.mxu0 %v1794_v36  ;;  %463 = vmatpush1.bf16.msra.mxu1 %v1796_v37  ;;  %v1861_v35 = vld [vmem:[%s2030_s17 + $0x138] sm:$0xff]  ;;  %v1884_v36 = vcombine.low %v1865_v25, %v1869_v26  ;;  %v1875_v37 = vcombine.high %v1856_v31, %v1860_v32  ;;  %v1898_v49 = vld [vmem:[%s2030_s17 + $0x1a0] sm:$0xff]  ;;  %v1904_v55 = vld [vmem:[%s2030_s17 + $0x1d0] sm:$0xff] }
  0x22   : > { %610 = vmatprep.subr.bf16.mxu0 %v1839_v38  ;;  %663 = vmatprep.subr.bf16.mxu1 %v1841_v39  ;;  %v1902_v38 = vld [vmem:[%s2030_s17 + $0x1c0] sm:$0xff]  ;;  %v1877_v41 = vcombine.high %v1857_v34, %v1861_v35  ;;  %v1876_v45 = vcombine.low %v1857_v34, %v1861_v35  ;;  %v1908_v56 = vld [vmem:[%s2030_s17 + $0x1f0] sm:$0xff]  ;;  %v1901_v5 = vld [vmem:[%s2030_s17 + $0x1b8] sm:$0xff] }
  0x23   : > { %v1906_v39 = vld [vmem:[%s2030_s17 + $0x1e0] sm:$0xff]  ;;  %v1923_v62 = vcombine.high %v1904_v55, %v1908_v56  ;;  %v1896_v1 = vld [vmem:[%s2030_s17 + $0x190] sm:$0xff] }
  0x24   : > { %1807 = vmatmul.mubr.msk.bf16.gmra.mxu0 %vm282_vm0, %v2066_v40  ;;  %1809 = vmatmul.mubr.msk.bf16.gmra.mxu1 %vm282_vm0, %v2066_v40  ;;  %v1900_v2 = vld [vmem:[%s2030_s17 + $0x1b0] sm:$0xff] }
  0x25   : > { %427 = vmatprep.mubr.bf16.mxu0 %v1991_v0  ;;  %480 = vmatprep.mubr.bf16.mxu1 %v1991_v0  ;;  %v1914_v9 = vcombine.low %v1896_v1, %v1900_v2 }
  0x2c   : > { %1810 = vmatmul.mubr.msk.bf16.vlgmr.msra.gmra.mxu0 %vm282_vm0, %v2047_v23  ;;  %1812 = vmatmul.mubr.msk.bf16.vlgmr.msra.gmra.mxu1 %vm282_vm0, %v2047_v23 }
  0x2d   : > { %611 = vmatpush1.bf16.msra.mxu0 %v1838_v46  ;;  %664 = vmatpush1.bf16.msra.mxu1 %v1840_v50  ;;  %v1919_v46 = vcombine.high %v1902_v38, %v1906_v39  ;;  %v1918_v50 = vcombine.low %v1902_v38, %v1906_v39 }
  0x2e   : > { %437 = vmatprep.mubr.bf16.mxu0 %v1991_v0  ;;  %490 = vmatprep.mubr.bf16.mxu1 %v1991_v0 }
  0x2f   : > { %612 = vmatprep.subr.bf16.mxu0 %v1831_v51  ;;  %665 = vmatprep.subr.bf16.mxu1 %v1833_v54  ;;  %v1895_v51 = vld [vmem:[%s2030_s17 + $0x188] sm:$0xff]  ;;  %v1911_v54 = vcombine.high %v1894_v48, %v1898_v49 }
  0x30   : > { %v1912_v61 = vcombine.low %v1895_v51, %v1899_v52 }
  0x31   : > { %613 = vmatpush1.bf16.msra.mxu0 %v1830_v57  ;;  %666 = vmatpush1.bf16.msra.mxu1 %v1832_v58  ;;  %v1913_v57 = vcombine.high %v1895_v51, %v1899_v52  ;;  %v1905_v58 = vld [vmem:[%s2030_s17 + $0x1d8] sm:$0xff] }
  0x32   : > { %716 = vmatprep.subr.bf16.mxu0 %v1843_v59  ;;  %769 = vmatprep.subr.bf16.mxu1 %v1845_v60  ;;  %v1909_v59 = vld [vmem:[%s2030_s17 + $0x1f8] sm:$0xff]  ;;  %v1910_v60 = vcombine.low %v1894_v48, %v1898_v49 }
  0x33   : > { %v1924_v6 = vcombine.low %v1905_v58, %v1909_v59 }
  0x34   : > { %1811 = vmatmul.mubr.msk.bf16.gmra.mxu0 %vm282_vm0, %v2066_v40  ;;  %1813 = vmatmul.mubr.msk.bf16.gmra.mxu1 %vm282_vm0, %v2066_v40 }
  0x35   : > { %630 = vmatprep.mubr.bf16.mxu0 %v1991_v0  ;;  %683 = vmatprep.mubr.bf16.mxu1 %v1991_v0 }
  0x3c   : > { %1846 = vmatmul.mubr.msk.bf16.vlgmr.msra.gmra.mxu0 %vm282_vm0, %v2047_v23  ;;  %1848 = vmatmul.mubr.msk.bf16.vlgmr.msra.gmra.mxu1 %vm282_vm0, %v2047_v23 }
  0x3d   : > { %717 = vmatpush1.bf16.msra.mxu0 %v1842_v63  ;;  %770 = vmatpush1.bf16.msra.mxu1 %v1844_v3  ;;  %v1925_v63 = vcombine.high %v1905_v58, %v1909_v59  ;;  %v1922_v3 = vcombine.low %v1904_v55, %v1908_v56 }
  0x3e   : > { %640 = vmatprep.mubr.bf16.mxu0 %v1991_v0  ;;  %693 = vmatprep.mubr.bf16.mxu1 %v1991_v0 }
  0x3f   : > { %718 = vmatprep.subr.bf16.mxu0 %v1835_v4  ;;  %771 = vmatprep.subr.bf16.mxu1 %v1837_v7  ;;  %v1897_v4 = vld [vmem:[%s2030_s17 + $0x198] sm:$0xff]  ;;  %v1915_v7 = vcombine.high %v1896_v1, %v1900_v2 }
  0x40   : > { %v1917_v8 = vcombine.high %v1897_v4, %v1901_v5 }
  0x41   : > { %719 = vmatpush1.bf16.msra.mxu0 %v1834_v10  ;;  %772 = vmatpush1.bf16.msra.mxu1 %v1836_v11  ;;  %v1916_v10 = vcombine.low %v1897_v4, %v1901_v5 }
  0x42   : > { %951 = vmatprep.subr.bf16.mxu0 %v1879_v12  ;;  %1004 = vmatprep.subr.bf16.mxu1 %v1881_v13 }
  0x44   : > { %1847 = vmatmul.mubr.msk.bf16.gmra.mxu0 %vm282_vm0, %v2066_v40  ;;  %1849 = vmatmul.mubr.msk.bf16.gmra.mxu1 %vm282_vm0, %v2066_v40 }
  0x45   : > { %736 = vmatprep.mubr.bf16.mxu0 %v1991_v0  ;;  %789 = vmatprep.mubr.bf16.mxu1 %v1991_v0 }
  0x4c   : > { %1850 = vmatmul.mubr.msk.bf16.vlgmr.msra.gmra.mxu0 %vm282_vm0, %v2047_v23  ;;  %1852 = vmatmul.mubr.msk.bf16.vlgmr.msra.gmra.mxu1 %vm282_vm0, %v2047_v23 }
  0x4d   : > { %952 = vmatpush1.bf16.msra.mxu0 %v1878_v16  ;;  %1005 = vmatpush1.bf16.msra.mxu1 %v1880_v19 }
  0x4e   : > { %746 = vmatprep.mubr.bf16.mxu0 %v1991_v0  ;;  %799 = vmatprep.mubr.bf16.mxu1 %v1991_v0 }
  0x4f   : > { %953 = vmatprep.subr.bf16.mxu0 %v1871_v20  ;;  %1006 = vmatprep.subr.bf16.mxu1 %v1873_v24 }
  0x51   : > { %954 = vmatpush1.bf16.msra.mxu0 %v1870_v27  ;;  %1007 = vmatpush1.bf16.msra.mxu1 %v1872_v28 }
  0x52   : > { %1057 = vmatprep.subr.bf16.mxu0 %v1883_v29  ;;  %1110 = vmatprep.subr.bf16.mxu1 %v1885_v30 }
  0x54   : > { %1851 = vmatmul.mubr.msk.bf16.gmra.mxu0 %vm282_vm0, %v2066_v40  ;;  %1853 = vmatmul.mubr.msk.bf16.gmra.mxu1 %vm282_vm0, %v2066_v40 }
  0x55   : > { %971 = vmatprep.mubr.bf16.mxu0 %v1991_v0  ;;  %1024 = vmatprep.mubr.bf16.mxu1 %v1991_v0 }
  0x5c   : > { %1886 = vmatmul.mubr.msk.bf16.vlgmr.msra.gmra.mxu0 %vm282_vm0, %v2047_v23  ;;  %1888 = vmatmul.mubr.msk.bf16.vlgmr.msra.gmra.mxu1 %vm282_vm0, %v2047_v23 }
  0x5d   : > { %1058 = vmatpush1.bf16.msra.mxu0 %v1882_v33  ;;  %1111 = vmatpush1.bf16.msra.mxu1 %v1884_v36 }
  0x5e   : > { %981 = vmatprep.mubr.bf16.mxu0 %v1991_v0  ;;  %1034 = vmatprep.mubr.bf16.mxu1 %v1991_v0 }
  0x5f   : > { %1059 = vmatprep.subr.bf16.mxu0 %v1875_v37  ;;  %1112 = vmatprep.subr.bf16.mxu1 %v1877_v41 }
  0x61   : > { %1060 = vmatpush1.bf16.msra.mxu0 %v1874_v44  ;;  %1113 = vmatpush1.bf16.msra.mxu1 %v1876_v45 }
  0x62   : > { %1292 = vmatprep.subr.bf16.mxu0 %v1919_v46  ;;  %1345 = vmatprep.subr.bf16.mxu1 %v1921_v47 }
  0x64   : > { %1887 = vmatmul.mubr.msk.bf16.gmra.mxu0 %vm282_vm0, %v2066_v40  ;;  %1889 = vmatmul.mubr.msk.bf16.gmra.mxu1 %vm282_vm0, %v2066_v40 }
  0x65   : > { %1077 = vmatprep.mubr.bf16.mxu0 %v1991_v0  ;;  %1130 = vmatprep.mubr.bf16.mxu1 %v1991_v0 }
  0x6c   : > { %1890 = vmatmul.mubr.msk.bf16.vlgmr.msra.gmra.mxu0 %vm282_vm0, %v2047_v23  ;;  %1892 = vmatmul.mubr.msk.bf16.vlgmr.msra.gmra.mxu1 %vm282_vm0, %v2047_v23 }
  0x6d   : > { %1293 = vmatpush1.bf16.msra.mxu0 %v1918_v50  ;;  %1346 = vmatpush1.bf16.msra.mxu1 %v1920_v53 }
  0x6e   : > { %1087 = vmatprep.mubr.bf16.mxu0 %v1991_v0  ;;  %1140 = vmatprep.mubr.bf16.mxu1 %v1991_v0 }
  0x6f   : > { %1294 = vmatprep.subr.bf16.mxu0 %v1911_v54  ;;  %1347 = vmatprep.subr.bf16.mxu1 %v1913_v57 }
  0x71   : > { %1295 = vmatpush1.bf16.msra.mxu0 %v1910_v60  ;;  %1348 = vmatpush1.bf16.msra.mxu1 %v1912_v61 }
  0x72   : > { %1398 = vmatprep.subr.bf16.mxu0 %v1923_v62  ;;  %1451 = vmatprep.subr.bf16.mxu1 %v1925_v63 }
  0x74   : > { %1891 = vmatmul.mubr.msk.bf16.gmra.mxu0 %vm282_vm0, %v2066_v40  ;;  %1893 = vmatmul.mubr.msk.bf16.gmra.mxu1 %vm282_vm0, %v2066_v40 }
  0x75   : > { %1312 = vmatprep.mubr.bf16.mxu0 %v1991_v0  ;;  %1365 = vmatprep.mubr.bf16.mxu1 %v1991_v0 }
  0x7c   : > { %1926 = vmatmul.mubr.msk.bf16.vlgmr.msra.gmra.mxu0 %vm282_vm0, %v2047_v23  ;;  %1928 = vmatmul.mubr.msk.bf16.vlgmr.msra.gmra.mxu1 %vm282_vm0, %v2047_v23 }
  0x7d   : > { %1399 = vmatpush1.bf16.msra.mxu0 %v1922_v3  ;;  %1452 = vmatpush1.bf16.msra.mxu1 %v1924_v6 }
  0x7e   : > { %1322 = vmatprep.mubr.bf16.mxu0 %v1991_v0  ;;  %1375 = vmatprep.mubr.bf16.mxu1 %v1991_v0 }
  0x7f   : > { %1400 = vmatprep.subr.bf16.mxu0 %v1915_v7  ;;  %1453 = vmatprep.subr.bf16.mxu1 %v1917_v8 }
  0x81   : > { %1401 = vmatpush1.bf16.msra.mxu0 %v1914_v9  ;;  %1454 = vmatpush1.bf16.msra.mxu1 %v1916_v10 }
  0x84   : > { %1927 = vmatmul.mubr.msk.bf16.gmra.mxu0 %vm282_vm0, %v2066_v40  ;;  %1929 = vmatmul.mubr.msk.bf16.gmra.mxu1 %vm282_vm0, %v2066_v40 }
  0x85   : > { %1418 = vmatprep.mubr.bf16.mxu0 %v1991_v0  ;;  %1471 = vmatprep.mubr.bf16.mxu1 %v1991_v0 }
  0x8c   : > { %1930 = vmatmul.mubr.msk.bf16.vlgmr.msra.gmra.mxu0 %vm282_vm0, %v2047_v23  ;;  %1932 = vmatmul.mubr.msk.bf16.vlgmr.msra.gmra.mxu1 %vm282_vm0, %v2047_v23 }
  0x8d   : > { %1428 = vmatprep.mubr.bf16.mxu0 %v1991_v0  ;;  %1481 = vmatprep.mubr.bf16.mxu1 %v1991_v0 }
  0x94   : > { %1931 = vmatmul.mubr.msk.bf16.gmra.mxu0 %vm282_vm0, %v2066_v40  ;;  %1933 = vmatmul.mubr.msk.bf16.gmra.mxu1 %vm282_vm0, %v2066_v40 }
  0xdc   : > { %v2212_v11 = vpop.f32.mrf.mxu0  ;;  %v2214_v12 = vpop.f32.mrf.mxu1 }
  0xde   : > { %v2216_v13 = vpop.f32.mrf.mxu0  ;;  %v2218_v14 = vpop.f32.mrf.mxu1 }
  0xe0   : > { %v2220_v15 = vpop.f32.mrf.mxu0  ;;  %v2222_v23 = vpop.f32.mrf.mxu1 }
  0xe2   : > { %v2224_v16 = vpop.f32.mrf.mxu0  ;;  %v2226_v0 = vpop.f32.mrf.mxu1 }
  0xe4   : > { %v2228_v17 = vpop.f32.mrf.mxu0  ;;  %v2230_v18 = vpop.f32.mrf.mxu1 }
  0xe6   : > { %v2232_v40 = vpop.f32.mrf.mxu0  ;;  %v2234_v19 = vpop.f32.mrf.mxu1 }
  0xe8   : > { %v2236_v20 = vpop.f32.mrf.mxu0  ;;  %v2238_v21 = vpop.f32.mrf.mxu1 }
  0xea   : > { %v2240_v22 = vpop.f32.mrf.mxu0  ;;  %v2242_v24 = vpop.f32.mrf.mxu1 }
  0xec   : > { %v2244_v25 = vpop.f32.mrf.mxu0  ;;  %v2246_v26 = vpop.f32.mrf.mxu1 }
  0xee   : > { %v2248_v27 = vpop.f32.mrf.mxu0  ;;  %v2250_v28 = vpop.f32.mrf.mxu1 }
  0xf0   : > { %v2252_v29 = vpop.f32.mrf.mxu0  ;;  %v2254_v30 = vpop.f32.mrf.mxu1 }
  0xf2   : > { %v2256_v31 = vpop.f32.mrf.mxu0  ;;  %v2258_v32 = vpop.f32.mrf.mxu1 }
  0xf4   : > { %v2260_v33 = vpop.f32.mrf.mxu0  ;;  %v2262_v34 = vpop.f32.mrf.mxu1 }
  0xf6   : > { %v2264_v35 = vpop.f32.mrf.mxu0  ;;  %v2266_v36 = vpop.f32.mrf.mxu1 }
  0xf7   : > { %2658 = vst [vmem:[#allocation2_spill] sm:$0xff] %v2264_v35  ;;  %2659 = vst [vmem:[#allocation3_spill] sm:$0xff] %v2266_v36 }
  0xf8   : > { %v2268_v37 = vpop.f32.mrf.mxu0  ;;  %v2270_v38 = vpop.f32.mrf.mxu1 }
  0xf9   : > { %2660 = vst [vmem:[#allocation4_spill] sm:$0xff] %v2268_v37  ;;  %2661 = vst [vmem:[#allocation5_spill] sm:$0xff] %v2270_v38 }
  0xfa   : > { %v2272_v39 = vpop.f32.mrf.mxu0  ;;  %v2274_v41 = vpop.f32.mrf.mxu1 }
  0xfb   : > { %2662 = vst [vmem:[#allocation6_spill] sm:$0xff] %v2272_v39  ;;  %2663 = vst [vmem:[#allocation7_spill] sm:$0xff] %v2274_v41 }
  0xfc   : > { %v2276_v42 = vpop.f32.mrf.mxu0  ;;  %v2278_v43 = vpop.f32.mrf.mxu1 }
  0xfe   : > { %v2280_v44 = vpop.f32.mrf.mxu0  ;;  %v2282_v45 = vpop.f32.mrf.mxu1 }
 0x100   : > { %v2284_v46 = vpop.f32.mrf.mxu0  ;;  %v2286_v47 = vpop.f32.mrf.mxu1 }
 0x102   : > { %v2288_v48 = vpop.f32.mrf.mxu0  ;;  %v2290_v49 = vpop.f32.mrf.mxu1 }
 0x104   : > { %v2292_v50 = vpop.f32.mrf.mxu0  ;;  %v2294_v51 = vpop.f32.mrf.mxu1 }
 0x106   : > { %v2296_v52 = vpop.f32.mrf.mxu0  ;;  %v2298_v53 = vpop.f32.mrf.mxu1 }
 0x108   : > { %v2300_v54 = vpop.f32.mrf.mxu0  ;;  %v2302_v55 = vpop.f32.mrf.mxu1 }
 0x10a   : > { %v2304_v56 = vpop.f32.mrf.mxu0  ;;  %v2306_v57 = vpop.f32.mrf.mxu1 }
 0x10c   : > { %v2308_v58 = vpop.f32.mrf.mxu0  ;;  %v2310_v59 = vpop.f32.mrf.mxu1 }
 0x10e   : > { %v2312_v60 = vpop.f32.mrf.mxu0  ;;  %v2314_v61 = vpop.f32.mrf.mxu1 }
 0x110   : > { %v2316_v62 = vpop.f32.mrf.mxu0  ;;  %v2318_v63 = vpop.f32.mrf.mxu1 }
 0x112   : > { %v2320_v1 = vpop.f32.mrf.mxu0  ;;  %v2322_v2 = vpop.f32.mrf.mxu1 }
 0x114   : > { %v2324_v3 = vpop.f32.mrf.mxu0  ;;  %v2326_v4 = vpop.f32.mrf.mxu1 }
 0x116   : > { %v2328_v5 = vpop.f32.mrf.mxu0  ;;  %v2330_v6 = vpop.f32.mrf.mxu1 }
 0x117   : > { %2664 = vst [vmem:[#allocation8_spill] sm:$0xff] %v2330_v6 }
 0x118   : > { %v2332_v7 = vpop.f32.mrf.mxu0  ;;  %v2334_v8 = vpop.f32.mrf.mxu1 }
 0x119   : > { %2665 = vst [vmem:[#allocation9_spill] sm:$0xff] %v2332_v7  ;;  %2666 = vst [vmem:[#allocation10_spill] sm:$0xff] %v2334_v8 }
 0x11a   : > { %v2336_v9 = vpop.f32.mrf.mxu0  ;;  %v2338_v10 = vpop.f32.mrf.mxu1 }
 0x11b   : > { %2667 = vst [vmem:[#allocation11_spill] sm:$0xff] %v2336_v9  ;;  %2668 = vst [vmem:[#allocation12_spill] sm:$0xff] %v2338_v10 }
 0x11c   : > { %v2340_v41 = vpop.f32.mrf.mxu0  ;;  %v2342_v39 = vpop.f32.mrf.mxu1 }
 0x11d   : > { %2669 = vst [vmem:[#allocation13_spill] sm:$0xff] %v2340_v41  ;;  %2670 = vst [vmem:[#allocation14_spill] sm:$0xff] %v2342_v39 }
 0x11e   : > { %v2344_v38 = vpop.f32.mrf.mxu0  ;;  %v2346_v37 = vpop.f32.mrf.mxu1 }
 0x11f   : > { %2671 = vst [vmem:[#allocation15_spill] sm:$0xff] %v2344_v38  ;;  %2672 = vst [vmem:[#allocation16_spill] sm:$0xff] %v2346_v37 }
 0x120   : > { %v2348_v36 = vpop.f32.mrf.mxu0  ;;  %v2350_v35 = vpop.f32.mrf.mxu1 }
 0x121   : > { %2673 = vst [vmem:[#allocation17_spill] sm:$0xff] %v2348_v36  ;;  %2674 = vst [vmem:[#allocation18_spill] sm:$0xff] %v2350_v35 }
 0x122   : > { %v2352_v6 = vpop.f32.mrf.mxu0  ;;  %v2354_v7 = vpop.f32.mrf.mxu1 }
 0x123   : > { %2675 = vst [vmem:[#allocation19_spill] sm:$0xff] %v2352_v6  ;;  %2676 = vst [vmem:[#allocation20_spill] sm:$0xff] %v2354_v7 }
 0x124   : > { %v2356_v8 = vpop.f32.mrf.mxu0  ;;  %v2358_v9 = vpop.f32.mrf.mxu1 }
 0x125   : > { %2677 = vst [vmem:[#allocation21_spill] sm:$0xff] %v2356_v8  ;;  %2678 = vst [vmem:[#allocation22_spill] sm:$0xff] %v2358_v9 }
 0x126   : > { %v2360_v10 = vpop.f32.mrf.mxu0  ;;  %v2362_v41 = vpop.f32.mrf.mxu1 }
 0x127   : > { %2679 = vst [vmem:[#allocation23_spill] sm:$0xff] %v2360_v10  ;;  %2680 = vst [vmem:[#allocation24_spill] sm:$0xff] %v2362_v41 }
 0x128   : > { %v2364_v39 = vpop.f32.mrf.mxu0  ;;  %v2366_v38 = vpop.f32.mrf.mxu1 }
 0x129   : > { %2681 = vst [vmem:[#allocation25_spill] sm:$0xff] %v2366_v38  ;;  %v810_v38 = vmax.f32 %v2212_v11, %v2276_v42  ;;  %v819_v11 = vmax.f32 %v2224_v16, %v2288_v48  ;;  %v834_v16 = vmax.f32 %v2236_v20, %v2300_v54  ;;  %v815_v20 = vmax.f32 %v2248_v27, %v2312_v60  ;;  %v2703_v48 = vld [vmem:[#allocation13_spill] sm:$0xff]  ;;  %v2706_v54 = vld [vmem:[#allocation15_spill] sm:$0xff] }
 0x12a   : > { %v2368_v37 = vpop.f32.mrf.mxu0  ;;  %v2370_v36 = vpop.f32.mrf.mxu1  ;;  %v2711_v60 = vld [vmem:[#allocation20_spill] sm:$0xff] }
 0x12b   : > { %2682 = vst [vmem:[#allocation26_spill] sm:$0xff] %v2368_v37  ;;  %2683 = vst [vmem:[#allocation27_spill] sm:$0xff] %v2370_v36  ;;  %v812_v36 = vmax.f32 %v2214_v12, %v2278_v43  ;;  %v821_v12 = vmax.f32 %v2226_v0, %v2290_v49  ;;  %v836_v0 = vmax.f32 %v2238_v21, %v2302_v55  ;;  %v2708_v55 = vld [vmem:[#allocation17_spill] sm:$0xff] }
 0x12c   : > { %v2372_v35 = vpop.f32.mrf.mxu0  ;;  %v2374_v6 = vpop.f32.mrf.mxu1  ;;  %v817_v21 = vmax.f32 %v2250_v28, %v2314_v61 }
 0x12d   : > { %2684 = vst [vmem:[#allocation28_spill] sm:$0xff] %v2374_v6  ;;  %v811_v6 = vmax.f32 %v2216_v13, %v2280_v44  ;;  %v826_v13 = vmax.f32 %v2228_v17, %v2292_v50  ;;  %v835_v17 = vmax.f32 %v2240_v22, %v2304_v56  ;;  %v2704_v22 = vld [vmem:[#allocation14_spill] sm:$0xff]  ;;  %v2710_v50 = vld [vmem:[#allocation19_spill] sm:$0xff]  ;;  %v1162_v61 = vmax.f32 %v821_v12, %v2711_v60 }
 0x12e   : > { %v2376_v7 = vpop.f32.mrf.mxu0  ;;  %v2378_v8 = vpop.f32.mrf.mxu1  ;;  %v2709_v56 = vld [vmem:[#allocation18_spill] sm:$0xff]  ;;  %v1160_v28 = vmax.f32 %v819_v11, %v2710_v50 }
 0x12f   : > { %2685 = vst [vmem:[#allocation29_spill] sm:$0xff] %v2378_v8  ;;  %v813_v8 = vmax.f32 %v2218_v14, %v2282_v45  ;;  %v828_v14 = vmax.f32 %v2230_v18, %v2294_v51  ;;  %v837_v18 = vmax.f32 %v2242_v24, %v2306_v57  ;;  %v1151_v24 = vmax.f32 %v810_v38, %v2703_v48 }
 0x130   : > { %v2380_v9 = vpop.f32.mrf.mxu0  ;;  %v2382_v10 = vpop.f32.mrf.mxu1  ;;  %v1153_v51 = vmax.f32 %v812_v36, %v2704_v22  ;;  %v2713_v36 = vld [vmem:[#allocation22_spill] sm:$0xff]  ;;  %v2716_v11 = vld [vmem:[#allocation25_spill] sm:$0xff] }
 0x131   : > { %2686 = vst [vmem:[#allocation30_spill] sm:$0xff] %v2380_v9  ;;  %2687 = vst [vmem:[#allocation31_spill] sm:$0xff] %v2382_v10  ;;  %v818_v9 = vmax.f32 %v2220_v15, %v2284_v46  ;;  %v827_v15 = vmax.f32 %v2232_v40, %v2296_v52  ;;  %v814_v40 = vmax.f32 %v2244_v25, %v2308_v58  ;;  %v2712_v25 = vld [vmem:[#allocation21_spill] sm:$0xff] }
 0x132   : > { %v2384_v41 = vpop.f32.mrf.mxu0  ;;  %v2390_v37 = vpop.f32.mrf.mxu1  ;;  %v1152_v52 = vmax.f32 %v811_v6, %v2706_v54  ;;  %v1167_v27 = vmax.f32 %v826_v13, %v2712_v25  ;;  %v1169_v22 = vmax.f32 %v828_v14, %v2713_v36  ;;  %v2715_v6 = vld [vmem:[#allocation24_spill] sm:$0xff]  ;;  %v2490_v12 = vmax.f32 %v836_v0, %v2716_v11  ;;  %v2717_v14 = vld [vmem:[#allocation26_spill] sm:$0xff] }
 0x133   : > { %2688 = vst [vmem:[#allocation32_spill] sm:$0xff] %v2384_v41  ;;  %v820_v41 = vmax.f32 %v2222_v23, %v2286_v47  ;;  %v829_v23 = vmax.f32 %v2234_v19, %v2298_v53  ;;  %v816_v19 = vmax.f32 %v2246_v26, %v2310_v59  ;;  %v2691_v47 = vld [vmem:[#allocation2_spill] sm:$0xff]  ;;  %v2462_v59 = vpop.permute.xlu0 %1530  ;;  %v2707_v53 = vld [vmem:[#allocation16_spill] sm:$0xff]  ;;  %v2714_v26 = vld [vmem:[#allocation23_spill] sm:$0xff]  ;;  %v2722_v11 = vmax.f32 %v2252_v29, %v2316_v62 }
 0x134   : > { %v2400_v10 = vpop.f32.mrf.mxu0  ;;  %v2410_v42 = vpop.f32.mrf.mxu1  ;;  %v1154_v57 = vmax.f32 %v813_v8, %v2707_v53  ;;  %v2487_v53 = vmax.f32 %v834_v16, %v2364_v39  ;;  %v2503_v39 = vmax.f32 %v814_v40, %v2372_v35  ;;  %v2719_v16 = vld [vmem:[#allocation28_spill] sm:$0xff] }
 0x135   : > { %v2484_v8 = vmax.f32 %v829_v23, %v2715_v6  ;;  %v2506_v0 = vmax.f32 %v816_v19, %v2719_v16  ;;  %v2517_v35 = vpop.permute.xlu1 %1540 }
 0x136   : > { %v2420_v43 = vpop.f32.mrf.mxu0  ;;  %v2430_v44 = vpop.f32.mrf.mxu1 }
 0x137   : > { %v2500_v54 = vpop.permute.xlu0 %1535 }
 0x138   : > { %v2440_v45 = vpop.f32.mrf.mxu0  ;;  %v2450_v46 = vpop.f32.mrf.mxu1 }
 0x139   : > { %2689 = vst [vmem:[#allocation33_spill] sm:$0xff] %v2440_v45  ;;  %2690 = vst [vmem:[#allocation34_spill] sm:$0xff] %v2450_v46  ;;  %v1161_v45 = vmax.f32 %v820_v41, %v2709_v56  ;;  %v2720_v56 = vld [vmem:[#allocation29_spill] sm:$0xff] }
 0x13a   : > { %v2460_v58 = vpop.f32.mrf.mxu0  ;;  %v2470_v46 = vpop.f32.mrf.mxu1 }
 0x13b   : > { %2698 = vst [vmem:[#allocation2_spill] sm:$0xff] %v2460_v58  ;;  %2705 = vst [vmem:[#allocation13_spill] sm:$0xff] %v2470_v46  ;;  %v1159_v58 = vmax.f32 %v818_v9, %v2708_v55  ;;  %v2481_v46 = vmax.f32 %v827_v15, %v2714_v26  ;;  %v2718_v15 = vld [vmem:[#allocation27_spill] sm:$0xff] }
 0x13c   : > { %v1314_v49 = vpop.f32.mrf.mxu0  ;;  %v1367_v48 = vpop.f32.mrf.mxu1  ;;  %v2497_v26 = vmax.f32 %v837_v18, %v2718_v15  ;;  %v2511_v18 = vmax.f32 %v815_v20, %v2376_v7  ;;  %v2723_v15 = vld [vmem:[#allocation31_spill] sm:$0xff] }
 0x13d   : > { %v1492_v38 = vmax.f32 %v1151_v24, %v1314_v49  ;;  %v1494_v9 = vmax.f32 %v1153_v51, %v1367_v48  ;;  %v2494_v49 = vmax.f32 %v835_v17, %v2717_v14 }
 0x13e   : > { %v1316_v41 = vpop.f32.mrf.mxu0  ;;  %v1369_v25 = vpop.f32.mrf.mxu1 }
 0x13f   : > { %v1493_v13 = vmax.f32 %v1152_v52, %v1316_v41  ;;  %v1548_v24 = vadd.f32 %v2462_v59, %v1492_v38  ;;  %v1495_v23 = vmax.f32 %v1154_v57, %v1369_v25  ;;  %v1550_v50 = vadd.f32 %v2462_v59, %v1494_v9  ;;  %v2721_v41 = vld [vmem:[#allocation30_spill] sm:$0xff] }
 0x140   : > { %v1318_v51 = vpop.f32.mrf.mxu0  ;;  %v1371_v55 = vpop.f32.mrf.mxu1  ;;  %v2514_v57 = vmax.f32 %v817_v21, %v2720_v56 }
 0x141   : > { %v1549_v52 = vadd.f32 %v2462_v59, %v1493_v13  ;;  %v1500_v17 = vmax.f32 %v1159_v58, %v1318_v51  ;;  %v1551_v60 = vadd.f32 %v2462_v59, %v1495_v23  ;;  %v1502_v38 = vmax.f32 %v1161_v45, %v1371_v55 }
 0x142   : > { %v1320_v48 = vpop.f32.mrf.mxu0  ;;  %v1580_v40 = vmax.f32 %v1548_v24, 0.0  ;;  %v1373_v9 = vpop.f32.mrf.mxu1  ;;  %v1582_v7 = vmax.f32 %v1550_v50, 0.0  ;;  %v2724_v23 = vmax.f32 %v2254_v30, %v2318_v63 }
 0x143   : > { %v1581_v19 = vmax.f32 %v1549_v52, 0.0  ;;  %v1501_v36 = vmax.f32 %v1160_v28, %v1320_v48  ;;  %v1556_v6 = vadd.f32 %v2500_v54, %v1500_v17  ;;  %v1583_v20 = vmax.f32 %v1551_v60, 0.0  ;;  %v2546_v48 = vpop.permute.xlu1 %1545 }
 0x144   : > { %v1503_v21 = vmax.f32 %v1162_v61, %v1373_v9  ;;  %v1558_v45 = vadd.f32 %v2500_v54, %v1502_v38  ;;  %v1324_v58 = vpop.f32.mrf.mxu0  ;;  %v2530_v28 = vmax.f32 %v2722_v11, %v2721_v41  ;;  %v1377_v14 = vpop.f32.mrf.mxu1  ;;  %v2537_v61 = vmax.f32 %v2724_v23, %v2723_v15 }
 0x145   : > { %v1954_v13 = vpack.c.bf16 %v1581_v19, %v1580_v40  ;;  %v1557_v24 = vadd.f32 %v2500_v54, %v1501_v36  ;;  %v1508_v25 = vmax.f32 %v1167_v27, %v1324_v58  ;;  %v1955_v50 = vpack.c.bf16 %v1583_v20, %v1582_v7 }
 0x146   : > { %v1559_v51 = vadd.f32 %v2500_v54, %v1503_v21  ;;  %v1510_v16 = vmax.f32 %v1169_v22, %v1377_v14  ;;  %v1326_v52 = vpop.f32.mrf.mxu0  ;;  %v1588_v29 = vmax.f32 %v1556_v6, 0.0  ;;  %v1379_v27 = vpop.f32.mrf.mxu1  ;;  %v1590_v56 = vmax.f32 %v1558_v45, 0.0  ;;  %v2725_v22 = vld [vmem:[#allocation32_spill] sm:$0xff] }
 0x147   : > { %1708 = vst [vmem:[%s2523_s6] sm:$0xff] %v1954_v13  ;;  %v1589_v62 = vmax.f32 %v1557_v24, 0.0  ;;  %v1509_v17 = vmax.f32 %v2481_v46, %v1326_v52  ;;  %v1564_v55 = vadd.f32 %v2517_v35, %v1508_v25  ;;  %1709 = vst [vmem:[%s2523_s6 + $0x8] sm:$0xff] %v1955_v50  ;;  %v1511_v30 = vmax.f32 %v2484_v8, %v1379_v27 }
 0x148   : > { %v1591_v60 = vmax.f32 %v1559_v51, 0.0  ;;  %v1566_v63 = vadd.f32 %v2517_v35, %v1510_v16  ;;  %v1328_v38 = vpop.f32.mrf.mxu0  ;;  %v2726_v40 = vmax.f32 %v2256_v31, %v2320_v1  ;;  %v1381_v9 = vpop.f32.mrf.mxu1  ;;  %v2727_v8 = vmax.f32 %v2258_v32, %v2322_v2 }
 0x149   : > { %v1958_v46 = vpack.c.bf16 %v1589_v62, %v1588_v29  ;;  %v1565_v36 = vadd.f32 %v2517_v35, %v1509_v17  ;;  %v1516_v6 = vmax.f32 %v2487_v53, %v1328_v38  ;;  %v1567_v21 = vadd.f32 %v2517_v35, %v1511_v30  ;;  %v2732_v38 = vld [vmem:[#allocation8_spill] sm:$0xff] }
 0x14a   : > { %v2552_v19 = vmax.f32 %v2726_v40, %v2725_v22  ;;  %v2560_v7 = vmax.f32 %v2727_v8, %v2390_v37  ;;  %v1959_v20 = vpack.c.bf16 %v1591_v60, %v1590_v56  ;;  %v1518_v31 = vmax.f32 %v2490_v12, %v1381_v9  ;;  %v1330_v1 = vpop.f32.mrf.mxu0  ;;  %v1383_v11 = vpop.f32.mrf.mxu1 }
 0x14b   : > { %1712 = vst [vmem:[%s2523_s6 + $0x20] sm:$0xff] %v1958_v46  ;;  %v1596_v45 = vmax.f32 %v1564_v55, 0.0  ;;  %v1597_v58 = vmax.f32 %v1565_v36, 0.0  ;;  %v1517_v41 = vmax.f32 %v2494_v49, %v1330_v1  ;;  %v1572_v53 = vadd.f32 %v2546_v48, %v1516_v6  ;;  %v2736_v1 = vld [vmem:[#allocation9_spill] sm:$0xff] }
 0x14c   : > { %1713 = vst [vmem:[%s2523_s6 + $0x28] sm:$0xff] %v1959_v20  ;;  %v1598_v13 = vmax.f32 %v1566_v63, 0.0  ;;  %v1599_v32 = vmax.f32 %v1567_v21, 0.0  ;;  %v1519_v37 = vmax.f32 %v2497_v26, %v1383_v11  ;;  %v1574_v2 = vadd.f32 %v2546_v48, %v1518_v31  ;;  %v1420_v24 = vpop.f32.mrf.mxu0  ;;  %v1473_v23 = vpop.f32.mrf.mxu1  ;;  %v2731_v63 = vld [vmem:[#allocation3_spill] sm:$0xff]  ;;  %v2734_v31 = vld [vmem:[#allocation33_spill] sm:$0xff] }
 0x14d   : > { %v2728_v12 = vmax.f32 %v2260_v33, %v2324_v3  ;;  %v1962_v14 = vpack.c.bf16 %v1597_v58, %v1596_v45  ;;  %v1573_v49 = vadd.f32 %v2546_v48, %v1517_v41  ;;  %v1496_v15 = vmax.f32 %v2503_v39, %v1420_v24 }
 0x14e   : > { %v2729_v50 = vmax.f32 %v2262_v34, %v2326_v4  ;;  %v1963_v51 = vpack.c.bf16 %v1599_v32, %v1598_v13  ;;  %v1575_v16 = vadd.f32 %v2546_v48, %v1519_v37  ;;  %v1498_v52 = vmax.f32 %v2506_v0, %v1473_v23  ;;  %v1422_v29 = vpop.f32.mrf.mxu0  ;;  %v1475_v39 = vpop.f32.mrf.mxu1  ;;  %v2738_v13 = vld [vmem:[#allocation34_spill] sm:$0xff]  ;;  %v2739_v32 = vld [vmem:[#allocation5_spill] sm:$0xff] }
 0x14f   : > { %v1171_v25 = vmax.f32 %v2728_v12, %v2400_v10  ;;  %1716 = vst [vmem:[%s2523_s6 + $0x40] sm:$0xff] %v1962_v14  ;;  %v1604_v33 = vmax.f32 %v1572_v53, 0.0  ;;  %v1605_v3 = vmax.f32 %v1573_v49, 0.0  ;;  %v1552_v10 = vadd.f32 %v2462_v59, %v1496_v15  ;;  %v2740_v37 = vld [vmem:[#allocation10_spill] sm:$0xff] }
 0x150   : > { %v1173_v26 = vmax.f32 %v2729_v50, %v2410_v42  ;;  %v1497_v62 = vmax.f32 %v2511_v18, %v1422_v29  ;;  %1717 = vst [vmem:[%s2523_s6 + $0x48] sm:$0xff] %v1963_v51  ;;  %v1606_v17 = vmax.f32 %v1574_v2, 0.0  ;;  %v1607_v55 = vmax.f32 %v1575_v16, 0.0  ;;  %v1424_v42 = vpop.f32.mrf.mxu0  ;;  %v1477_v30 = vpop.f32.mrf.mxu1 }
 0x151   : > { %v1554_v34 = vadd.f32 %v2462_v59, %v1498_v52  ;;  %v1499_v4 = vmax.f32 %v2514_v57, %v1475_v39  ;;  %v2730_v0 = vmax.f32 %v2691_v47, %v2328_v5  ;;  %v1966_v56 = vpack.c.bf16 %v1605_v3, %v1604_v33 }
 0x152   : > { %v1553_v60 = vadd.f32 %v2462_v59, %v1497_v62  ;;  %v1504_v18 = vmax.f32 %v2530_v28, %v1424_v42  ;;  %v2733_v22 = vmax.f32 %v2731_v63, %v2732_v38  ;;  %v1967_v46 = vpack.c.bf16 %v1607_v55, %v1606_v17  ;;  %v1426_v6 = vpop.f32.mrf.mxu0  ;;  %v1479_v28 = vpop.f32.mrf.mxu1  ;;  %v2743_v62 = vld [vmem:[#allocation6_spill] sm:$0xff]  ;;  %v2746_v42 = vld [vmem:[#allocation13_spill] sm:$0xff] }
 0x153   : > { %v1172_v27 = vmax.f32 %v2730_v0, %v2420_v43  ;;  %v1555_v57 = vadd.f32 %v2462_v59, %v1499_v4  ;;  %v1506_v36 = vmax.f32 %v2537_v61, %v1477_v30  ;;  %1720 = vst [vmem:[%s2523_s6 + $0x60] sm:$0xff] %v1966_v56  ;;  %v1584_v5 = vmax.f32 %v1552_v10, 0.0  ;;  %v2735_v61 = vld [vmem:[#allocation4_spill] sm:$0xff]  ;;  %v2742_v10 = vld [vmem:[#allocation2_spill] sm:$0xff]  ;;  %v2747_v0 = vld [vmem:[#allocation7_spill] sm:$0xff] }
 0x154   : > { %v1174_v40 = vmax.f32 %v2733_v22, %v2430_v44  ;;  %v1585_v43 = vmax.f32 %v1553_v60, 0.0  ;;  %v1560_v47 = vadd.f32 %v2500_v54, %v1504_v18  ;;  %v1505_v9 = vmax.f32 %v2552_v19, %v1426_v6  ;;  %1721 = vst [vmem:[%s2523_s6 + $0x68] sm:$0xff] %v1967_v46  ;;  %v1430_v59 = vpop.f32.mrf.mxu0  ;;  %v1483_v11 = vpop.f32.mrf.mxu1 }
 0x155   : > { %v1586_v8 = vmax.f32 %v1554_v34, 0.0  ;;  %v1587_v20 = vmax.f32 %v1555_v57, 0.0  ;;  %v1562_v44 = vadd.f32 %v2500_v54, %v1506_v36  ;;  %v1507_v21 = vmax.f32 %v2560_v7, %v1479_v28 }
 0x156   : > { %v2737_v45 = vmax.f32 %v2735_v61, %v2736_v1  ;;  %v1956_v41 = vpack.c.bf16 %v1585_v43, %v1584_v5  ;;  %v1561_v53 = vadd.f32 %v2500_v54, %v1505_v9  ;;  %v1512_v19 = vmax.f32 %v1171_v25, %v1430_v59  ;;  %v1432_v49 = vpop.f32.mrf.mxu0  ;;  %v1485_v16 = vpop.f32.mrf.mxu1 }
 0x157   : > { %v2741_v2 = vmax.f32 %v2739_v32, %v2740_v37  ;;  %v1957_v12 = vpack.c.bf16 %v1587_v20, %v1586_v8  ;;  %v1563_v7 = vadd.f32 %v2500_v54, %v1507_v21  ;;  %v1514_v14 = vmax.f32 %v1173_v26, %v1483_v11  ;;  %v2744_v54 = vld [vmem:[#allocation11_spill] sm:$0xff] }
 0x158   : > { %v1179_v58 = vmax.f32 %v2737_v45, %v2734_v31  ;;  %1710 = vst [vmem:[%s2523_s6 + $0x10] sm:$0xff] %v1956_v41  ;;  %v1592_v15 = vmax.f32 %v1560_v47, 0.0  ;;  %v1593_v23 = vmax.f32 %v1561_v53, 0.0  ;;  %v1568_v50 = vadd.f32 %v2517_v35, %v1512_v19  ;;  %v1434_v3 = vpop.f32.mrf.mxu0  ;;  %v1487_v4 = vpop.f32.mrf.mxu1 }
 0x159   : > { %v1181_v24 = vmax.f32 %v2741_v2, %v2738_v13  ;;  %v1513_v51 = vmax.f32 %v1172_v27, %v1432_v49  ;;  %1711 = vst [vmem:[%s2523_s6 + $0x18] sm:$0xff] %v1957_v12  ;;  %v1594_v25 = vmax.f32 %v1562_v44, 0.0  ;;  %v1595_v52 = vmax.f32 %v1563_v7, 0.0  ;;  %v2748_v27 = vld [vmem:[#allocation12_spill] sm:$0xff] }
 0x15a   : > { %v1570_v29 = vadd.f32 %v2517_v35, %v1514_v14  ;;  %v1515_v33 = vmax.f32 %v1174_v40, %v1485_v16  ;;  %v2745_v26 = vmax.f32 %v2743_v62, %v2744_v54  ;;  %v1960_v17 = vpack.c.bf16 %v1593_v23, %v1592_v15  ;;  %v1436_v38 = vpop.f32.mrf.mxu0  ;;  %v1489_v36 = vpop.f32.mrf.mxu1 }
 0x15b   : > { %v1569_v55 = vadd.f32 %v2517_v35, %v1513_v51  ;;  %v1520_v34 = vmax.f32 %v1179_v58, %v1434_v3  ;;  %v2749_v56 = vmax.f32 %v2747_v0, %v2748_v27  ;;  %v1961_v18 = vpack.c.bf16 %v1595_v52, %v1594_v25 }
 0x15c   : > { %v1180_v39 = vmax.f32 %v2745_v26, %v2742_v10  ;;  %v1571_v30 = vadd.f32 %v2517_v35, %v1515_v33  ;;  %v1522_v63 = vmax.f32 %v1181_v24, %v1487_v4  ;;  %1714 = vst [vmem:[%s2523_s6 + $0x30] sm:$0xff] %v1960_v17  ;;  %v1600_v22 = vmax.f32 %v1568_v50, 0.0 }
 0x15d   : > { %v1182_v60 = vmax.f32 %v2749_v56, %v2746_v42  ;;  %v1601_v40 = vmax.f32 %v1569_v55, 0.0  ;;  %v1576_v46 = vadd.f32 %v2546_v48, %v1520_v34  ;;  %1715 = vst [vmem:[%s2523_s6 + $0x38] sm:$0xff] %v1961_v18  ;;  %v1602_v6 = vmax.f32 %v1570_v29, 0.0 }
 0x15e   : > { %v1521_v57 = vmax.f32 %v1180_v39, %v1436_v38  ;;  %v1603_v5 = vmax.f32 %v1571_v30, 0.0  ;;  %v1578_v43 = vadd.f32 %v2546_v48, %v1522_v63 }
 0x15f   : > { %v1523_v47 = vmax.f32 %v1182_v60, %v1489_v36  ;;  %v1964_v35 = vpack.c.bf16 %v1601_v40, %v1600_v22  ;;  %v1608_v20 = vmax.f32 %v1576_v46, 0.0 }
 0x160   : > { %v1577_v9 = vadd.f32 %v2546_v48, %v1521_v57  ;;  %v1965_v28 = vpack.c.bf16 %v1603_v5, %v1602_v6  ;;  %v1610_v21 = vmax.f32 %v1578_v43, 0.0 }
 0x161   : > { %v1579_v8 = vadd.f32 %v2546_v48, %v1523_v47  ;;  %1718 = vst [vmem:[%s2523_s6 + $0x50] sm:$0xff] %v1964_v35 }
 0x162   : > { %v1609_v44 = vmax.f32 %v1577_v9, 0.0  ;;  %1719 = vst [vmem:[%s2523_s6 + $0x58] sm:$0xff] %v1965_v28 }
 0x163   : > { %v1611_v59 = vmax.f32 %v1579_v8, 0.0 }
 0x164   : > { %v1968_v31 = vpack.c.bf16 %v1609_v44, %v1608_v20 }
 0x165   : > { %v1969_v61 = vpack.c.bf16 %v1611_v59, %v1610_v21 }
 0x166   : > { %1722 = vst [vmem:[%s2523_s6 + $0x70] sm:$0xff] %v1968_v31 }
 0x167   : > { %1723 = vst [vmem:[%s2523_s6 + $0x78] sm:$0xff] %v1969_v61 }
 0x168 PF: > { %s13_s12 = sadd.s32 1, %s1989_s12  }
 0x169   : > { %p10_p4 = scmp.ge.s32.totalorder %s13_s12, 4  }
 0x16b   :  { %12 = sbr.rel (!%p10_p4) target bundleno = 1 (0x1), region = 65 }

// kernel: gesture_forward.3
= control target key start
LH: loop header
LB: loop body
LE: loop exit
PB: predicated region body
PF: predicated region fallthrough
CT: control target
= control target key end

     0   :  { %10 = vsyncpa [#allocation4], 0  ;;  %s15745_s18 = smov 0   ;;  %s17131_s0 = inlined_call_operand.vmem [shape: bf16[2,32768], index: 0, kind: input, shape index: {}]   ;;  %s17132_s1 = inlined_call_operand.vmem [shape: bf16[32768,128], index: 1, kind: input, shape index: {}]   ;;  %s17133_s2 = inlined_call_operand.vmem [shape: f32[1,128], index: 2, kind: input, shape index: {}]   ;;  %s17134_s3 = inlined_call_operand.vmem [shape: f32[128,10], index: 3, kind: input, shape index: {}]   ;;  %s17135_s4 = inlined_call_operand.vmem [shape: f32[1,10], index: 4, kind: input, shape index: {}]   ;;  %s17136_s5 = inlined_call_operand.hbm [shape: f32[2,10], index: 5, kind: output, shape index: {}]  }
   0x1 LB: > { %s15751_s19 = sadd.s32 4294967295, %s15708_s18   ;;  %p12115_p0 = scmp.ge.s32.totalorder %s15708_s18, 1  ;;  %s15708_s18 = sphi %s15745_s18, %s16_s18  }
   0x2   : > { %p194_p1 = scmp.lt.s32.totalorder %s15708_s18, 3 }
   0x4   : > { %p195_p2 = pnand %p12115_p0, %p194_p1 }
   0x5   : > { %s12116_s20 = sshll.u32 (!%p195_p2), %s15751_s19, 7  ;;  %s12117_s21 = sshll.u32 (!%p195_p2), %s15751_s19, 11 }
   0x6   : > { %198 = sbr.rel (%p195_p2) target bundleno = 1806 (0x70e), region = 40  ;;  %p222_p3 = scmp.lt.s32.totalorder (!%p195_p2), %s12116_s20, 255 }
   0x7   : > { %p227_p4 = scmp.lt.s32.totalorder (!%p195_p2), %s12117_s21, 4095  ;;  %p12119_p5 = scmp.ne.s32.totalorder (!%p195_p2), %s15751_s19, 0 }
   0xb   : > { %s17138_s20 = smov (!%p222_p3, %s12116_s20), 255  ;;  %s17140_s21 = smov (!%p227_p4, %s12117_s21), 4095 }
   0xc   : > { %s15760_s24 = scalar_lea.vmem %s17131_s0, %s17138_s20  ;;  %s12118_s25 = sshll.u32 %s17140_s21, 2 }
   0xd   : > { %s15765_s28 = scalar_lea.vmem %s17132_s1, %s12118_s25  ;;  %236 = sbr.rel (%p12119_p5) target bundleno = 20 (0x14), region = 44 }
  0x12   : > { %v15710_v0 = vmov 0.0  }
  0x13   : > { %237 = vst [vmem:[#allocation2] sm:$0x3] %v15710_v0 }
  0x14 PF: > { %v14630_v1 = vld [vmem:[%s15765_s28 + $0x78] sm:$0xff]   ;;  %v14634_v5 = vld [vmem:[%s15765_s28 + $0x70] sm:$0xff]   ;;  %v14638_v9 = vld [vmem:[%s15765_s28 + $0x68] sm:$0xff]   ;;  %v2323_v29 = vlaneseq  ;;  %v15711_v37 = vmov 1966171168   ;;  %p13144_p6 = scmp.ne.s32.totalorder %s15751_s19, 1 }
  0x15   : > { %v14631_v2 = vld [vmem:[%s15765_s28 + $0xf8] sm:$0xff]   ;;  %13151 = vmatprep.subr.bf16.mxu0 %v14630_v1  ;;  %v14635_v6 = vld [vmem:[%s15765_s28 + $0xf0] sm:$0xff]   ;;  %v14639_v10 = vld [vmem:[%s15765_s28 + $0xe8] sm:$0xff]   ;;  %v2321_v38 = vunpack.c.l.s4 %v15711_v37 }
  0x16   : > { %v14632_v3 = vld [vmem:[%s15765_s28 + $0x38] sm:$0xff]   ;;  %13173 = vmatprep.subr.bf16.mxu1 %v14631_v2  ;;  %v14636_v7 = vld [vmem:[%s15765_s28 + $0x30] sm:$0xff]   ;;  %v14640_v11 = vld [vmem:[%s15765_s28 + $0x28] sm:$0xff]   ;;  %v2324_v34 = vshrl.u32 %v2323_v29, 7 }
  0x17   : > { %v14633_v4 = vld [vmem:[%s15765_s28 + $0xb8] sm:$0xff]   ;;  %13152 = vmatpush3.bf16.msra.mxu0 %v14632_v3  ;;  %v14637_v8 = vld [vmem:[%s15765_s28 + $0xb0] sm:$0xff]   ;;  %v14641_v12 = vld [vmem:[%s15765_s28 + $0xa8] sm:$0xff]   ;;  %v2322_v41 = vunpack.c.0.s8 %v2321_v38 }
  0x18   : > { %13174 = vmatpush3.bf16.msra.mxu1 %v14633_v4  ;;  %13153 = vmatprep.subr.bf16.mxu0 %v14634_v5  ;;  %v14642_v13 = vld [vmem:[%s15765_s28 + $0x60] sm:$0xff]   ;;  %v14646_v17 = vld [vmem:[%s15765_s28 + $0x58] sm:$0xff]   ;;  %v14650_v21 = vld [vmem:[%s15765_s28 + $0x50] sm:$0xff]  }
  0x19   : > { %13175 = vmatprep.subr.bf16.mxu1 %v14635_v6  ;;  %v14643_v14 = vld [vmem:[%s15765_s28 + $0xe0] sm:$0xff]   ;;  %v14647_v18 = vld [vmem:[%s15765_s28 + $0xd8] sm:$0xff]   ;;  %v14651_v22 = vld [vmem:[%s15765_s28 + $0xd0] sm:$0xff]   ;;  %v15803_v42 = vsub.s32 %v2322_v41, %v2324_v34 }
  0x1a   : > { %v14644_v15 = vld [vmem:[%s15765_s28 + $0x20] sm:$0xff]   ;;  %v14648_v19 = vld [vmem:[%s15765_s28 + $0x18] sm:$0xff]   ;;  %v14652_v23 = vld [vmem:[%s15765_s28 + $0x10] sm:$0xff]  }
  0x1b   : > { %13154 = vmatpush3.bf16.msra.mxu0 %v14636_v7  ;;  %v14645_v16 = vld [vmem:[%s15765_s28 + $0xa0] sm:$0xff]   ;;  %v14649_v20 = vld [vmem:[%s15765_s28 + $0x98] sm:$0xff]   ;;  %v14653_v24 = vld [vmem:[%s15765_s28 + $0x90] sm:$0xff]  }
  0x1c   : > { %13176 = vmatpush3.bf16.msra.mxu1 %v14637_v8  ;;  %13155 = vmatprep.subr.bf16.mxu0 %v14638_v9  ;;  %v14654_v25 = vld [vmem:[%s15765_s28 + $0x48] sm:$0xff]   ;;  %v14658_v30 = vld [vmem:[%s15765_s28 + $0x40] sm:$0xff]   ;;  %v14663_v36 = vld [vmem:[%s15765_s28 + $0x178] sm:$0xff]  }
  0x1d   : > { %13177 = vmatprep.subr.bf16.mxu1 %v14639_v10  ;;  %v14655_v26 = vld [vmem:[%s15765_s28 + $0xc8] sm:$0xff]   ;;  %v14659_v31 = vld [vmem:[%s15765_s28 + $0xc0] sm:$0xff]   ;;  %v14664_v39 = vld [vmem:[%s15765_s28 + $0x1f8] sm:$0xff]  }
  0x1e   : > { %v14656_v27 = vld [vmem:[%s15765_s28 + $0x8] sm:$0xff]   ;;  %v14660_v32 = vld [vmem:[%s15765_s28] sm:$0xff]   ;;  %v14665_v48 = vld [vmem:[%s15765_s28 + $0x138] sm:$0xff]  }
  0x1f   : > { %13156 = vmatpush3.bf16.msra.mxu0 %v14640_v11  ;;  %v14657_v28 = vld [vmem:[%s15765_s28 + $0x88] sm:$0xff]   ;;  %v14661_v33 = vld [vmem:[%s15765_s28 + $0x80] sm:$0xff]   ;;  %v14666_v50 = vld [vmem:[%s15765_s28 + $0x1b8] sm:$0xff]  }
  0x20   : > { %13178 = vmatpush3.bf16.msra.mxu1 %v14641_v12  ;;  %13157 = vmatprep.subr.bf16.mxu0 %v14642_v13  ;;  %v239_v35 = vld [vmem:[%s15760_s24] sm:$0xff]  ;;  %v14667_v53 = vld [vmem:[%s15765_s28 + $0x170] sm:$0xff]   ;;  %v14671_v59 = vld [vmem:[%s15765_s28 + $0x168] sm:$0xff]  }
  0x21   : > { %13179 = vmatprep.subr.bf16.mxu1 %v14643_v14  ;;  %v2319_v40 = vcombine.high %v239_v35, %v239_v35  ;;  %v2326_v43 = vrot.slane %v239_v35, %v15803_v42  ;;  %v14668_v55 = vld [vmem:[%s15765_s28 + $0x1f0] sm:$0xff]   ;;  %v14672_v60 = vld [vmem:[%s15765_s28 + $0x1e8] sm:$0xff]   ;;  %v14675_v63 = vld [vmem:[%s15765_s28 + $0x160] sm:$0xff]  }
  0x22   : > { %v14669_v56 = vld [vmem:[%s15765_s28 + $0x130] sm:$0xff]   ;;  %v14673_v61 = vld [vmem:[%s15765_s28 + $0x128] sm:$0xff]   ;;  %v14676_v0 = vld [vmem:[%s15765_s28 + $0x1e0] sm:$0xff]  }
  0x23   : > { %13158 = vmatpush3.bf16.msra.mxu0 %v14644_v15  ;;  %v15807_v44 = vrot.slane %v2319_v40, %v15803_v42  ;;  %v2334_v45 = vcombine.high %v2326_v43, %v2326_v43  ;;  %v2342_v46 = vrot.slane %v2326_v43, %v15803_v42  ;;  %v14670_v58 = vld [vmem:[%s15765_s28 + $0x1b0] sm:$0xff]   ;;  %v14674_v62 = vld [vmem:[%s15765_s28 + $0x1a8] sm:$0xff]   ;;  %v14677_v1 = vld [vmem:[%s15765_s28 + $0x120] sm:$0xff]  }
  0x24   : > { %13180 = vmatpush3.bf16.msra.mxu1 %v14645_v16  ;;  %13159 = vmatprep.subr.bf16.mxu0 %v14646_v17  ;;  %v14678_v2 = vld [vmem:[%s15765_s28 + $0x1a0] sm:$0xff]   ;;  %v14679_v3 = vld [vmem:[%s15765_s28 + $0x158] sm:$0xff]   ;;  %v14683_v7 = vld [vmem:[%s15765_s28 + $0x150] sm:$0xff]  }
  0x25   : > { %13181 = vmatprep.subr.bf16.mxu1 %v14647_v18  ;;  %v2335_v47 = vcombine.high %v15807_v44, %v15807_v44  ;;  %v2356_v49 = vrot.slane %v2334_v45, %v15803_v42  ;;  %v2364_v52 = vcombine.high %v2342_v46, %v2342_v46  ;;  %v14680_v4 = vld [vmem:[%s15765_s28 + $0x1d8] sm:$0xff]   ;;  %v14684_v8 = vld [vmem:[%s15765_s28 + $0x1d0] sm:$0xff]   ;;  %v14687_v11 = vld [vmem:[%s15765_s28 + $0x148] sm:$0xff]  }
  0x26   : > { %v14681_v5 = vld [vmem:[%s15765_s28 + $0x118] sm:$0xff]   ;;  %v14685_v9 = vld [vmem:[%s15765_s28 + $0x110] sm:$0xff]   ;;  %v14688_v12 = vld [vmem:[%s15765_s28 + $0x1c8] sm:$0xff]  }
  0x27   : > { %13160 = vmatpush3.bf16.msra.mxu0 %v14648_v19  ;;  %v2363_v51 = vrot.slane %v2335_v47, %v15803_v42  ;;  %9407 = vmatprep.mubr.bf16.mxu0 %v2356_v49  ;;  %v2366_v54 = vcombine.high %v2356_v49, %v2356_v49  ;;  %v14682_v6 = vld [vmem:[%s15765_s28 + $0x198] sm:$0xff]   ;;  %v14686_v10 = vld [vmem:[%s15765_s28 + $0x190] sm:$0xff]   ;;  %v14689_v13 = vld [vmem:[%s15765_s28 + $0x108] sm:$0xff]   ;;  %v2349_v19 = vrot.slane %v15807_v44, %v15803_v42 }
  0x28   : > { %13182 = vmatpush3.bf16.msra.mxu1 %v14649_v20  ;;  %13161 = vmatprep.subr.bf16.mxu0 %v14650_v21  ;;  %v14690_v14 = vld [vmem:[%s15765_s28 + $0x188] sm:$0xff]   ;;  %v14691_v15 = vld [vmem:[%s15765_s28 + $0x140] sm:$0xff]   ;;  %v14695_v20 = vld [vmem:[%s15765_s28 + $0x278] sm:$0xff]  }
  0x29   : > { %13183 = vmatprep.subr.bf16.mxu1 %v14651_v22  ;;  %v2367_v57 = vcombine.high %v2363_v51, %v2363_v51  ;;  %9447 = vmatprep.mubr.bf16.mxu1 %v2366_v54  ;;  %v14692_v16 = vld [vmem:[%s15765_s28 + $0x1c0] sm:$0xff]   ;;  %v14696_v21 = vld [vmem:[%s15765_s28 + $0x2f8] sm:$0xff]   ;;  %v14703_v29 = vld [vmem:[%s15765_s28 + $0x268] sm:$0xff]  }
  0x2a   : > { %v14693_v17 = vld [vmem:[%s15765_s28 + $0x100] sm:$0xff]   ;;  %v14697_v22 = vld [vmem:[%s15765_s28 + $0x238] sm:$0xff]   ;;  %v14715_v41 = vld [vmem:[%s15765_s28 + $0x250] sm:$0xff]  }
  0x2b   : > { %13162 = vmatpush3.bf16.msra.mxu0 %v14652_v23  ;;  %v14694_v18 = vld [vmem:[%s15765_s28 + $0x180] sm:$0xff]   ;;  %v14698_v23 = vld [vmem:[%s15765_s28 + $0x2b8] sm:$0xff]   ;;  %v14716_v43 = vld [vmem:[%s15765_s28 + $0x2d0] sm:$0xff]  }
  0x2c   : > { %13184 = vmatpush3.bf16.msra.mxu1 %v14653_v24  ;;  %13163 = vmatprep.subr.bf16.mxu0 %v14654_v25  ;;  %v2365_v24 = vcombine.high %v2349_v19, %v2349_v19  ;;  %v14699_v25 = vld [vmem:[%s15765_s28 + $0x270] sm:$0xff]   ;;  %v14708_v34 = vld [vmem:[%s15765_s28 + $0x2e0] sm:$0xff]   ;;  %v14711_v37 = vld [vmem:[%s15765_s28 + $0x258] sm:$0xff]  }
  0x2d   : > { %13185 = vmatprep.subr.bf16.mxu1 %v14655_v26  ;;  %v14700_v26 = vld [vmem:[%s15765_s28 + $0x2f0] sm:$0xff]   ;;  %v14709_v35 = vld [vmem:[%s15765_s28 + $0x220] sm:$0xff]   ;;  %v14712_v38 = vld [vmem:[%s15765_s28 + $0x2d8] sm:$0xff]  }
  0x2e   : > { %v14714_v40 = vld [vmem:[%s15765_s28 + $0x298] sm:$0xff]   ;;  %v14717_v44 = vld [vmem:[%s15765_s28 + $0x210] sm:$0xff]   ;;  %v240_v47 = vld [vmem:[%s15760_s24 + $0x8] sm:$0xff] }
  0x2f   : > { %13164 = vmatpush3.bf16.msra.mxu0 %v14656_v27  ;;  %v14701_v27 = vld [vmem:[%s15765_s28 + $0x230] sm:$0xff]   ;;  %v2375_v49 = vrot.slane %v240_v47, %v15803_v42 }
  0x30   : > { %13186 = vmatpush3.bf16.msra.mxu1 %v14657_v28  ;;  %13165 = vmatprep.subr.bf16.mxu0 %v14658_v30  ;;  %v14702_v28 = vld [vmem:[%s15765_s28 + $0x2b0] sm:$0xff]   ;;  %v14704_v30 = vld [vmem:[%s15765_s28 + $0x2e8] sm:$0xff]  }
  0x31   : > { %13187 = vmatprep.subr.bf16.mxu1 %v14659_v31  ;;  %v14705_v31 = vld [vmem:[%s15765_s28 + $0x228] sm:$0xff]   ;;  %v14718_v45 = vld [vmem:[%s15765_s28 + $0x290] sm:$0xff]  }
  0x33   : > { %13166 = vmatpush3.bf16.msra.mxu0 %v14660_v32  ;;  %v14706_v32 = vld [vmem:[%s15765_s28 + $0x2a8] sm:$0xff]  }
  0x34   : > { %13188 = vmatpush3.bf16.msra.mxu1 %v14661_v33  ;;  %13195 = vmatprep.subr.bf16.mxu0 %v14663_v36  ;;  %v14707_v33 = vld [vmem:[%s15765_s28 + $0x260] sm:$0xff]  }
  0x35   : > { %13217 = vmatprep.subr.bf16.mxu1 %v14664_v39  ;;  %v14710_v36 = vld [vmem:[%s15765_s28 + $0x2a0] sm:$0xff]   ;;  %v14713_v39 = vld [vmem:[%s15765_s28 + $0x218] sm:$0xff]  }
  0x36   : > { %9408 = vmatmul.mubr.bf16.vlgmr.msra.gmra.mxu0 %v2342_v46  ;;  %v14719_v46 = vld [vmem:[%s15765_s28 + $0x248] sm:$0xff]  }
  0x37   : > { %13196 = vmatpush3.bf16.msra.mxu0 %v14665_v48  ;;  %9448 = vmatmul.mubr.bf16.vlgmr.msra.gmra.mxu1 %v2364_v52  ;;  %v14720_v48 = vld [vmem:[%s15765_s28 + $0x2c8] sm:$0xff]  }
  0x38   : > { %13197 = vmatprep.subr.bf16.mxu0 %v14667_v53  ;;  %13218 = vmatpush3.bf16.msra.mxu1 %v14666_v50  ;;  %v2368_v50 = vcombine.high %v240_v47, %v240_v47  ;;  %v14722_v52 = vld [vmem:[%s15765_s28 + $0x288] sm:$0xff]   ;;  %v2383_v53 = vcombine.high %v2375_v49, %v2375_v49 }
  0x39   : > { %9487 = vmatprep.mubr.bf16.mxu0 %v2363_v51  ;;  %13219 = vmatprep.subr.bf16.mxu1 %v14668_v55  ;;  %v14721_v51 = vld [vmem:[%s15765_s28 + $0x208] sm:$0xff]   ;;  %v14723_v55 = vld [vmem:[%s15765_s28 + $0x240] sm:$0xff]  }
  0x3a   : > { %9527 = vmatprep.mubr.bf16.mxu1 %v2367_v57  ;;  %v15877_v54 = vrot.slane %v2368_v50, %v15803_v42  ;;  %v2405_v57 = vrot.slane %v2383_v53, %v15803_v42  ;;  %v14770_v47 = vld [vmem:[%s15765_s28 + $0x428] sm:$0xff]   ;;  %v14773_v50 = vld [vmem:[%s15765_s28 + $0x4e0] sm:$0xff]   ;;  %v14776_v53 = vld [vmem:[%s15765_s28 + $0x458] sm:$0xff]  }
  0x3b   : > { %13198 = vmatpush3.bf16.msra.mxu0 %v14669_v56  ;;  %v14724_v56 = vld [vmem:[%s15765_s28 + $0x2c0] sm:$0xff]  }
  0x3c   : > { %13199 = vmatprep.subr.bf16.mxu0 %v14671_v59  ;;  %13220 = vmatpush3.bf16.msra.mxu1 %v14670_v58  ;;  %v2384_v58 = vcombine.high %v15877_v54, %v15877_v54  ;;  %v14725_v59 = vld [vmem:[%s15765_s28 + $0x200] sm:$0xff]  }
  0x3d   : > { %13221 = vmatprep.subr.bf16.mxu1 %v14672_v60  ;;  %v14726_v60 = vld [vmem:[%s15765_s28 + $0x280] sm:$0xff]  }
  0x3f   : > { %13200 = vmatpush3.bf16.msra.mxu0 %v14673_v61  ;;  %v2415_v61 = vcombine.high %v2405_v57, %v2405_v57 }
  0x40   : > { %13201 = vmatprep.subr.bf16.mxu0 %v14675_v63  ;;  %13222 = vmatpush3.bf16.msra.mxu1 %v14674_v62  ;;  %v2391_v62 = vrot.slane %v2375_v49, %v15803_v42  ;;  %v14727_v63 = vld [vmem:[%s15765_s28 + $0x378] sm:$0xff]   ;;  %v14772_v49 = vld [vmem:[%s15765_s28 + $0x460] sm:$0xff]  }
  0x41   : > { %13223 = vmatprep.subr.bf16.mxu1 %v14676_v0  ;;  %v14728_v0 = vld [vmem:[%s15765_s28 + $0x3f8] sm:$0xff]  }
  0x43   : > { %13202 = vmatpush3.bf16.msra.mxu0 %v14677_v1  ;;  %v2412_v1 = vrot.slane %v2384_v58, %v15803_v42  ;;  %v14781_v58 = vld [vmem:[%s15765_s28 + $0x4d0] sm:$0xff]  }
  0x44   : > { %13203 = vmatprep.subr.bf16.mxu0 %v14679_v3  ;;  %13224 = vmatpush3.bf16.msra.mxu1 %v14678_v2  ;;  %v14729_v2 = vld [vmem:[%s15765_s28 + $0x338] sm:$0xff]  }
  0x45   : > { %13225 = vmatprep.subr.bf16.mxu1 %v14680_v4  ;;  %v14730_v3 = vld [vmem:[%s15765_s28 + $0x3b8] sm:$0xff]   ;;  %v2413_v4 = vcombine.high %v2391_v62, %v2391_v62 }
  0x47   : > { %13204 = vmatpush3.bf16.msra.mxu0 %v14681_v5  ;;  %v14731_v5 = vld [vmem:[%s15765_s28 + $0x370] sm:$0xff]  }
  0x48   : > { %13205 = vmatprep.subr.bf16.mxu0 %v14683_v7  ;;  %13226 = vmatpush3.bf16.msra.mxu1 %v14682_v6  ;;  %v14732_v6 = vld [vmem:[%s15765_s28 + $0x3f0] sm:$0xff]   ;;  %v2416_v7 = vcombine.high %v2412_v1, %v2412_v1 }
  0x49   : > { %13227 = vmatprep.subr.bf16.mxu1 %v14684_v8  ;;  %v14733_v8 = vld [vmem:[%s15765_s28 + $0x330] sm:$0xff]  }
  0x4b   : > { %13206 = vmatpush3.bf16.msra.mxu0 %v14685_v9  ;;  %v14734_v9 = vld [vmem:[%s15765_s28 + $0x3b0] sm:$0xff]  }
  0x4c   : > { %13207 = vmatprep.subr.bf16.mxu0 %v14687_v11  ;;  %13228 = vmatpush3.bf16.msra.mxu1 %v14686_v10  ;;  %v14735_v10 = vld [vmem:[%s15765_s28 + $0x368] sm:$0xff]  }
  0x4d   : > { %13229 = vmatprep.subr.bf16.mxu1 %v14688_v12  ;;  %v14736_v11 = vld [vmem:[%s15765_s28 + $0x3e8] sm:$0xff]  }
  0x4e   : > { %v14737_v12 = vld [vmem:[%s15765_s28 + $0x328] sm:$0xff]  }
  0x4f   : > { %13208 = vmatpush3.bf16.msra.mxu0 %v14689_v13  ;;  %v14738_v13 = vld [vmem:[%s15765_s28 + $0x3a8] sm:$0xff]  }
  0x50   : > { %13209 = vmatprep.subr.bf16.mxu0 %v14691_v15  ;;  %13230 = vmatpush3.bf16.msra.mxu1 %v14690_v14  ;;  %v14739_v14 = vld [vmem:[%s15765_s28 + $0x360] sm:$0xff]  }
  0x51   : > { %13231 = vmatprep.subr.bf16.mxu1 %v14692_v16  ;;  %v14740_v15 = vld [vmem:[%s15765_s28 + $0x3e0] sm:$0xff]  }
  0x52   : > { %v14741_v16 = vld [vmem:[%s15765_s28 + $0x320] sm:$0xff]  }
  0x53   : > { %13210 = vmatpush3.bf16.msra.mxu0 %v14693_v17  ;;  %v14742_v17 = vld [vmem:[%s15765_s28 + $0x3a0] sm:$0xff]  }
  0x54   : > { %13239 = vmatprep.subr.bf16.mxu0 %v14695_v20  ;;  %13232 = vmatpush3.bf16.msra.mxu1 %v14694_v18  ;;  %v14743_v18 = vld [vmem:[%s15765_s28 + $0x358] sm:$0xff]  }
  0x55   : > { %13261 = vmatprep.subr.bf16.mxu1 %v14696_v21  ;;  %v14745_v20 = vld [vmem:[%s15765_s28 + $0x318] sm:$0xff]  }
  0x56   : > { %9488 = vmatmul.mubr.bf16.vlgmr.msra.gmra.mxu0 %v2349_v19  ;;  %v14744_v19 = vld [vmem:[%s15765_s28 + $0x3d8] sm:$0xff]  }
  0x57   : > { %13240 = vmatpush3.bf16.msra.mxu0 %v14697_v22  ;;  %9528 = vmatmul.mubr.bf16.vlgmr.msra.gmra.mxu1 %v2365_v24  ;;  %v14746_v21 = vld [vmem:[%s15765_s28 + $0x398] sm:$0xff]   ;;  %v14747_v22 = vld [vmem:[%s15765_s28 + $0x350] sm:$0xff]  }
  0x58   : > { %13241 = vmatprep.subr.bf16.mxu0 %v14699_v25  ;;  %13262 = vmatpush3.bf16.msra.mxu1 %v14698_v23  ;;  %v14748_v23 = vld [vmem:[%s15765_s28 + $0x3d0] sm:$0xff]  }
  0x59   : > { %13263 = vmatprep.subr.bf16.mxu1 %v14700_v26  ;;  %9567 = vmatprep.mubr.bf16.mxu0 %v2405_v57  ;;  %v14749_v24 = vld [vmem:[%s15765_s28 + $0x310] sm:$0xff]   ;;  %v14751_v26 = vld [vmem:[%s15765_s28 + $0x348] sm:$0xff]  }
  0x5a   : > { %9607 = vmatprep.mubr.bf16.mxu1 %v2415_v61  ;;  %v14750_v25 = vld [vmem:[%s15765_s28 + $0x390] sm:$0xff]   ;;  %v14784_v61 = vld [vmem:[%s15765_s28 + $0x448] sm:$0xff]  }
  0x5b   : > { %13242 = vmatpush3.bf16.msra.mxu0 %v14701_v27  ;;  %v14752_v27 = vld [vmem:[%s15765_s28 + $0x3c8] sm:$0xff]   ;;  %v14780_v57 = vld [vmem:[%s15765_s28 + $0x450] sm:$0xff]  }
  0x5c   : > { %13243 = vmatprep.subr.bf16.mxu0 %v14703_v29  ;;  %13264 = vmatpush3.bf16.msra.mxu1 %v14702_v28  ;;  %v14753_v28 = vld [vmem:[%s15765_s28 + $0x308] sm:$0xff]  }
  0x5d   : > { %13265 = vmatprep.subr.bf16.mxu1 %v14704_v30  ;;  %v14754_v29 = vld [vmem:[%s15765_s28 + $0x388] sm:$0xff]   ;;  %v14755_v30 = vld [vmem:[%s15765_s28 + $0x340] sm:$0xff]  }
  0x5f   : > { %13244 = vmatpush3.bf16.msra.mxu0 %v14705_v31  ;;  %v14756_v31 = vld [vmem:[%s15765_s28 + $0x3c0] sm:$0xff]  }
  0x60   : > { %13245 = vmatprep.subr.bf16.mxu0 %v14707_v33  ;;  %13266 = vmatpush3.bf16.msra.mxu1 %v14706_v32  ;;  %v14757_v32 = vld [vmem:[%s15765_s28 + $0x300] sm:$0xff]  }
  0x61   : > { %13267 = vmatprep.subr.bf16.mxu1 %v14708_v34  ;;  %v14758_v33 = vld [vmem:[%s15765_s28 + $0x380] sm:$0xff]   ;;  %v2398_v34 = vrot.slane %v15877_v54, %v15803_v42  ;;  %v14777_v54 = vld [vmem:[%s15765_s28 + $0x4d8] sm:$0xff]  }
  0x63   : > { %13246 = vmatpush3.bf16.msra.mxu0 %v14709_v35  ;;  %v14760_v35 = vld [vmem:[%s15765_s28 + $0x478] sm:$0xff]  }
  0x64   : > { %13247 = vmatprep.subr.bf16.mxu0 %v14711_v37  ;;  %13268 = vmatpush3.bf16.msra.mxu1 %v14710_v36  ;;  %v14761_v36 = vld [vmem:[%s15765_s28 + $0x4f8] sm:$0xff]  }
  0x65   : > { %13269 = vmatprep.subr.bf16.mxu1 %v14712_v38  ;;  %v14762_v37 = vld [vmem:[%s15765_s28 + $0x438] sm:$0xff]  }
  0x66   : > { %v14763_v38 = vld [vmem:[%s15765_s28 + $0x4b8] sm:$0xff]  }
  0x67   : > { %13248 = vmatpush3.bf16.msra.mxu0 %v14713_v39  ;;  %v2414_v39 = vcombine.high %v2398_v34, %v2398_v34 }
  0x68   : > { %13249 = vmatprep.subr.bf16.mxu0 %v14715_v41  ;;  %13270 = vmatpush3.bf16.msra.mxu1 %v14714_v40  ;;  %v14764_v40 = vld [vmem:[%s15765_s28 + $0x470] sm:$0xff]  }
  0x69   : > { %13271 = vmatprep.subr.bf16.mxu1 %v14716_v43  ;;  %v14765_v41 = vld [vmem:[%s15765_s28 + $0x4f0] sm:$0xff]  }
  0x6a   : > { %v14766_v43 = vld [vmem:[%s15765_s28 + $0x430] sm:$0xff]  }
  0x6b   : > { %13250 = vmatpush3.bf16.msra.mxu0 %v14717_v44  ;;  %v14767_v44 = vld [vmem:[%s15765_s28 + $0x4b0] sm:$0xff]  }
  0x6c   : > { %13251 = vmatprep.subr.bf16.mxu0 %v14719_v46  ;;  %13272 = vmatpush3.bf16.msra.mxu1 %v14718_v45  ;;  %v14768_v45 = vld [vmem:[%s15765_s28 + $0x468] sm:$0xff]  }
  0x6d   : > { %13273 = vmatprep.subr.bf16.mxu1 %v14720_v48  ;;  %v14769_v46 = vld [vmem:[%s15765_s28 + $0x4e8] sm:$0xff]  }
  0x6e   : > { %v14771_v48 = vld [vmem:[%s15765_s28 + $0x4a8] sm:$0xff]  }
  0x6f   : > { %13252 = vmatpush3.bf16.msra.mxu0 %v14721_v51  ;;  %v14774_v51 = vld [vmem:[%s15765_s28 + $0x420] sm:$0xff]  }
  0x70   : > { %13253 = vmatprep.subr.bf16.mxu0 %v14723_v55  ;;  %13274 = vmatpush3.bf16.msra.mxu1 %v14722_v52  ;;  %v14775_v52 = vld [vmem:[%s15765_s28 + $0x4a0] sm:$0xff]   ;;  %v14778_v55 = vld [vmem:[%s15765_s28 + $0x418] sm:$0xff]  }
  0x71   : > { %13275 = vmatprep.subr.bf16.mxu1 %v14724_v56  ;;  %v14779_v56 = vld [vmem:[%s15765_s28 + $0x498] sm:$0xff]  }
  0x73   : > { %13254 = vmatpush3.bf16.msra.mxu0 %v14725_v59  ;;  %v14782_v59 = vld [vmem:[%s15765_s28 + $0x410] sm:$0xff]  }
  0x74   : > { %13283 = vmatprep.subr.bf16.mxu0 %v14727_v63  ;;  %13276 = vmatpush3.bf16.msra.mxu1 %v14726_v60  ;;  %v14783_v60 = vld [vmem:[%s15765_s28 + $0x490] sm:$0xff]   ;;  %v14785_v63 = vld [vmem:[%s15765_s28 + $0x4c8] sm:$0xff]  }
  0x75   : > { %13305 = vmatprep.subr.bf16.mxu1 %v14728_v0 }
  0x76   : > { %9568 = vmatmul.mubr.bf16.vlgmr.msra.gmra.mxu0 %v2391_v62  ;;  %v241_v62 = vld [vmem:[%s15760_s24 + $0x10] sm:$0xff] }
  0x77   : > { %13284 = vmatpush3.bf16.msra.mxu0 %v14729_v2  ;;  %9647 = vmatprep.mubr.bf16.mxu0 %v2412_v1  ;;  %v2424_v0 = vrot.slane %v241_v62, %v15803_v42  ;;  %v2417_v1 = vcombine.high %v241_v62, %v241_v62  ;;  %v14786_v2 = vld [vmem:[%s15765_s28 + $0x408] sm:$0xff]  }
  0x78   : > { %9608 = vmatmul.mubr.bf16.vlgmr.msra.gmra.mxu1 %v2413_v4  ;;  %13285 = vmatprep.subr.bf16.mxu0 %v14731_v5  ;;  %v14835_v62 = vld [vmem:[%s15765_s28 + $0x628] sm:$0xff]  }
  0x79   : > { %13306 = vmatpush3.bf16.msra.mxu1 %v14730_v3  ;;  %9687 = vmatprep.mubr.bf16.mxu1 %v2416_v7  ;;  %v14787_v3 = vld [vmem:[%s15765_s28 + $0x488] sm:$0xff]   ;;  %v2432_v4 = vcombine.high %v2424_v0, %v2424_v0  ;;  %v15953_v5 = vrot.slane %v2417_v1, %v15803_v42  ;;  %v14789_v7 = vld [vmem:[%s15765_s28 + $0x4c0] sm:$0xff]  }
  0x7a   : > { %13307 = vmatprep.subr.bf16.mxu1 %v14732_v6  ;;  %v14788_v6 = vld [vmem:[%s15765_s28 + $0x440] sm:$0xff]  }
  0x7b   : > { %13286 = vmatpush3.bf16.msra.mxu0 %v14733_v8  ;;  %v2454_v8 = vrot.slane %v2432_v4, %v15803_v42  ;;  %v14838_v1 = vld [vmem:[%s15765_s28 + $0x6e0] sm:$0xff]   ;;  %v14841_v4 = vld [vmem:[%s15765_s28 + $0x658] sm:$0xff]  }
  0x7c   : > { %13287 = vmatprep.subr.bf16.mxu0 %v14735_v10  ;;  %v14790_v10 = vld [vmem:[%s15765_s28 + $0x400] sm:$0xff]  }
  0x7d   : > { %13308 = vmatpush3.bf16.msra.mxu1 %v14734_v9  ;;  %v2433_v9 = vcombine.high %v15953_v5, %v15953_v5 }
  0x7e   : > { %13309 = vmatprep.subr.bf16.mxu1 %v14736_v11  ;;  %v14791_v11 = vld [vmem:[%s15765_s28 + $0x480] sm:$0xff]  }
  0x7f   : > { %13288 = vmatpush3.bf16.msra.mxu0 %v14737_v12  ;;  %v2464_v12 = vcombine.high %v2454_v8, %v2454_v8 }
  0x80   : > { %13289 = vmatprep.subr.bf16.mxu0 %v14739_v14  ;;  %v14792_v14 = vld [vmem:[%s15765_s28 + $0x578] sm:$0xff]  }
  0x81   : > { %13310 = vmatpush3.bf16.msra.mxu1 %v14738_v13  ;;  %v2440_v13 = vrot.slane %v2424_v0, %v15803_v42  ;;  %v14837_v0 = vld [vmem:[%s15765_s28 + $0x660] sm:$0xff]  }
  0x82   : > { %13311 = vmatprep.subr.bf16.mxu1 %v14740_v15  ;;  %v14793_v15 = vld [vmem:[%s15765_s28 + $0x5f8] sm:$0xff]  }
  0x83   : > { %13290 = vmatpush3.bf16.msra.mxu0 %v14741_v16  ;;  %v2461_v16 = vrot.slane %v2433_v9, %v15803_v42  ;;  %v14846_v9 = vld [vmem:[%s15765_s28 + $0x6d0] sm:$0xff]  }
  0x84   : > { %13291 = vmatprep.subr.bf16.mxu0 %v14743_v18  ;;  %v14795_v18 = vld [vmem:[%s15765_s28 + $0x5b8] sm:$0xff]  }
  0x85   : > { %13312 = vmatpush3.bf16.msra.mxu1 %v14742_v17  ;;  %v14794_v17 = vld [vmem:[%s15765_s28 + $0x538] sm:$0xff]  }
  0x86   : > { %13313 = vmatprep.subr.bf16.mxu1 %v14744_v19  ;;  %v2462_v19 = vcombine.high %v2440_v13, %v2440_v13 }
  0x87   : > { %13292 = vmatpush3.bf16.msra.mxu0 %v14745_v20  ;;  %v14796_v20 = vld [vmem:[%s15765_s28 + $0x570] sm:$0xff]  }
  0x88   : > { %13293 = vmatprep.subr.bf16.mxu0 %v14747_v22  ;;  %v2465_v22 = vcombine.high %v2461_v16, %v2461_v16 }
  0x89   : > { %13314 = vmatpush3.bf16.msra.mxu1 %v14746_v21  ;;  %v14797_v21 = vld [vmem:[%s15765_s28 + $0x5f0] sm:$0xff]  }
  0x8a   : > { %13315 = vmatprep.subr.bf16.mxu1 %v14748_v23  ;;  %v14798_v23 = vld [vmem:[%s15765_s28 + $0x530] sm:$0xff]  }
  0x8b   : > { %13294 = vmatpush3.bf16.msra.mxu0 %v14749_v24  ;;  %v14799_v24 = vld [vmem:[%s15765_s28 + $0x5b0] sm:$0xff]  }
  0x8c   : > { %13295 = vmatprep.subr.bf16.mxu0 %v14751_v26  ;;  %v14801_v26 = vld [vmem:[%s15765_s28 + $0x5e8] sm:$0xff]  }
  0x8d   : > { %13316 = vmatpush3.bf16.msra.mxu1 %v14750_v25  ;;  %v14800_v25 = vld [vmem:[%s15765_s28 + $0x568] sm:$0xff]  }
  0x8e   : > { %13317 = vmatprep.subr.bf16.mxu1 %v14752_v27  ;;  %v14802_v27 = vld [vmem:[%s15765_s28 + $0x528] sm:$0xff]  }
  0x8f   : > { %13296 = vmatpush3.bf16.msra.mxu0 %v14753_v28  ;;  %v14803_v28 = vld [vmem:[%s15765_s28 + $0x5a8] sm:$0xff]  }
  0x90   : > { %13297 = vmatprep.subr.bf16.mxu0 %v14755_v30  ;;  %v14805_v30 = vld [vmem:[%s15765_s28 + $0x5e0] sm:$0xff]  }
  0x91   : > { %13318 = vmatpush3.bf16.msra.mxu1 %v14754_v29  ;;  %v14804_v29 = vld [vmem:[%s15765_s28 + $0x560] sm:$0xff]  }
  0x92   : > { %13319 = vmatprep.subr.bf16.mxu1 %v14756_v31  ;;  %v14806_v31 = vld [vmem:[%s15765_s28 + $0x520] sm:$0xff]  }
  0x93   : > { %13298 = vmatpush3.bf16.msra.mxu0 %v14757_v32  ;;  %v14807_v32 = vld [vmem:[%s15765_s28 + $0x5a0] sm:$0xff]  }
  0x94   : > { %13327 = vmatprep.subr.bf16.mxu0 %v14760_v35  ;;  %v14810_v35 = vld [vmem:[%s15765_s28 + $0x518] sm:$0xff]  }
  0x95   : > { %13320 = vmatpush3.bf16.msra.mxu1 %v14758_v33  ;;  %v14808_v33 = vld [vmem:[%s15765_s28 + $0x558] sm:$0xff]  }
  0x96   : > { %9648 = vmatmul.mubr.bf16.vlgmr.msra.gmra.mxu0 %v2398_v34  ;;  %13349 = vmatprep.subr.bf16.mxu1 %v14761_v36  ;;  %v14809_v34 = vld [vmem:[%s15765_s28 + $0x5d8] sm:$0xff]  }
  0x97   : > { %13328 = vmatpush3.bf16.msra.mxu0 %v14762_v37  ;;  %9727 = vmatprep.mubr.bf16.mxu0 %v2454_v8  ;;  %v14811_v36 = vld [vmem:[%s15765_s28 + $0x598] sm:$0xff]   ;;  %v14812_v37 = vld [vmem:[%s15765_s28 + $0x550] sm:$0xff]  }
  0x98   : > { %9688 = vmatmul.mubr.bf16.vlgmr.msra.gmra.mxu1 %v2414_v39  ;;  %13329 = vmatprep.subr.bf16.mxu0 %v14764_v40  ;;  %v14814_v39 = vld [vmem:[%s15765_s28 + $0x510] sm:$0xff]  }
  0x99   : > { %13350 = vmatpush3.bf16.msra.mxu1 %v14763_v38  ;;  %9767 = vmatprep.mubr.bf16.mxu1 %v2464_v12  ;;  %v14813_v38 = vld [vmem:[%s15765_s28 + $0x5d0] sm:$0xff]   ;;  %v14849_v12 = vld [vmem:[%s15765_s28 + $0x648] sm:$0xff]  }
  0x9a   : > { %13351 = vmatprep.subr.bf16.mxu1 %v14765_v41  ;;  %v14815_v40 = vld [vmem:[%s15765_s28 + $0x590] sm:$0xff]   ;;  %v14816_v41 = vld [vmem:[%s15765_s28 + $0x548] sm:$0xff]  }
  0x9b   : > { %13330 = vmatpush3.bf16.msra.mxu0 %v14766_v43  ;;  %v14817_v43 = vld [vmem:[%s15765_s28 + $0x5c8] sm:$0xff]   ;;  %v14845_v8 = vld [vmem:[%s15765_s28 + $0x650] sm:$0xff]  }
  0x9c   : > { %13331 = vmatprep.subr.bf16.mxu0 %v14768_v45  ;;  %v14819_v45 = vld [vmem:[%s15765_s28 + $0x588] sm:$0xff]  }
  0x9d   : > { %13352 = vmatpush3.bf16.msra.mxu1 %v14767_v44  ;;  %v14818_v44 = vld [vmem:[%s15765_s28 + $0x508] sm:$0xff]  }
  0x9e   : > { %13353 = vmatprep.subr.bf16.mxu1 %v14769_v46  ;;  %v14820_v46 = vld [vmem:[%s15765_s28 + $0x540] sm:$0xff]  }
  0x9f   : > { %13332 = vmatpush3.bf16.msra.mxu0 %v14770_v47  ;;  %v14821_v47 = vld [vmem:[%s15765_s28 + $0x5c0] sm:$0xff]  }
  0xa0   : > { %13333 = vmatprep.subr.bf16.mxu0 %v14772_v49  ;;  %v14823_v49 = vld [vmem:[%s15765_s28 + $0x580] sm:$0xff]  }
  0xa1   : > { %13354 = vmatpush3.bf16.msra.mxu1 %v14771_v48  ;;  %v14822_v48 = vld [vmem:[%s15765_s28 + $0x500] sm:$0xff]  }
  0xa2   : > { %13355 = vmatprep.subr.bf16.mxu1 %v14773_v50  ;;  %v2447_v50 = vrot.slane %v15953_v5, %v15803_v42  ;;  %v14842_v5 = vld [vmem:[%s15765_s28 + $0x6d8] sm:$0xff]  }
  0xa3   : > { %13334 = vmatpush3.bf16.msra.mxu0 %v14774_v51  ;;  %v14825_v51 = vld [vmem:[%s15765_s28 + $0x678] sm:$0xff]  }
  0xa4   : > { %13335 = vmatprep.subr.bf16.mxu0 %v14776_v53  ;;  %v14827_v53 = vld [vmem:[%s15765_s28 + $0x638] sm:$0xff]  }
  0xa5   : > { %13356 = vmatpush3.bf16.msra.mxu1 %v14775_v52  ;;  %v14826_v52 = vld [vmem:[%s15765_s28 + $0x6f8] sm:$0xff]  }
  0xa6   : > { %13357 = vmatprep.subr.bf16.mxu1 %v14777_v54  ;;  %v14828_v54 = vld [vmem:[%s15765_s28 + $0x6b8] sm:$0xff]  }
  0xa7   : > { %13336 = vmatpush3.bf16.msra.mxu0 %v14778_v55  ;;  %v2463_v55 = vcombine.high %v2447_v50, %v2447_v50 }
  0xa8   : > { %13337 = vmatprep.subr.bf16.mxu0 %v14780_v57  ;;  %v14830_v57 = vld [vmem:[%s15765_s28 + $0x6f0] sm:$0xff]  }
  0xa9   : > { %13358 = vmatpush3.bf16.msra.mxu1 %v14779_v56  ;;  %v14829_v56 = vld [vmem:[%s15765_s28 + $0x670] sm:$0xff]  }
  0xaa   : > { %13359 = vmatprep.subr.bf16.mxu1 %v14781_v58  ;;  %v14831_v58 = vld [vmem:[%s15765_s28 + $0x630] sm:$0xff]  }
  0xab   : > { %13338 = vmatpush3.bf16.msra.mxu0 %v14782_v59  ;;  %v14832_v59 = vld [vmem:[%s15765_s28 + $0x6b0] sm:$0xff]  }
  0xac   : > { %13339 = vmatprep.subr.bf16.mxu0 %v14784_v61  ;;  %v14834_v61 = vld [vmem:[%s15765_s28 + $0x6e8] sm:$0xff]  }
  0xad   : > { %13360 = vmatpush3.bf16.msra.mxu1 %v14783_v60  ;;  %v14833_v60 = vld [vmem:[%s15765_s28 + $0x668] sm:$0xff]  }
  0xae   : > { %13361 = vmatprep.subr.bf16.mxu1 %v14785_v63  ;;  %v14836_v63 = vld [vmem:[%s15765_s28 + $0x6a8] sm:$0xff]  }
  0xaf   : > { %13340 = vmatpush3.bf16.msra.mxu0 %v14786_v2  ;;  %v14839_v2 = vld [vmem:[%s15765_s28 + $0x620] sm:$0xff]  }
  0xb0   : > { %13341 = vmatprep.subr.bf16.mxu0 %v14788_v6  ;;  %v14843_v6 = vld [vmem:[%s15765_s28 + $0x618] sm:$0xff]  }
  0xb1   : > { %13362 = vmatpush3.bf16.msra.mxu1 %v14787_v3  ;;  %v14840_v3 = vld [vmem:[%s15765_s28 + $0x6a0] sm:$0xff]  }
  0xb2   : > { %13363 = vmatprep.subr.bf16.mxu1 %v14789_v7  ;;  %v14844_v7 = vld [vmem:[%s15765_s28 + $0x698] sm:$0xff]  }
  0xb3   : > { %13342 = vmatpush3.bf16.msra.mxu0 %v14790_v10  ;;  %v14847_v10 = vld [vmem:[%s15765_s28 + $0x610] sm:$0xff]  }
  0xb4   : > { %13371 = vmatprep.subr.bf16.mxu0 %v14792_v14  ;;  %v242_v14 = vld [vmem:[%s15760_s24 + $0x18] sm:$0xff] }
  0xb5   : > { %13364 = vmatpush3.bf16.msra.mxu1 %v14791_v11  ;;  %v14848_v11 = vld [vmem:[%s15765_s28 + $0x690] sm:$0xff]  }
  0xb6   : > { %9728 = vmatmul.mubr.bf16.vlgmr.msra.gmra.mxu0 %v2440_v13  ;;  %13393 = vmatprep.subr.bf16.mxu1 %v14793_v15  ;;  %v14850_v13 = vld [vmem:[%s15765_s28 + $0x6c8] sm:$0xff]  }
  0xb7   : > { %13372 = vmatpush3.bf16.msra.mxu0 %v14794_v17  ;;  %9807 = vmatprep.mubr.bf16.mxu0 %v2461_v16  ;;  %v14851_v15 = vld [vmem:[%s15765_s28 + $0x608] sm:$0xff]   ;;  %v2473_v16 = vrot.slane %v242_v14, %v15803_v42  ;;  %v2466_v17 = vcombine.high %v242_v14, %v242_v14  ;;  %v14891_v14 = vld [vmem:[%s15765_s28 + $0x8f8] sm:$0xff]  }
  0xb8   : > { %9768 = vmatmul.mubr.bf16.vlgmr.msra.gmra.mxu1 %v2462_v19  ;;  %13373 = vmatprep.subr.bf16.mxu0 %v14796_v20  ;;  %v14853_v19 = vld [vmem:[%s15765_s28 + $0x640] sm:$0xff]  }
  0xb9   : > { %13394 = vmatpush3.bf16.msra.mxu1 %v14795_v18  ;;  %9847 = vmatprep.mubr.bf16.mxu1 %v2465_v22  ;;  %v14852_v18 = vld [vmem:[%s15765_s28 + $0x688] sm:$0xff]   ;;  %v2481_v20 = vcombine.high %v2473_v16, %v2473_v16  ;;  %v14854_v22 = vld [vmem:[%s15765_s28 + $0x6c0] sm:$0xff]  }
  0xba   : > { %13395 = vmatprep.subr.bf16.mxu1 %v14797_v21  ;;  %v16030_v21 = vrot.slane %v2466_v17, %v15803_v42 }
  0xbb   : > { %13374 = vmatpush3.bf16.msra.mxu0 %v14798_v23  ;;  %v14855_v23 = vld [vmem:[%s15765_s28 + $0x600] sm:$0xff]  }
  0xbc   : > { %13375 = vmatprep.subr.bf16.mxu0 %v14800_v25  ;;  %v2482_v25 = vcombine.high %v16030_v21, %v16030_v21 }
  0xbd   : > { %13396 = vmatpush3.bf16.msra.mxu1 %v14799_v24  ;;  %v2503_v24 = vrot.slane %v2481_v20, %v15803_v42 }
  0xbe   : > { %13397 = vmatprep.subr.bf16.mxu1 %v14801_v26  ;;  %v14856_v26 = vld [vmem:[%s15765_s28 + $0x680] sm:$0xff]  }
  0xbf   : > { %13376 = vmatpush3.bf16.msra.mxu0 %v14802_v27  ;;  %v2513_v27 = vcombine.high %v2503_v24, %v2503_v24 }
  0xc0   : > { %13377 = vmatprep.subr.bf16.mxu0 %v14804_v29  ;;  %v14857_v29 = vld [vmem:[%s15765_s28 + $0x778] sm:$0xff]  }
  0xc1   : > { %13398 = vmatpush3.bf16.msra.mxu1 %v14803_v28  ;;  %v2489_v28 = vrot.slane %v2473_v16, %v15803_v42  ;;  %v14893_v16 = vld [vmem:[%s15765_s28 + $0x8b8] sm:$0xff]  }
  0xc2   : > { %13399 = vmatprep.subr.bf16.mxu1 %v14805_v30  ;;  %v14858_v30 = vld [vmem:[%s15765_s28 + $0x7f8] sm:$0xff]  }
  0xc3   : > { %13378 = vmatpush3.bf16.msra.mxu0 %v14806_v31  ;;  %v2510_v31 = vrot.slane %v2482_v25, %v15803_v42  ;;  %v14898_v25 = vld [vmem:[%s15765_s28 + $0x868] sm:$0xff]  }
  0xc4   : > { %13379 = vmatprep.subr.bf16.mxu0 %v14808_v33  ;;  %v14860_v33 = vld [vmem:[%s15765_s28 + $0x7b8] sm:$0xff]  }
  0xc5   : > { %13400 = vmatpush3.bf16.msra.mxu1 %v14807_v32  ;;  %v14859_v32 = vld [vmem:[%s15765_s28 + $0x738] sm:$0xff]  }
  0xc6   : > { %13401 = vmatprep.subr.bf16.mxu1 %v14809_v34  ;;  %v2511_v34 = vcombine.high %v2489_v28, %v2489_v28 }
  0xc7   : > { %13380 = vmatpush3.bf16.msra.mxu0 %v14810_v35  ;;  %v14861_v35 = vld [vmem:[%s15765_s28 + $0x770] sm:$0xff]  }
  0xc8   : > { %13381 = vmatprep.subr.bf16.mxu0 %v14812_v37  ;;  %v2514_v37 = vcombine.high %v2510_v31, %v2510_v31 }
  0xc9   : > { %13402 = vmatpush3.bf16.msra.mxu1 %v14811_v36  ;;  %v14862_v36 = vld [vmem:[%s15765_s28 + $0x7f0] sm:$0xff]  }
  0xca   : > { %13403 = vmatprep.subr.bf16.mxu1 %v14813_v38 }
  0xcb   : > { %13382 = vmatpush3.bf16.msra.mxu0 %v14814_v39  ;;  %v14863_v39 = vld [vmem:[%s15765_s28 + $0x730] sm:$0xff]  }
  0xcc   : > { %13383 = vmatprep.subr.bf16.mxu0 %v14816_v41 }
  0xcd   : > { %13404 = vmatpush3.bf16.msra.mxu1 %v14815_v40  ;;  %v14864_v40 = vld [vmem:[%s15765_s28 + $0x7b0] sm:$0xff]  }
  0xce   : > { %13405 = vmatprep.subr.bf16.mxu1 %v14817_v43 }
  0xcf   : > { %13384 = vmatpush3.bf16.msra.mxu0 %v14818_v44  ;;  %v14865_v44 = vld [vmem:[%s15765_s28 + $0x768] sm:$0xff]  }
  0xd0   : > { %13385 = vmatprep.subr.bf16.mxu0 %v14820_v46  ;;  %v14866_v46 = vld [vmem:[%s15765_s28 + $0x7e8] sm:$0xff]  }
  0xd1   : > { %13406 = vmatpush3.bf16.msra.mxu1 %v14819_v45 }
  0xd2   : > { %13407 = vmatprep.subr.bf16.mxu1 %v14821_v47 }
  0xd3   : > { %13386 = vmatpush3.bf16.msra.mxu0 %v14822_v48 }
  0xd4   : > { %13415 = vmatprep.subr.bf16.mxu0 %v14825_v51  ;;  %v14868_v51 = vld [vmem:[%s15765_s28 + $0x7a8] sm:$0xff]  }
  0xd5   : > { %13408 = vmatpush3.bf16.msra.mxu1 %v14823_v49  ;;  %v14867_v49 = vld [vmem:[%s15765_s28 + $0x728] sm:$0xff]  }
  0xd6   : > { %9808 = vmatmul.mubr.bf16.vlgmr.msra.gmra.mxu0 %v2447_v50  ;;  %13437 = vmatprep.subr.bf16.mxu1 %v14826_v52 }
  0xd7   : > { %13416 = vmatpush3.bf16.msra.mxu0 %v14827_v53  ;;  %9887 = vmatprep.mubr.bf16.mxu0 %v2503_v24 }
  0xd8   : > { %9848 = vmatmul.mubr.bf16.vlgmr.msra.gmra.mxu1 %v2463_v55  ;;  %13417 = vmatprep.subr.bf16.mxu0 %v14829_v56  ;;  %v14870_v56 = vld [vmem:[%s15765_s28 + $0x7e0] sm:$0xff]  }
  0xd9   : > { %13438 = vmatpush3.bf16.msra.mxu1 %v14828_v54  ;;  %9927 = vmatprep.mubr.bf16.mxu1 %v2513_v27  ;;  %v14869_v54 = vld [vmem:[%s15765_s28 + $0x760] sm:$0xff]   ;;  %v14899_v27 = vld [vmem:[%s15765_s28 + $0x8e8] sm:$0xff]  }
  0xda   : > { %13439 = vmatprep.subr.bf16.mxu1 %v14830_v57 }
  0xdb   : > { %13418 = vmatpush3.bf16.msra.mxu0 %v14831_v58  ;;  %v14871_v58 = vld [vmem:[%s15765_s28 + $0x720] sm:$0xff]  }
  0xdc   : > { %13419 = vmatprep.subr.bf16.mxu0 %v14833_v60  ;;  %v14873_v60 = vld [vmem:[%s15765_s28 + $0x758] sm:$0xff]  }
  0xdd   : > { %13440 = vmatpush3.bf16.msra.mxu1 %v14832_v59  ;;  %v14872_v59 = vld [vmem:[%s15765_s28 + $0x7a0] sm:$0xff]  }
  0xde   : > { %13441 = vmatprep.subr.bf16.mxu1 %v14834_v61  ;;  %v14874_v61 = vld [vmem:[%s15765_s28 + $0x7d8] sm:$0xff]  }
  0xdf   : > { %13420 = vmatpush3.bf16.msra.mxu0 %v14835_v62  ;;  %v14875_v62 = vld [vmem:[%s15765_s28 + $0x718] sm:$0xff]  }
  0xe0   : > { %13421 = vmatprep.subr.bf16.mxu0 %v14837_v0  ;;  %v14877_v0 = vld [vmem:[%s15765_s28 + $0x750] sm:$0xff]  }
  0xe1   : > { %13442 = vmatpush3.bf16.msra.mxu1 %v14836_v63  ;;  %v14876_v63 = vld [vmem:[%s15765_s28 + $0x798] sm:$0xff]  }
  0xe2   : > { %13443 = vmatprep.subr.bf16.mxu1 %v14838_v1  ;;  %v14878_v1 = vld [vmem:[%s15765_s28 + $0x7d0] sm:$0xff]  }
  0xe3   : > { %13422 = vmatpush3.bf16.msra.mxu0 %v14839_v2  ;;  %v14879_v2 = vld [vmem:[%s15765_s28 + $0x710] sm:$0xff]  }
  0xe4   : > { %13423 = vmatprep.subr.bf16.mxu0 %v14841_v4  ;;  %v14881_v4 = vld [vmem:[%s15765_s28 + $0x748] sm:$0xff]  }
  0xe5   : > { %13444 = vmatpush3.bf16.msra.mxu1 %v14840_v3  ;;  %v14880_v3 = vld [vmem:[%s15765_s28 + $0x790] sm:$0xff]  }
  0xe6   : > { %13445 = vmatprep.subr.bf16.mxu1 %v14842_v5  ;;  %v14882_v5 = vld [vmem:[%s15765_s28 + $0x7c8] sm:$0xff]  }
  0xe7   : > { %13424 = vmatpush3.bf16.msra.mxu0 %v14843_v6  ;;  %v14883_v6 = vld [vmem:[%s15765_s28 + $0x708] sm:$0xff]  }
  0xe8   : > { %13425 = vmatprep.subr.bf16.mxu0 %v14845_v8  ;;  %v14885_v8 = vld [vmem:[%s15765_s28 + $0x740] sm:$0xff]  }
  0xe9   : > { %13446 = vmatpush3.bf16.msra.mxu1 %v14844_v7  ;;  %v14884_v7 = vld [vmem:[%s15765_s28 + $0x788] sm:$0xff]  }
  0xea   : > { %13447 = vmatprep.subr.bf16.mxu1 %v14846_v9  ;;  %v14886_v9 = vld [vmem:[%s15765_s28 + $0x7c0] sm:$0xff]  }
  0xeb   : > { %13426 = vmatpush3.bf16.msra.mxu0 %v14847_v10  ;;  %v14887_v10 = vld [vmem:[%s15765_s28 + $0x700] sm:$0xff]  }
  0xec   : > { %13427 = vmatprep.subr.bf16.mxu0 %v14849_v12  ;;  %v2496_v12 = vrot.slane %v16030_v21, %v15803_v42  ;;  %v14896_v21 = vld [vmem:[%s15765_s28 + $0x830] sm:$0xff]  }
  0xed   : > { %13448 = vmatpush3.bf16.msra.mxu1 %v14848_v11  ;;  %v14888_v11 = vld [vmem:[%s15765_s28 + $0x780] sm:$0xff]  }
  0xee   : > { %13449 = vmatprep.subr.bf16.mxu1 %v14850_v13  ;;  %v14890_v13 = vld [vmem:[%s15765_s28 + $0x878] sm:$0xff]   ;;  %v2512_v17 = vcombine.high %v2496_v12, %v2496_v12 }
  0xef   : > { %13428 = vmatpush3.bf16.msra.mxu0 %v14851_v15  ;;  %v14892_v15 = vld [vmem:[%s15765_s28 + $0x838] sm:$0xff]  }
  0xf0   : > { %13429 = vmatprep.subr.bf16.mxu0 %v14853_v19  ;;  %v14895_v19 = vld [vmem:[%s15765_s28 + $0x8f0] sm:$0xff]  }
  0xf1   : > { %13450 = vmatpush3.bf16.msra.mxu1 %v14852_v18  ;;  %v14894_v18 = vld [vmem:[%s15765_s28 + $0x870] sm:$0xff]  }
  0xf2   : > { %13451 = vmatprep.subr.bf16.mxu1 %v14854_v22  ;;  %v14897_v22 = vld [vmem:[%s15765_s28 + $0x8b0] sm:$0xff]  }
  0xf3   : > { %13430 = vmatpush3.bf16.msra.mxu0 %v14855_v23 }
  0xf4   : > { %13459 = vmatprep.subr.bf16.mxu0 %v14857_v29 }
  0xf5   : > { %13452 = vmatpush3.bf16.msra.mxu1 %v14856_v26 }
  0xf6   : > { %v13167_v38 = vpop.f32.mrf.mxu0  ;;  %9888 = vmatmul.mubr.bf16.vlgmr.msra.gmra.mxu0 %v2489_v28  ;;  %13481 = vmatprep.subr.bf16.mxu1 %v14858_v30  ;;  %v14900_v30 = vld [vmem:[%s15765_s28 + $0x828] sm:$0xff]  }
  0xf7   : > { %13460 = vmatpush3.bf16.msra.mxu0 %v14859_v32  ;;  %9967 = vmatprep.mubr.bf16.mxu0 %v2510_v31  ;;  %v13189_v41 = vpop.f32.mrf.mxu1 }
  0xf8   : > { %9928 = vmatmul.mubr.bf16.vlgmr.msra.gmra.mxu1 %v2511_v34  ;;  %v13168_v43 = vpop.f32.mrf.mxu0  ;;  %13461 = vmatprep.subr.bf16.mxu0 %v14861_v35 }
  0xf9   : > { %13482 = vmatpush3.bf16.msra.mxu1 %v14860_v33  ;;  %v13169_v45 = vadd.f32 %v13168_v43, %v13167_v38  ;;  %10007 = vmatprep.mubr.bf16.mxu1 %v2514_v37  ;;  %v13190_v47 = vpop.f32.mrf.mxu1  ;;  %v14901_v33 = vld [vmem:[%s15765_s28 + $0x8a8] sm:$0xff]   ;;  %v14903_v38 = vld [vmem:[%s15765_s28 + $0x8e0] sm:$0xff]   ;;  %v14906_v43 = vld [vmem:[%s15765_s28 + $0x858] sm:$0xff]  }
  0xfa   : > { %v13170_v48 = vpop.f32.mrf.mxu0  ;;  %13483 = vmatprep.subr.bf16.mxu1 %v14862_v36  ;;  %v13191_v50 = vadd.f32 %v13190_v47, %v13189_v41  ;;  %v14902_v36 = vld [vmem:[%s15765_s28 + $0x860] sm:$0xff]   ;;  %v14910_v47 = vld [vmem:[%s15765_s28 + $0x850] sm:$0xff]  }
  0xfb   : > { %13462 = vmatpush3.bf16.msra.mxu0 %v14863_v39  ;;  %v13192_v52 = vpop.f32.mrf.mxu1  ;;  %v14905_v41 = vld [vmem:[%s15765_s28 + $0x8a0] sm:$0xff]   ;;  %v14911_v48 = vld [vmem:[%s15765_s28 + $0x8d0] sm:$0xff]  }
  0xfc   : > { %v13171_v53 = vpop.f32.mrf.mxu0  ;;  %13463 = vmatprep.subr.bf16.mxu0 %v14865_v44  ;;  %v16053_v55 = vadd.f32 %v13191_v50, %v13169_v45  ;;  %v14907_v44 = vld [vmem:[%s15765_s28 + $0x8d8] sm:$0xff]   ;;  %v14913_v50 = vld [vmem:[%s15765_s28 + $0x890] sm:$0xff]   ;;  %v14915_v52 = vld [vmem:[%s15765_s28 + $0x8c8] sm:$0xff]  }
  0xfd   : > { %13484 = vmatpush3.bf16.msra.mxu1 %v14864_v40  ;;  %v13193_v57 = vpop.f32.mrf.mxu1  ;;  %v14904_v40 = vld [vmem:[%s15765_s28 + $0x820] sm:$0xff]   ;;  %v14908_v45 = vld [vmem:[%s15765_s28 + $0x818] sm:$0xff]  }
  0xfe   : > { %13485 = vmatprep.subr.bf16.mxu1 %v14866_v46  ;;  %v14909_v46 = vld [vmem:[%s15765_s28 + $0x898] sm:$0xff]   ;;  %v243_v53 = vld [vmem:[%s15760_s24 + $0x20] sm:$0xff]  ;;  %v14917_v57 = vld [vmem:[%s15765_s28 + $0x888] sm:$0xff]  }
  0xff   : > { %13464 = vmatpush3.bf16.msra.mxu0 %v14867_v49  ;;  %v14912_v49 = vld [vmem:[%s15765_s28 + $0x810] sm:$0xff]  }
 0x100   : > { %13465 = vmatprep.subr.bf16.mxu0 %v14869_v54  ;;  %v14916_v54 = vld [vmem:[%s15765_s28 + $0x808] sm:$0xff]  }
 0x101   : > { %13486 = vmatpush3.bf16.msra.mxu1 %v14868_v51  ;;  %v14914_v51 = vld [vmem:[%s15765_s28 + $0x848] sm:$0xff]  }
 0x102   : > { %13487 = vmatprep.subr.bf16.mxu1 %v14870_v56  ;;  %v2515_v56 = vcombine.high %v243_v53, %v243_v53 }
 0x103   : > { %13466 = vmatpush3.bf16.msra.mxu0 %v14871_v58  ;;  %v14918_v58 = vld [vmem:[%s15765_s28 + $0x840] sm:$0xff]  }
 0x104   : > { %13467 = vmatprep.subr.bf16.mxu0 %v14873_v60  ;;  %v16111_v60 = vrot.slane %v2515_v56, %v15803_v42  ;;  %v14958_v56 = vld [vmem:[%s15765_s28 + $0xab8] sm:$0xff]  }
 0x105   : > { %13488 = vmatpush3.bf16.msra.mxu1 %v14872_v59 }
 0x106   : > { %13489 = vmatprep.subr.bf16.mxu1 %v14874_v61  ;;  %v14919_v61 = vld [vmem:[%s15765_s28 + $0x8c0] sm:$0xff]  }
 0x107   : > { %13468 = vmatpush3.bf16.msra.mxu0 %v14875_v62  ;;  %v14920_v62 = vld [vmem:[%s15765_s28 + $0x800] sm:$0xff]  }
 0x108   : > { %13469 = vmatprep.subr.bf16.mxu0 %v14877_v0  ;;  %v2531_v0 = vcombine.high %v16111_v60, %v16111_v60 }
 0x109   : > { %13490 = vmatpush3.bf16.msra.mxu1 %v14876_v63 }
 0x10a   : > { %13491 = vmatprep.subr.bf16.mxu1 %v14878_v1  ;;  %v14921_v1 = vld [vmem:[%s15765_s28 + $0x880] sm:$0xff]  }
 0x10b   : > { %13470 = vmatpush3.bf16.msra.mxu0 %v14879_v2 }
 0x10c   : > { %13471 = vmatprep.subr.bf16.mxu0 %v14881_v4  ;;  %v14922_v4 = vld [vmem:[%s15765_s28 + $0x978] sm:$0xff]  }
 0x10d   : > { %13492 = vmatpush3.bf16.msra.mxu1 %v14880_v3 }
 0x10e   : > { %13493 = vmatprep.subr.bf16.mxu1 %v14882_v5  ;;  %v14923_v5 = vld [vmem:[%s15765_s28 + $0x9f8] sm:$0xff]  }
 0x10f   : > { %13472 = vmatpush3.bf16.msra.mxu0 %v14883_v6  ;;  %v2559_v6 = vrot.slane %v2531_v0, %v15803_v42 }
 0x110   : > { %13473 = vmatprep.subr.bf16.mxu0 %v14885_v8  ;;  %v14925_v8 = vld [vmem:[%s15765_s28 + $0x9b8] sm:$0xff]  }
 0x111   : > { %13494 = vmatpush3.bf16.msra.mxu1 %v14884_v7  ;;  %v14924_v7 = vld [vmem:[%s15765_s28 + $0x938] sm:$0xff]  }
 0x112   : > { %13495 = vmatprep.subr.bf16.mxu1 %v14886_v9 }
 0x113   : > { %13474 = vmatpush3.bf16.msra.mxu0 %v14887_v10  ;;  %v14926_v10 = vld [vmem:[%s15765_s28 + $0x970] sm:$0xff]  }
 0x114   : > { %13503 = vmatprep.subr.bf16.mxu0 %v14890_v13 }
 0x115   : > { %13496 = vmatpush3.bf16.msra.mxu1 %v14888_v11  ;;  %v14927_v11 = vld [vmem:[%s15765_s28 + $0x9f0] sm:$0xff]  }
 0x116   : > { %v13211_v20 = vpop.f32.mrf.mxu0  ;;  %9968 = vmatmul.mubr.bf16.vlgmr.msra.gmra.mxu0 %v2496_v12  ;;  %13525 = vmatprep.subr.bf16.mxu1 %v14891_v14  ;;  %v2563_v12 = vcombine.high %v2559_v6, %v2559_v6  ;;  %v14928_v14 = vld [vmem:[%s15765_s28 + $0x930] sm:$0xff]  }
 0x117   : > { %13504 = vmatpush3.bf16.msra.mxu0 %v14892_v15  ;;  %v13233_v23 = vpop.f32.mrf.mxu1  ;;  %v14929_v15 = vld [vmem:[%s15765_s28 + $0x9b0] sm:$0xff]  }
 0x118   : > { %10008 = vmatmul.mubr.bf16.vlgmr.msra.gmra.mxu1 %v2512_v17  ;;  %v13212_v24 = vpop.f32.mrf.mxu0  ;;  %13505 = vmatprep.subr.bf16.mxu0 %v14894_v18  ;;  %v14930_v18 = vld [vmem:[%s15765_s28 + $0x968] sm:$0xff]  }
 0x119   : > { %13526 = vmatpush3.bf16.msra.mxu1 %v14893_v16  ;;  %v13213_v26 = vadd.f32 %v13212_v24, %v13211_v20  ;;  %v13234_v28 = vpop.f32.mrf.mxu1  ;;  %v14931_v20 = vld [vmem:[%s15765_s28 + $0x9e8] sm:$0xff]  }
 0x11a   : > { %v13214_v29 = vpop.f32.mrf.mxu0  ;;  %13527 = vmatprep.subr.bf16.mxu1 %v14895_v19  ;;  %v13235_v32 = vadd.f32 %v13234_v28, %v13233_v23  ;;  %v14932_v23 = vld [vmem:[%s15765_s28 + $0x928] sm:$0xff]  }
 0x11b   : > { %v9490_v31 = vadd.f32 %v13213_v26, %v16053_v55  ;;  %13506 = vmatpush3.bf16.msra.mxu0 %v14896_v21  ;;  %v13236_v34 = vpop.f32.mrf.mxu1  ;;  %v2522_v55 = vrot.slane %v243_v53, %v15803_v42  ;;  %v14933_v26 = vld [vmem:[%s15765_s28 + $0x9a8] sm:$0xff]   ;;  %v14934_v29 = vld [vmem:[%s15765_s28 + $0x960] sm:$0xff]   ;;  %v14955_v53 = vld [vmem:[%s15765_s28 + $0xa78] sm:$0xff]  }
 0x11c   : > { %v13215_v35 = vpop.f32.mrf.mxu0  ;;  %13507 = vmatprep.subr.bf16.mxu0 %v14898_v25  ;;  %v14937_v34 = vld [vmem:[%s15765_s28 + $0x9a0] sm:$0xff]  }
 0x11d   : > { %v16090_v37 = vadd.f32 %v13235_v32, %v9490_v31  ;;  %13528 = vmatpush3.bf16.msra.mxu1 %v14897_v22  ;;  %v13237_v39 = vpop.f32.mrf.mxu1  ;;  %v2530_v59 = vcombine.high %v2522_v55, %v2522_v55  ;;  %v2538_v3 = vrot.slane %v2522_v55, %v15803_v42  ;;  %v14935_v31 = vld [vmem:[%s15765_s28 + $0x9e0] sm:$0xff]   ;;  %v14938_v35 = vld [vmem:[%s15765_s28 + $0x958] sm:$0xff]  }
 0x11e   : > { %13529 = vmatprep.subr.bf16.mxu1 %v14899_v27  ;;  %v14942_v39 = vld [vmem:[%s15765_s28 + $0x950] sm:$0xff]   ;;  %v14957_v55 = vld [vmem:[%s15765_s28 + $0xa38] sm:$0xff]  }
 0x11f   : > { %13508 = vmatpush3.bf16.msra.mxu0 %v14900_v30  ;;  %v2552_v63 = vrot.slane %v2530_v59, %v15803_v42  ;;  %v2560_v9 = vcombine.high %v2538_v3, %v2538_v3  ;;  %v14960_v59 = vld [vmem:[%s15765_s28 + $0xaf0] sm:$0xff]  }
 0x120   : > { %13509 = vmatprep.subr.bf16.mxu0 %v14902_v36  ;;  %v14939_v36 = vld [vmem:[%s15765_s28 + $0x9d8] sm:$0xff]  }
 0x121   : > { %13530 = vmatpush3.bf16.msra.mxu1 %v14901_v33  ;;  %10047 = vmatprep.mubr.bf16.mxu0 %v2552_v63  ;;  %v2562_v2 = vcombine.high %v2552_v63, %v2552_v63  ;;  %v14936_v33 = vld [vmem:[%s15765_s28 + $0x920] sm:$0xff]  }
 0x122   : > { %13531 = vmatprep.subr.bf16.mxu1 %v14903_v38  ;;  %v14941_v38 = vld [vmem:[%s15765_s28 + $0x998] sm:$0xff]  }
 0x123   : > { %13510 = vmatpush3.bf16.msra.mxu0 %v14904_v40  ;;  %10087 = vmatprep.mubr.bf16.mxu1 %v2562_v2  ;;  %v14943_v40 = vld [vmem:[%s15765_s28 + $0x9d0] sm:$0xff]  }
 0x124   : > { %13511 = vmatprep.subr.bf16.mxu0 %v14906_v43  ;;  %v14945_v43 = vld [vmem:[%s15765_s28 + $0x990] sm:$0xff]  }
 0x125   : > { %13532 = vmatpush3.bf16.msra.mxu1 %v14905_v41  ;;  %v14944_v41 = vld [vmem:[%s15765_s28 + $0x910] sm:$0xff]  }
 0x126   : > { %13533 = vmatprep.subr.bf16.mxu1 %v14907_v44  ;;  %v14946_v44 = vld [vmem:[%s15765_s28 + $0x948] sm:$0xff]  }
 0x127   : > { %13512 = vmatpush3.bf16.msra.mxu0 %v14908_v45  ;;  %v14947_v45 = vld [vmem:[%s15765_s28 + $0x9c8] sm:$0xff]  }
 0x128   : > { %13513 = vmatprep.subr.bf16.mxu0 %v14910_v47  ;;  %v14949_v47 = vld [vmem:[%s15765_s28 + $0x988] sm:$0xff]  }
 0x129   : > { %13534 = vmatpush3.bf16.msra.mxu1 %v14909_v46  ;;  %v14948_v46 = vld [vmem:[%s15765_s28 + $0x908] sm:$0xff]  }
 0x12a   : > { %13535 = vmatprep.subr.bf16.mxu1 %v14911_v48  ;;  %v14950_v48 = vld [vmem:[%s15765_s28 + $0x940] sm:$0xff]  }
 0x12b   : > { %13514 = vmatpush3.bf16.msra.mxu0 %v14912_v49  ;;  %v14951_v49 = vld [vmem:[%s15765_s28 + $0x9c0] sm:$0xff]  }
 0x12c   : > { %13515 = vmatprep.subr.bf16.mxu0 %v14914_v51  ;;  %v14953_v51 = vld [vmem:[%s15765_s28 + $0x980] sm:$0xff]  }
 0x12d   : > { %13536 = vmatpush3.bf16.msra.mxu1 %v14913_v50  ;;  %v14952_v50 = vld [vmem:[%s15765_s28 + $0x900] sm:$0xff]  }
 0x12e   : > { %13537 = vmatprep.subr.bf16.mxu1 %v14915_v52  ;;  %v2545_v52 = vrot.slane %v16111_v60, %v15803_v42  ;;  %v14961_v60 = vld [vmem:[%s15765_s28 + $0xa30] sm:$0xff]  }
 0x12f   : > { %13516 = vmatpush3.bf16.msra.mxu0 %v14916_v54  ;;  %v14956_v54 = vld [vmem:[%s15765_s28 + $0xaf8] sm:$0xff]  }
 0x130   : > { %13517 = vmatprep.subr.bf16.mxu0 %v14918_v58  ;;  %v14959_v58 = vld [vmem:[%s15765_s28 + $0xa70] sm:$0xff]  }
 0x131   : > { %13538 = vmatpush3.bf16.msra.mxu1 %v14917_v57  ;;  %v2561_v57 = vcombine.high %v2545_v52, %v2545_v52 }
 0x132   : > { %13539 = vmatprep.subr.bf16.mxu1 %v14919_v61 }
 0x133   : > { %13518 = vmatpush3.bf16.msra.mxu0 %v14920_v62  ;;  %v14962_v62 = vld [vmem:[%s15765_s28 + $0xab0] sm:$0xff]  }
 0x134   : > { %13547 = vmatprep.subr.bf16.mxu0 %v14922_v4 }
 0x135   : > { %13540 = vmatpush3.bf16.msra.mxu1 %v14921_v1  ;;  %v14963_v1 = vld [vmem:[%s15765_s28 + $0xa68] sm:$0xff]  }
 0x136   : > { %v13255_v13 = vpop.f32.mrf.mxu0  ;;  %10048 = vmatmul.mubr.bf16.vlgmr.msra.gmra.mxu0 %v2538_v3  ;;  %13569 = vmatprep.subr.bf16.mxu1 %v14923_v5  ;;  %v14964_v3 = vld [vmem:[%s15765_s28 + $0xae8] sm:$0xff]  }
 0x137   : > { %13548 = vmatpush3.bf16.msra.mxu0 %v14924_v7  ;;  %10127 = vmatprep.mubr.bf16.mxu0 %v2559_v6  ;;  %v14965_v6 = vld [vmem:[%s15765_s28 + $0xa28] sm:$0xff]  }
 0x138   : > { %v13277_v16 = vpop.f32.mrf.mxu1  ;;  %10088 = vmatmul.mubr.bf16.vlgmr.msra.gmra.mxu1 %v2560_v9  ;;  %v13256_v17 = vpop.f32.mrf.mxu0  ;;  %13549 = vmatprep.subr.bf16.mxu0 %v14926_v10  ;;  %v14966_v9 = vld [vmem:[%s15765_s28 + $0xaa8] sm:$0xff]  }
 0x139   : > { %13570 = vmatpush3.bf16.msra.mxu1 %v14925_v8  ;;  %v13257_v19 = vadd.f32 %v13256_v17, %v13255_v13  ;;  %10167 = vmatprep.mubr.bf16.mxu1 %v2563_v12  ;;  %v14967_v12 = vld [vmem:[%s15765_s28 + $0xa60] sm:$0xff]  }
 0x13a   : > { %v13278_v21 = vpop.f32.mrf.mxu1  ;;  %v13258_v22 = vpop.f32.mrf.mxu0  ;;  %13571 = vmatprep.subr.bf16.mxu1 %v14927_v11  ;;  %v14970_v17 = vld [vmem:[%s15765_s28 + $0xaa0] sm:$0xff]  }
 0x13b   : > { %v9570_v24 = vadd.f32 %v13257_v19, %v16090_v37  ;;  %v13279_v25 = vadd.f32 %v13278_v21, %v13277_v16  ;;  %13550 = vmatpush3.bf16.msra.mxu0 %v14928_v14  ;;  %v14940_v37 = vld [vmem:[%s15765_s28 + $0x918] sm:$0xff]   ;;  %v14968_v14 = vld [vmem:[%s15765_s28 + $0xae0] sm:$0xff]   ;;  %v14975_v22 = vld [vmem:[%s15765_s28 + $0xa50] sm:$0xff]  }
 0x13c   : > { %v13280_v27 = vpop.f32.mrf.mxu1  ;;  %v13259_v28 = vpop.f32.mrf.mxu0  ;;  %13551 = vmatprep.subr.bf16.mxu0 %v14930_v18  ;;  %v14969_v16 = vld [vmem:[%s15765_s28 + $0xa20] sm:$0xff]   ;;  %v14971_v18 = vld [vmem:[%s15765_s28 + $0xa58] sm:$0xff]  }
 0x13d   : > { %v16135_v30 = vadd.f32 %v13279_v25, %v9570_v24  ;;  %13572 = vmatpush3.bf16.msra.mxu1 %v14929_v15  ;;  %v14972_v19 = vld [vmem:[%s15765_s28 + $0xad8] sm:$0xff]   ;;  %v14977_v24 = vld [vmem:[%s15765_s28 + $0xa10] sm:$0xff]   ;;  %v14980_v27 = vld [vmem:[%s15765_s28 + $0xac8] sm:$0xff]  }
 0x13e   : > { %v13281_v32 = vpop.f32.mrf.mxu1  ;;  %13573 = vmatprep.subr.bf16.mxu1 %v14931_v20  ;;  %v14973_v20 = vld [vmem:[%s15765_s28 + $0xa18] sm:$0xff]   ;;  %v14978_v25 = vld [vmem:[%s15765_s28 + $0xa90] sm:$0xff]   ;;  %v244_v28 = vld [vmem:[%s15760_s24 + $0x28] sm:$0xff] }
 0x13f   : > { %13552 = vmatpush3.bf16.msra.mxu0 %v14932_v23  ;;  %v14974_v21 = vld [vmem:[%s15765_s28 + $0xa98] sm:$0xff]   ;;  %v14976_v23 = vld [vmem:[%s15765_s28 + $0xad0] sm:$0xff]   ;;  %v14982_v32 = vld [vmem:[%s15765_s28 + $0xa88] sm:$0xff]  }
 0x140   : > { %13553 = vmatprep.subr.bf16.mxu0 %v14934_v29  ;;  %v14981_v29 = vld [vmem:[%s15765_s28 + $0xa08] sm:$0xff]  }
 0x141   : > { %13574 = vmatpush3.bf16.msra.mxu1 %v14933_v26  ;;  %v14979_v26 = vld [vmem:[%s15765_s28 + $0xa48] sm:$0xff]  }
 0x142   : > { %13575 = vmatprep.subr.bf16.mxu1 %v14935_v31  ;;  %v2564_v31 = vcombine.high %v244_v28, %v244_v28 }
 0x143   : > { %13554 = vmatpush3.bf16.msra.mxu0 %v14936_v33  ;;  %v14983_v33 = vld [vmem:[%s15765_s28 + $0xa40] sm:$0xff]  }
 0x144   : > { %13555 = vmatprep.subr.bf16.mxu0 %v14938_v35  ;;  %v16193_v35 = vrot.slane %v2564_v31, %v15803_v42  ;;  %v15023_v31 = vld [vmem:[%s15765_s28 + $0xcb8] sm:$0xff]  }
 0x145   : > { %13576 = vmatpush3.bf16.msra.mxu1 %v14937_v34 }
 0x146   : > { %13577 = vmatprep.subr.bf16.mxu1 %v14939_v36  ;;  %v14984_v36 = vld [vmem:[%s15765_s28 + $0xac0] sm:$0xff]  }
 0x147   : > { %13556 = vmatpush3.bf16.msra.mxu0 %v14940_v37  ;;  %v14985_v37 = vld [vmem:[%s15765_s28 + $0xa00] sm:$0xff]  }
 0x148   : > { %13557 = vmatprep.subr.bf16.mxu0 %v14942_v39  ;;  %v2580_v39 = vcombine.high %v16193_v35, %v16193_v35 }
 0x149   : > { %13578 = vmatpush3.bf16.msra.mxu1 %v14941_v38 }
 0x14a   : > { %13579 = vmatprep.subr.bf16.mxu1 %v14943_v40  ;;  %v14986_v40 = vld [vmem:[%s15765_s28 + $0xa80] sm:$0xff]  }
 0x14b   : > { %13558 = vmatpush3.bf16.msra.mxu0 %v14944_v41 }
 0x14c   : > { %13559 = vmatprep.subr.bf16.mxu0 %v14946_v44  ;;  %v14987_v44 = vld [vmem:[%s15765_s28 + $0xb78] sm:$0xff]  }
 0x14d   : > { %13580 = vmatpush3.bf16.msra.mxu1 %v14945_v43 }
 0x14e   : > { %13581 = vmatprep.subr.bf16.mxu1 %v14947_v45  ;;  %v14988_v45 = vld [vmem:[%s15765_s28 + $0xbf8] sm:$0xff]  }
 0x14f   : > { %13560 = vmatpush3.bf16.msra.mxu0 %v14948_v46  ;;  %v2608_v46 = vrot.slane %v2580_v39, %v15803_v42 }
 0x150   : > { %13561 = vmatprep.subr.bf16.mxu0 %v14950_v48  ;;  %v14990_v48 = vld [vmem:[%s15765_s28 + $0xbb8] sm:$0xff]  }
 0x151   : > { %13582 = vmatpush3.bf16.msra.mxu1 %v14949_v47  ;;  %v14989_v47 = vld [vmem:[%s15765_s28 + $0xb38] sm:$0xff]  }
 0x152   : > { %13583 = vmatprep.subr.bf16.mxu1 %v14951_v49 }
 0x153   : > { %13562 = vmatpush3.bf16.msra.mxu0 %v14952_v50  ;;  %v14991_v50 = vld [vmem:[%s15765_s28 + $0xb70] sm:$0xff]  }
 0x154   : > { %13591 = vmatprep.subr.bf16.mxu0 %v14955_v53 }
 0x155   : > { %13584 = vmatpush3.bf16.msra.mxu1 %v14953_v51  ;;  %v14992_v51 = vld [vmem:[%s15765_s28 + $0xbf0] sm:$0xff]  }
 0x156   : > { %v13299_v61 = vpop.f32.mrf.mxu0  ;;  %10128 = vmatmul.mubr.bf16.vlgmr.msra.gmra.mxu0 %v2545_v52  ;;  %13613 = vmatprep.subr.bf16.mxu1 %v14956_v54  ;;  %v2612_v52 = vcombine.high %v2608_v46, %v2608_v46  ;;  %v14993_v54 = vld [vmem:[%s15765_s28 + $0xb30] sm:$0xff]  }
 0x157   : > { %13592 = vmatpush3.bf16.msra.mxu0 %v14957_v55  ;;  %v14994_v55 = vld [vmem:[%s15765_s28 + $0xbb0] sm:$0xff]  }
 0x158   : > { %v13321_v63 = vpop.f32.mrf.mxu1  ;;  %10168 = vmatmul.mubr.bf16.vlgmr.msra.gmra.mxu1 %v2561_v57  ;;  %v13300_v0 = vpop.f32.mrf.mxu0  ;;  %13593 = vmatprep.subr.bf16.mxu0 %v14959_v58  ;;  %v14995_v58 = vld [vmem:[%s15765_s28 + $0xb68] sm:$0xff]  }
 0x159   : > { %13614 = vmatpush3.bf16.msra.mxu1 %v14958_v56  ;;  %v13301_v2 = vadd.f32 %v13300_v0, %v13299_v61  ;;  %v14996_v61 = vld [vmem:[%s15765_s28 + $0xbe8] sm:$0xff]  }
 0x15a   : > { %v13322_v4 = vpop.f32.mrf.mxu1  ;;  %v13302_v5 = vpop.f32.mrf.mxu0  ;;  %13615 = vmatprep.subr.bf16.mxu1 %v14960_v59 }
 0x15b   : > { %v9650_v7 = vadd.f32 %v13301_v2, %v16135_v30  ;;  %v13323_v8 = vadd.f32 %v13322_v4, %v13321_v63  ;;  %13594 = vmatpush3.bf16.msra.mxu0 %v14961_v60  ;;  %v2571_v30 = vrot.slane %v244_v28, %v15803_v42  ;;  %v14997_v63 = vld [vmem:[%s15765_s28 + $0xb28] sm:$0xff]   ;;  %v14999_v5 = vld [vmem:[%s15765_s28 + $0xb60] sm:$0xff]   ;;  %v15020_v28 = vld [vmem:[%s15765_s28 + $0xc78] sm:$0xff]  }
 0x15c   : > { %v13324_v10 = vpop.f32.mrf.mxu1  ;;  %v13303_v11 = vpop.f32.mrf.mxu0  ;;  %13595 = vmatprep.subr.bf16.mxu0 %v14963_v1  ;;  %v14998_v2 = vld [vmem:[%s15765_s28 + $0xba8] sm:$0xff]  }
 0x15d   : > { %v16172_v13 = vadd.f32 %v13323_v8, %v9650_v7  ;;  %13616 = vmatpush3.bf16.msra.mxu1 %v14962_v62  ;;  %v2579_v34 = vcombine.high %v2571_v30, %v2571_v30  ;;  %v2587_v43 = vrot.slane %v2571_v30, %v15803_v42  ;;  %v15000_v7 = vld [vmem:[%s15765_s28 + $0xbe0] sm:$0xff]   ;;  %v15003_v11 = vld [vmem:[%s15765_s28 + $0xb58] sm:$0xff]  }
 0x15e   : > { %v13325_v15 = vpop.f32.mrf.mxu1  ;;  %13617 = vmatprep.subr.bf16.mxu1 %v14964_v3  ;;  %v15002_v10 = vld [vmem:[%s15765_s28 + $0xba0] sm:$0xff]   ;;  %v15022_v30 = vld [vmem:[%s15765_s28 + $0xc38] sm:$0xff]  }
 0x15f   : > { %13596 = vmatpush3.bf16.msra.mxu0 %v14965_v6  ;;  %v2601_v38 = vrot.slane %v2579_v34, %v15803_v42  ;;  %v2609_v49 = vcombine.high %v2587_v43, %v2587_v43  ;;  %v15007_v15 = vld [vmem:[%s15765_s28 + $0xb50] sm:$0xff]  }
 0x160   : > { %13597 = vmatprep.subr.bf16.mxu0 %v14967_v12  ;;  %v15004_v12 = vld [vmem:[%s15765_s28 + $0xbd8] sm:$0xff]   ;;  %v15025_v34 = vld [vmem:[%s15765_s28 + $0xcf0] sm:$0xff]  }
 0x161   : > { %13618 = vmatpush3.bf16.msra.mxu1 %v14966_v9  ;;  %10207 = vmatprep.mubr.bf16.mxu0 %v2601_v38  ;;  %v2611_v41 = vcombine.high %v2601_v38, %v2601_v38  ;;  %v15001_v9 = vld [vmem:[%s15765_s28 + $0xb20] sm:$0xff]  }
 0x162   : > { %13619 = vmatprep.subr.bf16.mxu1 %v14968_v14  ;;  %v15006_v14 = vld [vmem:[%s15765_s28 + $0xb98] sm:$0xff]  }
 0x163   : > { %13598 = vmatpush3.bf16.msra.mxu0 %v14969_v16  ;;  %10247 = vmatprep.mubr.bf16.mxu1 %v2611_v41  ;;  %v15008_v16 = vld [vmem:[%s15765_s28 + $0xbd0] sm:$0xff]  }
 0x164   : > { %13599 = vmatprep.subr.bf16.mxu0 %v14971_v18  ;;  %v15010_v18 = vld [vmem:[%s15765_s28 + $0xb90] sm:$0xff]  }
 0x165   : > { %13620 = vmatpush3.bf16.msra.mxu1 %v14970_v17  ;;  %v15009_v17 = vld [vmem:[%s15765_s28 + $0xb10] sm:$0xff]  }
 0x166   : > { %13621 = vmatprep.subr.bf16.mxu1 %v14972_v19  ;;  %v15011_v19 = vld [vmem:[%s15765_s28 + $0xb48] sm:$0xff]  }
 0x167   : > { %13600 = vmatpush3.bf16.msra.mxu0 %v14973_v20  ;;  %v15012_v20 = vld [vmem:[%s15765_s28 + $0xbc8] sm:$0xff]  }
 0x168   : > { %13601 = vmatprep.subr.bf16.mxu0 %v14975_v22  ;;  %v15014_v22 = vld [vmem:[%s15765_s28 + $0xb88] sm:$0xff]  }
 0x169   : > { %13622 = vmatpush3.bf16.msra.mxu1 %v14974_v21  ;;  %v15013_v21 = vld [vmem:[%s15765_s28 + $0xb08] sm:$0xff]  }
 0x16a   : > { %13623 = vmatprep.subr.bf16.mxu1 %v14976_v23  ;;  %v15015_v23 = vld [vmem:[%s15765_s28 + $0xb40] sm:$0xff]  }
 0x16b   : > { %13602 = vmatpush3.bf16.msra.mxu0 %v14977_v24  ;;  %v15016_v24 = vld [vmem:[%s15765_s28 + $0xbc0] sm:$0xff]  }
 0x16c   : > { %13603 = vmatprep.subr.bf16.mxu0 %v14979_v26  ;;  %v15018_v26 = vld [vmem:[%s15765_s28 + $0xb80] sm:$0xff]  }
 0x16d   : > { %13624 = vmatpush3.bf16.msra.mxu1 %v14978_v25  ;;  %v15017_v25 = vld [vmem:[%s15765_s28 + $0xb00] sm:$0xff]  }
 0x16e   : > { %13625 = vmatprep.subr.bf16.mxu1 %v14980_v27  ;;  %v2594_v27 = vrot.slane %v16193_v35, %v15803_v42  ;;  %v15026_v35 = vld [vmem:[%s15765_s28 + $0xc30] sm:$0xff]  }
 0x16f   : > { %13604 = vmatpush3.bf16.msra.mxu0 %v14981_v29  ;;  %v15021_v29 = vld [vmem:[%s15765_s28 + $0xcf8] sm:$0xff]  }
 0x170   : > { %13605 = vmatprep.subr.bf16.mxu0 %v14983_v33  ;;  %v15024_v33 = vld [vmem:[%s15765_s28 + $0xc70] sm:$0xff]  }
 0x171   : > { %13626 = vmatpush3.bf16.msra.mxu1 %v14982_v32  ;;  %v2610_v32 = vcombine.high %v2594_v27, %v2594_v27 }
 0x172   : > { %13627 = vmatprep.subr.bf16.mxu1 %v14984_v36 }
 0x173   : > { %13606 = vmatpush3.bf16.msra.mxu0 %v14985_v37  ;;  %v15027_v37 = vld [vmem:[%s15765_s28 + $0xcb0] sm:$0xff]  }
 0x174   : > { %13635 = vmatprep.subr.bf16.mxu0 %v14987_v44 }
 0x175   : > { %13628 = vmatpush3.bf16.msra.mxu1 %v14986_v40  ;;  %v15028_v40 = vld [vmem:[%s15765_s28 + $0xc68] sm:$0xff]  }
 0x176   : > { %v13343_v53 = vpop.f32.mrf.mxu0  ;;  %10208 = vmatmul.mubr.bf16.vlgmr.msra.gmra.mxu0 %v2587_v43  ;;  %13657 = vmatprep.subr.bf16.mxu1 %v14988_v45  ;;  %v15029_v43 = vld [vmem:[%s15765_s28 + $0xce8] sm:$0xff]  }
 0x177   : > { %13636 = vmatpush3.bf16.msra.mxu0 %v14989_v47  ;;  %10287 = vmatprep.mubr.bf16.mxu0 %v2608_v46  ;;  %v15030_v46 = vld [vmem:[%s15765_s28 + $0xc28] sm:$0xff]  }
 0x178   : > { %v13365_v56 = vpop.f32.mrf.mxu1  ;;  %10248 = vmatmul.mubr.bf16.vlgmr.msra.gmra.mxu1 %v2609_v49  ;;  %v13344_v57 = vpop.f32.mrf.mxu0  ;;  %13637 = vmatprep.subr.bf16.mxu0 %v14991_v50  ;;  %v15031_v49 = vld [vmem:[%s15765_s28 + $0xca8] sm:$0xff]  }
 0x179   : > { %13658 = vmatpush3.bf16.msra.mxu1 %v14990_v48  ;;  %v13345_v59 = vadd.f32 %v13344_v57, %v13343_v53  ;;  %10327 = vmatprep.mubr.bf16.mxu1 %v2612_v52  ;;  %v15032_v52 = vld [vmem:[%s15765_s28 + $0xc60] sm:$0xff]  }
 0x17a   : > { %v13366_v60 = vpop.f32.mrf.mxu1  ;;  %v13346_v62 = vpop.f32.mrf.mxu0  ;;  %13659 = vmatprep.subr.bf16.mxu1 %v14992_v51  ;;  %v15035_v57 = vld [vmem:[%s15765_s28 + $0xca0] sm:$0xff]  }
 0x17b   : > { %v9730_v0 = vadd.f32 %v13345_v59, %v16172_v13  ;;  %v13367_v1 = vadd.f32 %v13366_v60, %v13365_v56  ;;  %13638 = vmatpush3.bf16.msra.mxu0 %v14993_v54  ;;  %v15005_v13 = vld [vmem:[%s15765_s28 + $0xb18] sm:$0xff]   ;;  %v15033_v54 = vld [vmem:[%s15765_s28 + $0xce0] sm:$0xff]   ;;  %v15040_v62 = vld [vmem:[%s15765_s28 + $0xc50] sm:$0xff]  }
 0x17c   : > { %v13368_v3 = vpop.f32.mrf.mxu1  ;;  %v13347_v4 = vpop.f32.mrf.mxu0  ;;  %13639 = vmatprep.subr.bf16.mxu0 %v14995_v58  ;;  %v15034_v56 = vld [vmem:[%s15765_s28 + $0xc20] sm:$0xff]   ;;  %v15036_v58 = vld [vmem:[%s15765_s28 + $0xc58] sm:$0xff]  }
 0x17d   : > { %v16217_v6 = vadd.f32 %v13367_v1, %v9730_v0  ;;  %13660 = vmatpush3.bf16.msra.mxu1 %v14994_v55  ;;  %v15037_v59 = vld [vmem:[%s15765_s28 + $0xcd8] sm:$0xff]   ;;  %v15042_v0 = vld [vmem:[%s15765_s28 + $0xc10] sm:$0xff]   ;;  %v15045_v3 = vld [vmem:[%s15765_s28 + $0xcc8] sm:$0xff]  }
 0x17e   : > { %v13369_v8 = vpop.f32.mrf.mxu1  ;;  %13661 = vmatprep.subr.bf16.mxu1 %v14996_v61  ;;  %v15038_v61 = vld [vmem:[%s15765_s28 + $0xc18] sm:$0xff]   ;;  %v15043_v1 = vld [vmem:[%s15765_s28 + $0xc90] sm:$0xff]   ;;  %v15046_v4 = vld [vmem:[%s15765_s28 + $0xc08] sm:$0xff]  }
 0x17f   : > { %13640 = vmatpush3.bf16.msra.mxu0 %v14997_v63  ;;  %v15039_v60 = vld [vmem:[%s15765_s28 + $0xc98] sm:$0xff]   ;;  %v15041_v63 = vld [vmem:[%s15765_s28 + $0xcd0] sm:$0xff]  }
 0x180   : > { %13641 = vmatprep.subr.bf16.mxu0 %v14999_v5  ;;  %v245_v5 = vld [vmem:[%s15760_s24 + $0x30] sm:$0xff] }
 0x181   : > { %13662 = vmatpush3.bf16.msra.mxu1 %v14998_v2  ;;  %v15044_v2 = vld [vmem:[%s15765_s28 + $0xc48] sm:$0xff]   ;;  %v2613_v8 = vcombine.high %v245_v5, %v245_v5 }
 0x182   : > { %13663 = vmatprep.subr.bf16.mxu1 %v15000_v7  ;;  %v2620_v7 = vrot.slane %v245_v5, %v15803_v42  ;;  %v15086_v5 = vld [vmem:[%s15765_s28 + $0xef8] sm:$0xff]  }
 0x183   : > { %13642 = vmatpush3.bf16.msra.mxu0 %v15001_v9  ;;  %v15048_v9 = vld [vmem:[%s15765_s28 + $0xc40] sm:$0xff]  }
 0x184   : > { %13643 = vmatprep.subr.bf16.mxu0 %v15003_v11  ;;  %v2628_v11 = vcombine.high %v2620_v7, %v2620_v7 }
 0x185   : > { %13664 = vmatpush3.bf16.msra.mxu1 %v15002_v10  ;;  %v15049_v10 = vld [vmem:[%s15765_s28 + $0xcc0] sm:$0xff]  }
 0x186   : > { %13665 = vmatprep.subr.bf16.mxu1 %v15004_v12  ;;  %v16276_v12 = vrot.slane %v2613_v8, %v15803_v42 }
 0x187   : > { %13644 = vmatpush3.bf16.msra.mxu0 %v15005_v13  ;;  %v15050_v13 = vld [vmem:[%s15765_s28 + $0xc00] sm:$0xff]  }
 0x188   : > { %13645 = vmatprep.subr.bf16.mxu0 %v15007_v15  ;;  %v2650_v15 = vrot.slane %v2628_v11, %v15803_v42 }
 0x189   : > { %13666 = vmatpush3.bf16.msra.mxu1 %v15006_v14  ;;  %v15051_v14 = vld [vmem:[%s15765_s28 + $0xc80] sm:$0xff]  }
 0x18a   : > { %13667 = vmatprep.subr.bf16.mxu1 %v15008_v16  ;;  %v2629_v16 = vcombine.high %v16276_v12, %v16276_v12 }
 0x18b   : > { %13646 = vmatpush3.bf16.msra.mxu0 %v15009_v17  ;;  %v2636_v17 = vrot.slane %v2620_v7, %v15803_v42  ;;  %v15088_v7 = vld [vmem:[%s15765_s28 + $0xeb8] sm:$0xff]  }
 0x18c   : > { %13647 = vmatprep.subr.bf16.mxu0 %v15011_v19  ;;  %v2660_v19 = vcombine.high %v2650_v15, %v2650_v15 }
 0x18d   : > { %13668 = vmatpush3.bf16.msra.mxu1 %v15010_v18  ;;  %v15052_v18 = vld [vmem:[%s15765_s28 + $0xd78] sm:$0xff]  }
 0x18e   : > { %13669 = vmatprep.subr.bf16.mxu1 %v15012_v20  ;;  %v15053_v20 = vld [vmem:[%s15765_s28 + $0xdf8] sm:$0xff]  }
 0x18f   : > { %13648 = vmatpush3.bf16.msra.mxu0 %v15013_v21  ;;  %v2657_v21 = vrot.slane %v2629_v16, %v15803_v42  ;;  %v15093_v16 = vld [vmem:[%s15765_s28 + $0xe68] sm:$0xff]  }
 0x190   : > { %13649 = vmatprep.subr.bf16.mxu0 %v15015_v23  ;;  %v15055_v23 = vld [vmem:[%s15765_s28 + $0xdb8] sm:$0xff]  }
 0x191   : > { %13670 = vmatpush3.bf16.msra.mxu1 %v15014_v22  ;;  %v15054_v22 = vld [vmem:[%s15765_s28 + $0xd38] sm:$0xff]  }
 0x192   : > { %13671 = vmatprep.subr.bf16.mxu1 %v15016_v24  ;;  %v2658_v24 = vcombine.high %v2636_v17, %v2636_v17 }
 0x193   : > { %13650 = vmatpush3.bf16.msra.mxu0 %v15017_v25  ;;  %v15056_v25 = vld [vmem:[%s15765_s28 + $0xd70] sm:$0xff]  }
 0x194   : > { %13679 = vmatprep.subr.bf16.mxu0 %v15020_v28 }
 0x195   : > { %13672 = vmatpush3.bf16.msra.mxu1 %v15018_v26  ;;  %v15057_v26 = vld [vmem:[%s15765_s28 + $0xdf0] sm:$0xff]  }
 0x196   : > { %v13387_v36 = vpop.f32.mrf.mxu0  ;;  %10288 = vmatmul.mubr.bf16.vlgmr.msra.gmra.mxu0 %v2594_v27  ;;  %13701 = vmatprep.subr.bf16.mxu1 %v15021_v29  ;;  %v2661_v27 = vcombine.high %v2657_v21, %v2657_v21  ;;  %v15058_v29 = vld [vmem:[%s15765_s28 + $0xd30] sm:$0xff]  }
 0x197   : > { %13680 = vmatpush3.bf16.msra.mxu0 %v15022_v30  ;;  %10367 = vmatprep.mubr.bf16.mxu0 %v2650_v15  ;;  %v15059_v30 = vld [vmem:[%s15765_s28 + $0xdb0] sm:$0xff]  }
 0x198   : > { %v13409_v38 = vpop.f32.mrf.mxu1  ;;  %10328 = vmatmul.mubr.bf16.vlgmr.msra.gmra.mxu1 %v2610_v32  ;;  %v13388_v39 = vpop.f32.mrf.mxu0  ;;  %13681 = vmatprep.subr.bf16.mxu0 %v15024_v33  ;;  %v15060_v33 = vld [vmem:[%s15765_s28 + $0xd68] sm:$0xff]  }
 0x199   : > { %13702 = vmatpush3.bf16.msra.mxu1 %v15023_v31  ;;  %v13389_v41 = vadd.f32 %v13388_v39, %v13387_v36  ;;  %10407 = vmatprep.mubr.bf16.mxu1 %v2660_v19  ;;  %v15061_v36 = vld [vmem:[%s15765_s28 + $0xde8] sm:$0xff]  }
 0x19a   : > { %v13410_v44 = vpop.f32.mrf.mxu1  ;;  %v13390_v45 = vpop.f32.mrf.mxu0  ;;  %13703 = vmatprep.subr.bf16.mxu1 %v15025_v34 }
 0x19b   : > { %v9810_v47 = vadd.f32 %v13389_v41, %v16217_v6  ;;  %v13411_v48 = vadd.f32 %v13410_v44, %v13409_v38  ;;  %13682 = vmatpush3.bf16.msra.mxu0 %v15026_v35  ;;  %v15047_v6 = vld [vmem:[%s15765_s28 + $0xc88] sm:$0xff]   ;;  %v15064_v45 = vld [vmem:[%s15765_s28 + $0xd60] sm:$0xff]  }
 0x19c   : > { %v13412_v50 = vpop.f32.mrf.mxu1  ;;  %v13391_v51 = vpop.f32.mrf.mxu0  ;;  %13683 = vmatprep.subr.bf16.mxu0 %v15028_v40  ;;  %v15062_v38 = vld [vmem:[%s15765_s28 + $0xd28] sm:$0xff]  }
 0x19d   : > { %v16254_v53 = vadd.f32 %v13411_v48, %v9810_v47  ;;  %13704 = vmatpush3.bf16.msra.mxu1 %v15027_v37  ;;  %v15063_v41 = vld [vmem:[%s15765_s28 + $0xda8] sm:$0xff]   ;;  %v15065_v47 = vld [vmem:[%s15765_s28 + $0xde0] sm:$0xff]   ;;  %v15068_v51 = vld [vmem:[%s15765_s28 + $0xd58] sm:$0xff]  }
 0x19e   : > { %v13413_v55 = vpop.f32.mrf.mxu1  ;;  %13705 = vmatprep.subr.bf16.mxu1 %v15029_v43  ;;  %v15067_v50 = vld [vmem:[%s15765_s28 + $0xda0] sm:$0xff]  }
 0x19f   : > { %13684 = vmatpush3.bf16.msra.mxu0 %v15030_v46  ;;  %v15072_v55 = vld [vmem:[%s15765_s28 + $0xd50] sm:$0xff]  }
 0x1a0   : > { %13685 = vmatprep.subr.bf16.mxu0 %v15032_v52  ;;  %v15069_v52 = vld [vmem:[%s15765_s28 + $0xdd8] sm:$0xff]  }
 0x1a1   : > { %13706 = vmatpush3.bf16.msra.mxu1 %v15031_v49  ;;  %v15066_v49 = vld [vmem:[%s15765_s28 + $0xd20] sm:$0xff]  }
 0x1a2   : > { %13707 = vmatprep.subr.bf16.mxu1 %v15033_v54  ;;  %v15071_v54 = vld [vmem:[%s15765_s28 + $0xd98] sm:$0xff]  }
 0x1a3   : > { %13686 = vmatpush3.bf16.msra.mxu0 %v15034_v56  ;;  %v15073_v56 = vld [vmem:[%s15765_s28 + $0xdd0] sm:$0xff]  }
 0x1a4   : > { %13687 = vmatprep.subr.bf16.mxu0 %v15036_v58  ;;  %v15075_v58 = vld [vmem:[%s15765_s28 + $0xd90] sm:$0xff]  }
 0x1a5   : > { %13708 = vmatpush3.bf16.msra.mxu1 %v15035_v57  ;;  %v15074_v57 = vld [vmem:[%s15765_s28 + $0xd10] sm:$0xff]  }
 0x1a6   : > { %13709 = vmatprep.subr.bf16.mxu1 %v15037_v59  ;;  %v15076_v59 = vld [vmem:[%s15765_s28 + $0xd48] sm:$0xff]  }
 0x1a7   : > { %13688 = vmatpush3.bf16.msra.mxu0 %v15038_v61  ;;  %v15077_v61 = vld [vmem:[%s15765_s28 + $0xdc8] sm:$0xff]  }
 0x1a8   : > { %13689 = vmatprep.subr.bf16.mxu0 %v15040_v62  ;;  %v15079_v62 = vld [vmem:[%s15765_s28 + $0xd88] sm:$0xff]  }
 0x1a9   : > { %13710 = vmatpush3.bf16.msra.mxu1 %v15039_v60  ;;  %v15078_v60 = vld [vmem:[%s15765_s28 + $0xd08] sm:$0xff]  }
 0x1aa   : > { %13711 = vmatprep.subr.bf16.mxu1 %v15041_v63  ;;  %v15080_v63 = vld [vmem:[%s15765_s28 + $0xd40] sm:$0xff]  }
 0x1ab   : > { %13690 = vmatpush3.bf16.msra.mxu0 %v15042_v0  ;;  %v15081_v0 = vld [vmem:[%s15765_s28 + $0xdc0] sm:$0xff]  }
 0x1ac   : > { %13691 = vmatprep.subr.bf16.mxu0 %v15044_v2  ;;  %v15083_v2 = vld [vmem:[%s15765_s28 + $0xd80] sm:$0xff]  }
 0x1ad   : > { %13712 = vmatpush3.bf16.msra.mxu1 %v15043_v1  ;;  %v15082_v1 = vld [vmem:[%s15765_s28 + $0xd00] sm:$0xff]  }
 0x1ae   : > { %13713 = vmatprep.subr.bf16.mxu1 %v15045_v3  ;;  %v2643_v3 = vrot.slane %v16276_v12, %v15803_v42  ;;  %v15091_v12 = vld [vmem:[%s15765_s28 + $0xe30] sm:$0xff]  }
 0x1af   : > { %13692 = vmatpush3.bf16.msra.mxu0 %v15046_v4  ;;  %v15085_v4 = vld [vmem:[%s15765_s28 + $0xe78] sm:$0xff]  }
 0x1b0   : > { %13693 = vmatprep.subr.bf16.mxu0 %v15048_v9  ;;  %v2659_v8 = vcombine.high %v2643_v3, %v2643_v3  ;;  %v15089_v9 = vld [vmem:[%s15765_s28 + $0xe70] sm:$0xff]  }
 0x1b1   : > { %13714 = vmatpush3.bf16.msra.mxu1 %v15047_v6  ;;  %v15087_v6 = vld [vmem:[%s15765_s28 + $0xe38] sm:$0xff]  }
 0x1b2   : > { %13715 = vmatprep.subr.bf16.mxu1 %v15049_v10  ;;  %v15090_v10 = vld [vmem:[%s15765_s28 + $0xef0] sm:$0xff]  }
 0x1b3   : > { %13694 = vmatpush3.bf16.msra.mxu0 %v15050_v13  ;;  %v15092_v13 = vld [vmem:[%s15765_s28 + $0xeb0] sm:$0xff]  }
 0x1b4   : > { %13723 = vmatprep.subr.bf16.mxu0 %v15052_v18  ;;  %v15094_v18 = vld [vmem:[%s15765_s28 + $0xee8] sm:$0xff]  }
 0x1b5   : > { %13716 = vmatpush3.bf16.msra.mxu1 %v15051_v14 }
 0x1b6   : > { %v13431_v28 = vpop.f32.mrf.mxu0  ;;  %10368 = vmatmul.mubr.bf16.vlgmr.msra.gmra.mxu0 %v2636_v17  ;;  %13745 = vmatprep.subr.bf16.mxu1 %v15053_v20 }
 0x1b7   : > { %13724 = vmatpush3.bf16.msra.mxu0 %v15054_v22  ;;  %10447 = vmatprep.mubr.bf16.mxu0 %v2657_v21  ;;  %v15095_v21 = vld [vmem:[%s15765_s28 + $0xe28] sm:$0xff]  }
 0x1b8   : > { %v13453_v31 = vpop.f32.mrf.mxu1  ;;  %10408 = vmatmul.mubr.bf16.vlgmr.msra.gmra.mxu1 %v2658_v24  ;;  %v13432_v32 = vpop.f32.mrf.mxu0  ;;  %13725 = vmatprep.subr.bf16.mxu0 %v15056_v25  ;;  %v15096_v24 = vld [vmem:[%s15765_s28 + $0xea8] sm:$0xff]  }
 0x1b9   : > { %13746 = vmatpush3.bf16.msra.mxu1 %v15055_v23  ;;  %v13433_v34 = vadd.f32 %v13432_v32, %v13431_v28  ;;  %10487 = vmatprep.mubr.bf16.mxu1 %v2661_v27  ;;  %v15097_v27 = vld [vmem:[%s15765_s28 + $0xe60] sm:$0xff]  }
 0x1ba   : > { %v13454_v35 = vpop.f32.mrf.mxu1  ;;  %v13434_v37 = vpop.f32.mrf.mxu0  ;;  %13747 = vmatprep.subr.bf16.mxu1 %v15057_v26  ;;  %v15100_v32 = vld [vmem:[%s15765_s28 + $0xea0] sm:$0xff]  }
 0x1bb   : > { %v9890_v39 = vadd.f32 %v13433_v34, %v16254_v53  ;;  %v13455_v40 = vadd.f32 %v13454_v35, %v13453_v31  ;;  %13726 = vmatpush3.bf16.msra.mxu0 %v15058_v29  ;;  %v15070_v53 = vld [vmem:[%s15765_s28 + $0xd18] sm:$0xff]   ;;  %v15098_v29 = vld [vmem:[%s15765_s28 + $0xee0] sm:$0xff]   ;;  %v15105_v37 = vld [vmem:[%s15765_s28 + $0xe50] sm:$0xff]  }
 0x1bc   : > { %v13456_v43 = vpop.f32.mrf.mxu1  ;;  %v13435_v44 = vpop.f32.mrf.mxu0  ;;  %13727 = vmatprep.subr.bf16.mxu0 %v15060_v33  ;;  %v15099_v31 = vld [vmem:[%s15765_s28 + $0xe20] sm:$0xff]   ;;  %v15101_v33 = vld [vmem:[%s15765_s28 + $0xe58] sm:$0xff]  }
 0x1bd   : > { %v16299_v46 = vadd.f32 %v13455_v40, %v9890_v39  ;;  %13748 = vmatpush3.bf16.msra.mxu1 %v15059_v30  ;;  %v15102_v34 = vld [vmem:[%s15765_s28 + $0xed8] sm:$0xff]   ;;  %v15107_v39 = vld [vmem:[%s15765_s28 + $0xe10] sm:$0xff]   ;;  %v15110_v43 = vld [vmem:[%s15765_s28 + $0xec8] sm:$0xff]  }
 0x1be   : > { %v13457_v48 = vpop.f32.mrf.mxu1  ;;  %13749 = vmatprep.subr.bf16.mxu1 %v15061_v36  ;;  %v15103_v36 = vld [vmem:[%s15765_s28 + $0xe18] sm:$0xff]   ;;  %v15108_v40 = vld [vmem:[%s15765_s28 + $0xe90] sm:$0xff]   ;;  %v15111_v44 = vld [vmem:[%s15765_s28 + $0xe08] sm:$0xff]  }
 0x1bf   : > { %13728 = vmatpush3.bf16.msra.mxu0 %v15062_v38  ;;  %v15104_v35 = vld [vmem:[%s15765_s28 + $0xe98] sm:$0xff]   ;;  %v15106_v38 = vld [vmem:[%s15765_s28 + $0xed0] sm:$0xff]  }
 0x1c0   : > { %13729 = vmatprep.subr.bf16.mxu0 %v15064_v45  ;;  %v246_v45 = vld [vmem:[%s15760_s24 + $0x38] sm:$0xff] }
 0x1c1   : > { %13750 = vmatpush3.bf16.msra.mxu1 %v15063_v41  ;;  %v15109_v41 = vld [vmem:[%s15765_s28 + $0xe48] sm:$0xff]   ;;  %v2662_v48 = vcombine.high %v246_v45, %v246_v45 }
 0x1c2   : > { %13751 = vmatprep.subr.bf16.mxu1 %v15065_v47  ;;  %v2669_v47 = vrot.slane %v246_v45, %v15803_v42  ;;  %v15151_v45 = vld [vmem:[%s15765_s28 + $0x10f8] sm:$0xff]  }
 0x1c3   : > { %13730 = vmatpush3.bf16.msra.mxu0 %v15066_v49  ;;  %v15113_v49 = vld [vmem:[%s15765_s28 + $0xe40] sm:$0xff]  }
 0x1c4   : > { %13731 = vmatprep.subr.bf16.mxu0 %v15068_v51  ;;  %v2677_v51 = vcombine.high %v2669_v47, %v2669_v47 }
 0x1c5   : > { %13752 = vmatpush3.bf16.msra.mxu1 %v15067_v50  ;;  %v15114_v50 = vld [vmem:[%s15765_s28 + $0xec0] sm:$0xff]  }
 0x1c6   : > { %13753 = vmatprep.subr.bf16.mxu1 %v15069_v52  ;;  %v16358_v52 = vrot.slane %v2662_v48, %v15803_v42 }
 0x1c7   : > { %13732 = vmatpush3.bf16.msra.mxu0 %v15070_v53  ;;  %v15115_v53 = vld [vmem:[%s15765_s28 + $0xe00] sm:$0xff]  }
 0x1c8   : > { %13733 = vmatprep.subr.bf16.mxu0 %v15072_v55  ;;  %v2699_v55 = vrot.slane %v2677_v51, %v15803_v42 }
 0x1c9   : > { %13754 = vmatpush3.bf16.msra.mxu1 %v15071_v54  ;;  %v15116_v54 = vld [vmem:[%s15765_s28 + $0xe80] sm:$0xff]  }
 0x1ca   : > { %13755 = vmatprep.subr.bf16.mxu1 %v15073_v56  ;;  %v2678_v56 = vcombine.high %v16358_v52, %v16358_v52 }
 0x1cb   : > { %13734 = vmatpush3.bf16.msra.mxu0 %v15074_v57  ;;  %v2685_v57 = vrot.slane %v2669_v47, %v15803_v42  ;;  %v15153_v47 = vld [vmem:[%s15765_s28 + $0x10b8] sm:$0xff]  }
 0x1cc   : > { %13735 = vmatprep.subr.bf16.mxu0 %v15076_v59  ;;  %v2709_v59 = vcombine.high %v2699_v55, %v2699_v55 }
 0x1cd   : > { %13756 = vmatpush3.bf16.msra.mxu1 %v15075_v58  ;;  %v15117_v58 = vld [vmem:[%s15765_s28 + $0xf78] sm:$0xff]  }
 0x1ce   : > { %13757 = vmatprep.subr.bf16.mxu1 %v15077_v61  ;;  %v15118_v61 = vld [vmem:[%s15765_s28 + $0xff8] sm:$0xff]  }
 0x1cf   : > { %13736 = vmatpush3.bf16.msra.mxu0 %v15078_v60  ;;  %v2706_v60 = vrot.slane %v2678_v56, %v15803_v42  ;;  %v15158_v56 = vld [vmem:[%s15765_s28 + $0x1068] sm:$0xff]  }
 0x1d0   : > { %13737 = vmatprep.subr.bf16.mxu0 %v15080_v63  ;;  %v15120_v63 = vld [vmem:[%s15765_s28 + $0xfb8] sm:$0xff]  }
 0x1d1   : > { %13758 = vmatpush3.bf16.msra.mxu1 %v15079_v62  ;;  %v15119_v62 = vld [vmem:[%s15765_s28 + $0xf38] sm:$0xff]  }
 0x1d2   : > { %13759 = vmatprep.subr.bf16.mxu1 %v15081_v0  ;;  %v2707_v0 = vcombine.high %v2685_v57, %v2685_v57 }
 0x1d3   : > { %13738 = vmatpush3.bf16.msra.mxu0 %v15082_v1  ;;  %v15121_v1 = vld [vmem:[%s15765_s28 + $0xf70] sm:$0xff]  }
 0x1d4   : > { %13767 = vmatprep.subr.bf16.mxu0 %v15085_v4 }
 0x1d5   : > { %13760 = vmatpush3.bf16.msra.mxu1 %v15083_v2  ;;  %v15122_v2 = vld [vmem:[%s15765_s28 + $0xff0] sm:$0xff]  }
 0x1d6   : > { %v13475_v11 = vpop.f32.mrf.mxu0  ;;  %10448 = vmatmul.mubr.bf16.vlgmr.msra.gmra.mxu0 %v2643_v3  ;;  %13789 = vmatprep.subr.bf16.mxu1 %v15086_v5  ;;  %v2710_v3 = vcombine.high %v2706_v60, %v2706_v60  ;;  %v15123_v5 = vld [vmem:[%s15765_s28 + $0xf30] sm:$0xff]  }
 0x1d7   : > { %13768 = vmatpush3.bf16.msra.mxu0 %v15087_v6  ;;  %10527 = vmatprep.mubr.bf16.mxu0 %v2699_v55  ;;  %v15124_v6 = vld [vmem:[%s15765_s28 + $0xfb0] sm:$0xff]  }
 0x1d8   : > { %v13497_v14 = vpop.f32.mrf.mxu1  ;;  %10488 = vmatmul.mubr.bf16.vlgmr.msra.gmra.mxu1 %v2659_v8  ;;  %v13476_v15 = vpop.f32.mrf.mxu0  ;;  %13769 = vmatprep.subr.bf16.mxu0 %v15089_v9  ;;  %v15125_v9 = vld [vmem:[%s15765_s28 + $0xf68] sm:$0xff]  }
 0x1d9   : > { %13790 = vmatpush3.bf16.msra.mxu1 %v15088_v7  ;;  %v13477_v17 = vadd.f32 %v13476_v15, %v13475_v11  ;;  %10567 = vmatprep.mubr.bf16.mxu1 %v2709_v59  ;;  %v15126_v11 = vld [vmem:[%s15765_s28 + $0xfe8] sm:$0xff]  }
 0x1da   : > { %v13498_v19 = vpop.f32.mrf.mxu1  ;;  %v13478_v20 = vpop.f32.mrf.mxu0  ;;  %13791 = vmatprep.subr.bf16.mxu1 %v15090_v10 }
 0x1db   : > { %v9970_v22 = vadd.f32 %v13477_v17, %v16299_v46  ;;  %v13499_v23 = vadd.f32 %v13498_v19, %v13497_v14  ;;  %13770 = vmatpush3.bf16.msra.mxu0 %v15091_v12  ;;  %v15112_v46 = vld [vmem:[%s15765_s28 + $0xe88] sm:$0xff]   ;;  %v15129_v20 = vld [vmem:[%s15765_s28 + $0xf60] sm:$0xff]  }
 0x1dc   : > { %v13500_v25 = vpop.f32.mrf.mxu1  ;;  %v13479_v26 = vpop.f32.mrf.mxu0  ;;  %13771 = vmatprep.subr.bf16.mxu0 %v15093_v16  ;;  %v15127_v14 = vld [vmem:[%s15765_s28 + $0xf28] sm:$0xff]  }
 0x1dd   : > { %v16336_v28 = vadd.f32 %v13499_v23, %v9970_v22  ;;  %13792 = vmatpush3.bf16.msra.mxu1 %v15092_v13  ;;  %v15128_v17 = vld [vmem:[%s15765_s28 + $0xfa8] sm:$0xff]   ;;  %v15130_v22 = vld [vmem:[%s15765_s28 + $0xfe0] sm:$0xff]   ;;  %v15133_v26 = vld [vmem:[%s15765_s28 + $0xf58] sm:$0xff]  }
 0x1de   : > { %v13501_v30 = vpop.f32.mrf.mxu1  ;;  %13793 = vmatprep.subr.bf16.mxu1 %v15094_v18  ;;  %v15132_v25 = vld [vmem:[%s15765_s28 + $0xfa0] sm:$0xff]  }
 0x1df   : > { %13772 = vmatpush3.bf16.msra.mxu0 %v15095_v21  ;;  %v15137_v30 = vld [vmem:[%s15765_s28 + $0xf50] sm:$0xff]  }
 0x1e0   : > { %13773 = vmatprep.subr.bf16.mxu0 %v15097_v27  ;;  %v15134_v27 = vld [vmem:[%s15765_s28 + $0xfd8] sm:$0xff]  }
 0x1e1   : > { %13794 = vmatpush3.bf16.msra.mxu1 %v15096_v24  ;;  %v15131_v24 = vld [vmem:[%s15765_s28 + $0xf20] sm:$0xff]  }
 0x1e2   : > { %13795 = vmatprep.subr.bf16.mxu1 %v15098_v29  ;;  %v15136_v29 = vld [vmem:[%s15765_s28 + $0xf98] sm:$0xff]  }
 0x1e3   : > { %13774 = vmatpush3.bf16.msra.mxu0 %v15099_v31  ;;  %v15138_v31 = vld [vmem:[%s15765_s28 + $0xfd0] sm:$0xff]  }
 0x1e4   : > { %13775 = vmatprep.subr.bf16.mxu0 %v15101_v33  ;;  %v15140_v33 = vld [vmem:[%s15765_s28 + $0xf90] sm:$0xff]  }
 0x1e5   : > { %13796 = vmatpush3.bf16.msra.mxu1 %v15100_v32  ;;  %v15139_v32 = vld [vmem:[%s15765_s28 + $0xf10] sm:$0xff]  }
 0x1e6   : > { %13797 = vmatprep.subr.bf16.mxu1 %v15102_v34  ;;  %v15141_v34 = vld [vmem:[%s15765_s28 + $0xf48] sm:$0xff]  }
 0x1e7   : > { %13776 = vmatpush3.bf16.msra.mxu0 %v15103_v36  ;;  %v15142_v36 = vld [vmem:[%s15765_s28 + $0xfc8] sm:$0xff]  }
 0x1e8   : > { %13777 = vmatprep.subr.bf16.mxu0 %v15105_v37  ;;  %v15144_v37 = vld [vmem:[%s15765_s28 + $0xf88] sm:$0xff]  }
 0x1e9   : > { %13798 = vmatpush3.bf16.msra.mxu1 %v15104_v35  ;;  %v15143_v35 = vld [vmem:[%s15765_s28 + $0xf08] sm:$0xff]  }
 0x1ea   : > { %13799 = vmatprep.subr.bf16.mxu1 %v15106_v38  ;;  %v15145_v38 = vld [vmem:[%s15765_s28 + $0xf40] sm:$0xff]  }
 0x1eb   : > { %13778 = vmatpush3.bf16.msra.mxu0 %v15107_v39  ;;  %v15146_v39 = vld [vmem:[%s15765_s28 + $0xfc0] sm:$0xff]  }
 0x1ec   : > { %13779 = vmatprep.subr.bf16.mxu0 %v15109_v41  ;;  %v15148_v41 = vld [vmem:[%s15765_s28 + $0xf80] sm:$0xff]  }
 0x1ed   : > { %13800 = vmatpush3.bf16.msra.mxu1 %v15108_v40  ;;  %v15147_v40 = vld [vmem:[%s15765_s28 + $0xf00] sm:$0xff]  }
 0x1ee   : > { %13801 = vmatprep.subr.bf16.mxu1 %v15110_v43  ;;  %v2692_v43 = vrot.slane %v16358_v52, %v15803_v42  ;;  %v15156_v52 = vld [vmem:[%s15765_s28 + $0x1030] sm:$0xff]  }
 0x1ef   : > { %13780 = vmatpush3.bf16.msra.mxu0 %v15111_v44  ;;  %v15150_v44 = vld [vmem:[%s15765_s28 + $0x1078] sm:$0xff]  }
 0x1f0   : > { %13781 = vmatprep.subr.bf16.mxu0 %v15113_v49  ;;  %v2708_v48 = vcombine.high %v2692_v43, %v2692_v43  ;;  %v15154_v49 = vld [vmem:[%s15765_s28 + $0x1070] sm:$0xff]  }
 0x1f1   : > { %13802 = vmatpush3.bf16.msra.mxu1 %v15112_v46  ;;  %v15152_v46 = vld [vmem:[%s15765_s28 + $0x1038] sm:$0xff]  }
 0x1f2   : > { %13803 = vmatprep.subr.bf16.mxu1 %v15114_v50  ;;  %v15155_v50 = vld [vmem:[%s15765_s28 + $0x10f0] sm:$0xff]  }
 0x1f3   : > { %13782 = vmatpush3.bf16.msra.mxu0 %v15115_v53  ;;  %v15157_v53 = vld [vmem:[%s15765_s28 + $0x10b0] sm:$0xff]  }
 0x1f4   : > { %13811 = vmatprep.subr.bf16.mxu0 %v15117_v58  ;;  %v15159_v58 = vld [vmem:[%s15765_s28 + $0x10e8] sm:$0xff]  }
 0x1f5   : > { %13804 = vmatpush3.bf16.msra.mxu1 %v15116_v54 }
 0x1f6   : > { %v13519_v4 = vpop.f32.mrf.mxu0  ;;  %10528 = vmatmul.mubr.bf16.vlgmr.msra.gmra.mxu0 %v2685_v57  ;;  %13833 = vmatprep.subr.bf16.mxu1 %v15118_v61 }
 0x1f7   : > { %13812 = vmatpush3.bf16.msra.mxu0 %v15119_v62  ;;  %10607 = vmatprep.mubr.bf16.mxu0 %v2706_v60  ;;  %v15160_v60 = vld [vmem:[%s15765_s28 + $0x1028] sm:$0xff]  }
 0x1f8   : > { %v13541_v7 = vpop.f32.mrf.mxu1  ;;  %10568 = vmatmul.mubr.bf16.vlgmr.msra.gmra.mxu1 %v2707_v0  ;;  %v13520_v8 = vpop.f32.mrf.mxu0  ;;  %13813 = vmatprep.subr.bf16.mxu0 %v15121_v1  ;;  %v15161_v0 = vld [vmem:[%s15765_s28 + $0x10a8] sm:$0xff]  }
 0x1f9   : > { %13834 = vmatpush3.bf16.msra.mxu1 %v15120_v63  ;;  %v13521_v10 = vadd.f32 %v13520_v8, %v13519_v4  ;;  %10647 = vmatprep.mubr.bf16.mxu1 %v2710_v3  ;;  %v15162_v3 = vld [vmem:[%s15765_s28 + $0x1060] sm:$0xff]  }
 0x1fa   : > { %v13542_v12 = vpop.f32.mrf.mxu1  ;;  %v13522_v13 = vpop.f32.mrf.mxu0  ;;  %13835 = vmatprep.subr.bf16.mxu1 %v15122_v2  ;;  %v15165_v8 = vld [vmem:[%s15765_s28 + $0x10a0] sm:$0xff]  }
 0x1fb   : > { %v10050_v15 = vadd.f32 %v13521_v10, %v16336_v28  ;;  %v13543_v16 = vadd.f32 %v13542_v12, %v13541_v7  ;;  %13814 = vmatpush3.bf16.msra.mxu0 %v15123_v5  ;;  %v15135_v28 = vld [vmem:[%s15765_s28 + $0xf18] sm:$0xff]   ;;  %v15163_v5 = vld [vmem:[%s15765_s28 + $0x10e0] sm:$0xff]   ;;  %v15170_v13 = vld [vmem:[%s15765_s28 + $0x1050] sm:$0xff]  }
 0x1fc   : > { %v13544_v18 = vpop.f32.mrf.mxu1  ;;  %v13523_v19 = vpop.f32.mrf.mxu0  ;;  %13815 = vmatprep.subr.bf16.mxu0 %v15125_v9  ;;  %v15164_v7 = vld [vmem:[%s15765_s28 + $0x1020] sm:$0xff]   ;;  %v15166_v9 = vld [vmem:[%s15765_s28 + $0x1058] sm:$0xff]  }
 0x1fd   : > { %v16381_v21 = vadd.f32 %v13543_v16, %v10050_v15  ;;  %13836 = vmatpush3.bf16.msra.mxu1 %v15124_v6  ;;  %v15167_v10 = vld [vmem:[%s15765_s28 + $0x10d8] sm:$0xff]   ;;  %v15172_v15 = vld [vmem:[%s15765_s28 + $0x1010] sm:$0xff]   ;;  %v15175_v18 = vld [vmem:[%s15765_s28 + $0x10c8] sm:$0xff]  }
 0x1fe   : > { %v13545_v23 = vpop.f32.mrf.mxu1  ;;  %13837 = vmatprep.subr.bf16.mxu1 %v15126_v11  ;;  %v15168_v11 = vld [vmem:[%s15765_s28 + $0x1018] sm:$0xff]   ;;  %v15173_v16 = vld [vmem:[%s15765_s28 + $0x1090] sm:$0xff]   ;;  %v15176_v19 = vld [vmem:[%s15765_s28 + $0x1008] sm:$0xff]  }
 0x1ff   : > { %13816 = vmatpush3.bf16.msra.mxu0 %v15127_v14  ;;  %v15169_v12 = vld [vmem:[%s15765_s28 + $0x1098] sm:$0xff]   ;;  %v15171_v14 = vld [vmem:[%s15765_s28 + $0x10d0] sm:$0xff]  }
 0x200   : > { %13817 = vmatprep.subr.bf16.mxu0 %v15129_v20  ;;  %v247_v20 = vld [vmem:[%s15760_s24 + $0x40] sm:$0xff] }
 0x201   : > { %13838 = vmatpush3.bf16.msra.mxu1 %v15128_v17  ;;  %v15174_v17 = vld [vmem:[%s15765_s28 + $0x1048] sm:$0xff]   ;;  %v2711_v23 = vcombine.high %v247_v20, %v247_v20 }
 0x202   : > { %13839 = vmatprep.subr.bf16.mxu1 %v15130_v22  ;;  %v2718_v22 = vrot.slane %v247_v20, %v15803_v42  ;;  %v15216_v20 = vld [vmem:[%s15765_s28 + $0x12f8] sm:$0xff]  }
 0x203   : > { %13818 = vmatpush3.bf16.msra.mxu0 %v15131_v24  ;;  %v15178_v24 = vld [vmem:[%s15765_s28 + $0x1040] sm:$0xff]  }
 0x204   : > { %13819 = vmatprep.subr.bf16.mxu0 %v15133_v26  ;;  %v2726_v26 = vcombine.high %v2718_v22, %v2718_v22 }
 0x205   : > { %13840 = vmatpush3.bf16.msra.mxu1 %v15132_v25  ;;  %v15179_v25 = vld [vmem:[%s15765_s28 + $0x10c0] sm:$0xff]  }
 0x206   : > { %13841 = vmatprep.subr.bf16.mxu1 %v15134_v27  ;;  %v16440_v27 = vrot.slane %v2711_v23, %v15803_v42 }
 0x207   : > { %13820 = vmatpush3.bf16.msra.mxu0 %v15135_v28  ;;  %v15180_v28 = vld [vmem:[%s15765_s28 + $0x1000] sm:$0xff]  }
 0x208   : > { %13821 = vmatprep.subr.bf16.mxu0 %v15137_v30  ;;  %v2748_v30 = vrot.slane %v2726_v26, %v15803_v42 }
 0x209   : > { %13842 = vmatpush3.bf16.msra.mxu1 %v15136_v29  ;;  %v15181_v29 = vld [vmem:[%s15765_s28 + $0x1080] sm:$0xff]  }
 0x20a   : > { %13843 = vmatprep.subr.bf16.mxu1 %v15138_v31  ;;  %v2727_v31 = vcombine.high %v16440_v27, %v16440_v27 }
 0x20b   : > { %13822 = vmatpush3.bf16.msra.mxu0 %v15139_v32  ;;  %v2734_v32 = vrot.slane %v2718_v22, %v15803_v42  ;;  %v15218_v22 = vld [vmem:[%s15765_s28 + $0x12b8] sm:$0xff]  }
 0x20c   : > { %13823 = vmatprep.subr.bf16.mxu0 %v15141_v34  ;;  %v2758_v34 = vcombine.high %v2748_v30, %v2748_v30 }
 0x20d   : > { %13844 = vmatpush3.bf16.msra.mxu1 %v15140_v33  ;;  %v15182_v33 = vld [vmem:[%s15765_s28 + $0x1178] sm:$0xff]  }
 0x20e   : > { %13845 = vmatprep.subr.bf16.mxu1 %v15142_v36  ;;  %v15183_v36 = vld [vmem:[%s15765_s28 + $0x11f8] sm:$0xff]  }
 0x20f   : > { %13824 = vmatpush3.bf16.msra.mxu0 %v15143_v35  ;;  %v2755_v35 = vrot.slane %v2727_v31, %v15803_v42  ;;  %v15223_v31 = vld [vmem:[%s15765_s28 + $0x1268] sm:$0xff]  }
 0x210   : > { %13825 = vmatprep.subr.bf16.mxu0 %v15145_v38  ;;  %v15185_v38 = vld [vmem:[%s15765_s28 + $0x11b8] sm:$0xff]  }
 0x211   : > { %13846 = vmatpush3.bf16.msra.mxu1 %v15144_v37  ;;  %v15184_v37 = vld [vmem:[%s15765_s28 + $0x1138] sm:$0xff]  }
 0x212   : > { %13847 = vmatprep.subr.bf16.mxu1 %v15146_v39  ;;  %v2756_v39 = vcombine.high %v2734_v32, %v2734_v32 }
 0x213   : > { %13826 = vmatpush3.bf16.msra.mxu0 %v15147_v40  ;;  %v15186_v40 = vld [vmem:[%s15765_s28 + $0x1170] sm:$0xff]  }
 0x214   : > { %13855 = vmatprep.subr.bf16.mxu0 %v15150_v44 }
 0x215   : > { %13848 = vmatpush3.bf16.msra.mxu1 %v15148_v41  ;;  %v15187_v41 = vld [vmem:[%s15765_s28 + $0x11f0] sm:$0xff]  }
 0x216   : > { %v13563_v51 = vpop.f32.mrf.mxu0  ;;  %10608 = vmatmul.mubr.bf16.vlgmr.msra.gmra.mxu0 %v2692_v43  ;;  %13877 = vmatprep.subr.bf16.mxu1 %v15151_v45  ;;  %v2759_v43 = vcombine.high %v2755_v35, %v2755_v35  ;;  %v15188_v45 = vld [vmem:[%s15765_s28 + $0x1130] sm:$0xff]  }
 0x217   : > { %13856 = vmatpush3.bf16.msra.mxu0 %v15152_v46  ;;  %10687 = vmatprep.mubr.bf16.mxu0 %v2748_v30  ;;  %v15189_v46 = vld [vmem:[%s15765_s28 + $0x11b0] sm:$0xff]  }
 0x218   : > { %v13585_v54 = vpop.f32.mrf.mxu1  ;;  %10648 = vmatmul.mubr.bf16.vlgmr.msra.gmra.mxu1 %v2708_v48  ;;  %v13564_v55 = vpop.f32.mrf.mxu0  ;;  %13857 = vmatprep.subr.bf16.mxu0 %v15154_v49  ;;  %v15190_v49 = vld [vmem:[%s15765_s28 + $0x1168] sm:$0xff]  }
 0x219   : > { %13878 = vmatpush3.bf16.msra.mxu1 %v15153_v47  ;;  %v13565_v57 = vadd.f32 %v13564_v55, %v13563_v51  ;;  %10727 = vmatprep.mubr.bf16.mxu1 %v2758_v34  ;;  %v15191_v51 = vld [vmem:[%s15765_s28 + $0x11e8] sm:$0xff]  }
 0x21a   : > { %v13586_v59 = vpop.f32.mrf.mxu1  ;;  %v13566_v61 = vpop.f32.mrf.mxu0  ;;  %13879 = vmatprep.subr.bf16.mxu1 %v15155_v50 }
 0x21b   : > { %v10130_v62 = vadd.f32 %v13565_v57, %v16381_v21  ;;  %v13587_v63 = vadd.f32 %v13586_v59, %v13585_v54  ;;  %13858 = vmatpush3.bf16.msra.mxu0 %v15156_v52  ;;  %v15177_v21 = vld [vmem:[%s15765_s28 + $0x1088] sm:$0xff]   ;;  %v15194_v61 = vld [vmem:[%s15765_s28 + $0x1160] sm:$0xff]  }
 0x21c   : > { %v13588_v1 = vpop.f32.mrf.mxu1  ;;  %v13567_v2 = vpop.f32.mrf.mxu0  ;;  %13859 = vmatprep.subr.bf16.mxu0 %v15158_v56  ;;  %v15192_v54 = vld [vmem:[%s15765_s28 + $0x1128] sm:$0xff]  }
 0x21d   : > { %v16418_v4 = vadd.f32 %v13587_v63, %v10130_v62  ;;  %13880 = vmatpush3.bf16.msra.mxu1 %v15157_v53  ;;  %v15193_v57 = vld [vmem:[%s15765_s28 + $0x11a8] sm:$0xff]   ;;  %v15195_v62 = vld [vmem:[%s15765_s28 + $0x11e0] sm:$0xff]   ;;  %v15198_v2 = vld [vmem:[%s15765_s28 + $0x1158] sm:$0xff]  }
 0x21e   : > { %v13589_v6 = vpop.f32.mrf.mxu1  ;;  %13881 = vmatprep.subr.bf16.mxu1 %v15159_v58  ;;  %v15197_v1 = vld [vmem:[%s15765_s28 + $0x11a0] sm:$0xff]  }
 0x21f   : > { %13860 = vmatpush3.bf16.msra.mxu0 %v15160_v60  ;;  %v15202_v6 = vld [vmem:[%s15765_s28 + $0x1150] sm:$0xff]  }
 0x220   : > { %13861 = vmatprep.subr.bf16.mxu0 %v15162_v3  ;;  %v15199_v3 = vld [vmem:[%s15765_s28 + $0x11d8] sm:$0xff]  }
 0x221   : > { %13882 = vmatpush3.bf16.msra.mxu1 %v15161_v0  ;;  %v15196_v0 = vld [vmem:[%s15765_s28 + $0x1120] sm:$0xff]  }
 0x222   : > { %13883 = vmatprep.subr.bf16.mxu1 %v15163_v5  ;;  %v15201_v5 = vld [vmem:[%s15765_s28 + $0x1198] sm:$0xff]  }
 0x223   : > { %13862 = vmatpush3.bf16.msra.mxu0 %v15164_v7  ;;  %v15203_v7 = vld [vmem:[%s15765_s28 + $0x11d0] sm:$0xff]  }
 0x224   : > { %13863 = vmatprep.subr.bf16.mxu0 %v15166_v9  ;;  %v15205_v9 = vld [vmem:[%s15765_s28 + $0x1190] sm:$0xff]  }
 0x225   : > { %13884 = vmatpush3.bf16.msra.mxu1 %v15165_v8  ;;  %v15204_v8 = vld [vmem:[%s15765_s28 + $0x1110] sm:$0xff]  }
 0x226   : > { %13885 = vmatprep.subr.bf16.mxu1 %v15167_v10  ;;  %v15206_v10 = vld [vmem:[%s15765_s28 + $0x1148] sm:$0xff]  }
 0x227   : > { %13864 = vmatpush3.bf16.msra.mxu0 %v15168_v11  ;;  %v15207_v11 = vld [vmem:[%s15765_s28 + $0x11c8] sm:$0xff]  }
 0x228   : > { %13865 = vmatprep.subr.bf16.mxu0 %v15170_v13  ;;  %v15209_v13 = vld [vmem:[%s15765_s28 + $0x1188] sm:$0xff]  }
 0x229   : > { %13886 = vmatpush3.bf16.msra.mxu1 %v15169_v12  ;;  %v15208_v12 = vld [vmem:[%s15765_s28 + $0x1108] sm:$0xff]  }
 0x22a   : > { %13887 = vmatprep.subr.bf16.mxu1 %v15171_v14  ;;  %v15210_v14 = vld [vmem:[%s15765_s28 + $0x1140] sm:$0xff]  }
 0x22b   : > { %13866 = vmatpush3.bf16.msra.mxu0 %v15172_v15  ;;  %v15211_v15 = vld [vmem:[%s15765_s28 + $0x11c0] sm:$0xff]  }
 0x22c   : > { %13867 = vmatprep.subr.bf16.mxu0 %v15174_v17  ;;  %v15213_v17 = vld [vmem:[%s15765_s28 + $0x1180] sm:$0xff]  }
 0x22d   : > { %13888 = vmatpush3.bf16.msra.mxu1 %v15173_v16  ;;  %v15212_v16 = vld [vmem:[%s15765_s28 + $0x1100] sm:$0xff]  }
 0x22e   : > { %13889 = vmatprep.subr.bf16.mxu1 %v15175_v18  ;;  %v2741_v18 = vrot.slane %v16440_v27, %v15803_v42  ;;  %v15221_v27 = vld [vmem:[%s15765_s28 + $0x1230] sm:$0xff]  }
 0x22f   : > { %13868 = vmatpush3.bf16.msra.mxu0 %v15176_v19  ;;  %v15215_v19 = vld [vmem:[%s15765_s28 + $0x1278] sm:$0xff]  }
 0x230   : > { %13869 = vmatprep.subr.bf16.mxu0 %v15178_v24  ;;  %v2757_v23 = vcombine.high %v2741_v18, %v2741_v18  ;;  %v15219_v24 = vld [vmem:[%s15765_s28 + $0x1270] sm:$0xff]  }
 0x231   : > { %13890 = vmatpush3.bf16.msra.mxu1 %v15177_v21  ;;  %v15217_v21 = vld [vmem:[%s15765_s28 + $0x1238] sm:$0xff]  }
 0x232   : > { %13891 = vmatprep.subr.bf16.mxu1 %v15179_v25  ;;  %v15220_v25 = vld [vmem:[%s15765_s28 + $0x12f0] sm:$0xff]  }
 0x233   : > { %13870 = vmatpush3.bf16.msra.mxu0 %v15180_v28  ;;  %v15222_v28 = vld [vmem:[%s15765_s28 + $0x12b0] sm:$0xff]  }
 0x234   : > { %13899 = vmatprep.subr.bf16.mxu0 %v15182_v33  ;;  %v15224_v33 = vld [vmem:[%s15765_s28 + $0x12e8] sm:$0xff]  }
 0x235   : > { %13892 = vmatpush3.bf16.msra.mxu1 %v15181_v29 }
 0x236   : > { %v13607_v44 = vpop.f32.mrf.mxu0  ;;  %10688 = vmatmul.mubr.bf16.vlgmr.msra.gmra.mxu0 %v2734_v32  ;;  %13921 = vmatprep.subr.bf16.mxu1 %v15183_v36 }
 0x237   : > { %13900 = vmatpush3.bf16.msra.mxu0 %v15184_v37  ;;  %10767 = vmatprep.mubr.bf16.mxu0 %v2755_v35  ;;  %v15225_v35 = vld [vmem:[%s15765_s28 + $0x1228] sm:$0xff]  }
 0x238   : > { %v13629_v47 = vpop.f32.mrf.mxu1  ;;  %10728 = vmatmul.mubr.bf16.vlgmr.msra.gmra.mxu1 %v2756_v39  ;;  %v13608_v48 = vpop.f32.mrf.mxu0  ;;  %13901 = vmatprep.subr.bf16.mxu0 %v15186_v40  ;;  %v15226_v39 = vld [vmem:[%s15765_s28 + $0x12a8] sm:$0xff]  }
 0x239   : > { %13922 = vmatpush3.bf16.msra.mxu1 %v15185_v38  ;;  %v13609_v50 = vadd.f32 %v13608_v48, %v13607_v44  ;;  %10807 = vmatprep.mubr.bf16.mxu1 %v2759_v43  ;;  %v15227_v43 = vld [vmem:[%s15765_s28 + $0x1260] sm:$0xff]  }
 0x23a   : > { %v13630_v52 = vpop.f32.mrf.mxu1  ;;  %v13610_v53 = vpop.f32.mrf.mxu0  ;;  %13923 = vmatprep.subr.bf16.mxu1 %v15187_v41  ;;  %v15230_v48 = vld [vmem:[%s15765_s28 + $0x12a0] sm:$0xff]  }
 0x23b   : > { %v10210_v55 = vadd.f32 %v13609_v50, %v16418_v4  ;;  %v13631_v56 = vadd.f32 %v13630_v52, %v13629_v47  ;;  %13902 = vmatpush3.bf16.msra.mxu0 %v15188_v45  ;;  %v15200_v4 = vld [vmem:[%s15765_s28 + $0x1118] sm:$0xff]   ;;  %v15228_v45 = vld [vmem:[%s15765_s28 + $0x12e0] sm:$0xff]   ;;  %v15235_v53 = vld [vmem:[%s15765_s28 + $0x1250] sm:$0xff]  }
 0x23c   : > { %v13632_v58 = vpop.f32.mrf.mxu1  ;;  %v13611_v59 = vpop.f32.mrf.mxu0  ;;  %13903 = vmatprep.subr.bf16.mxu0 %v15190_v49  ;;  %v15229_v47 = vld [vmem:[%s15765_s28 + $0x1220] sm:$0xff]   ;;  %v15231_v49 = vld [vmem:[%s15765_s28 + $0x1258] sm:$0xff]  }
 0x23d   : > { %v16463_v60 = vadd.f32 %v13631_v56, %v10210_v55  ;;  %13924 = vmatpush3.bf16.msra.mxu1 %v15189_v46  ;;  %v15232_v50 = vld [vmem:[%s15765_s28 + $0x12d8] sm:$0xff]   ;;  %v15237_v55 = vld [vmem:[%s15765_s28 + $0x1210] sm:$0xff]   ;;  %v15240_v58 = vld [vmem:[%s15765_s28 + $0x12c8] sm:$0xff]  }
 0x23e   : > { %v13633_v63 = vpop.f32.mrf.mxu1  ;;  %13925 = vmatprep.subr.bf16.mxu1 %v15191_v51  ;;  %v15233_v51 = vld [vmem:[%s15765_s28 + $0x1218] sm:$0xff]   ;;  %v15238_v56 = vld [vmem:[%s15765_s28 + $0x1290] sm:$0xff]   ;;  %v15241_v59 = vld [vmem:[%s15765_s28 + $0x1208] sm:$0xff]  }
 0x23f   : > { %13904 = vmatpush3.bf16.msra.mxu0 %v15192_v54  ;;  %v15234_v52 = vld [vmem:[%s15765_s28 + $0x1298] sm:$0xff]   ;;  %v15236_v54 = vld [vmem:[%s15765_s28 + $0x12d0] sm:$0xff]  }
 0x240   : > { %13905 = vmatprep.subr.bf16.mxu0 %v15194_v61  ;;  %v15242_v61 = vld [vmem:[%s15765_s28 + $0x1288] sm:$0xff]  }
 0x241   : > { %13926 = vmatpush3.bf16.msra.mxu1 %v15193_v57  ;;  %v15239_v57 = vld [vmem:[%s15765_s28 + $0x1248] sm:$0xff]  }
 0x242   : > { %13927 = vmatprep.subr.bf16.mxu1 %v15195_v62  ;;  %v15243_v62 = vld [vmem:[%s15765_s28 + $0x1240] sm:$0xff]  }
 0x243   : > { %13906 = vmatpush3.bf16.msra.mxu0 %v15196_v0 }
 0x244   : > { %13907 = vmatprep.subr.bf16.mxu0 %v15198_v2  ;;  %v15245_v2 = vld [vmem:[%s15765_s28 + $0x1200] sm:$0xff]  }
 0x245   : > { %13928 = vmatpush3.bf16.msra.mxu1 %v15197_v1  ;;  %v15244_v1 = vld [vmem:[%s15765_s28 + $0x12c0] sm:$0xff]  }
 0x246   : > { %13929 = vmatprep.subr.bf16.mxu1 %v15199_v3 }
 0x247   : > { %13908 = vmatpush3.bf16.msra.mxu0 %v15200_v4 }
 0x248   : > { %13909 = vmatprep.subr.bf16.mxu0 %v15202_v6 }
 0x249   : > { %13930 = vmatpush3.bf16.msra.mxu1 %v15201_v5  ;;  %v15246_v5 = vld [vmem:[%s15765_s28 + $0x1280] sm:$0xff]  }
 0x24a   : > { %13931 = vmatprep.subr.bf16.mxu1 %v15203_v7 }
 0x24b   : > { %13910 = vmatpush3.bf16.msra.mxu0 %v15204_v8  ;;  %v15247_v8 = vld [vmem:[%s15765_s28 + $0x1378] sm:$0xff]  }
 0x24c   : > { %13911 = vmatprep.subr.bf16.mxu0 %v15206_v10  ;;  %v15248_v10 = vld [vmem:[%s15765_s28 + $0x13f8] sm:$0xff]  }
 0x24d   : > { %13932 = vmatpush3.bf16.msra.mxu1 %v15205_v9 }
 0x24e   : > { %13933 = vmatprep.subr.bf16.mxu1 %v15207_v11 }
 0x24f   : > { %13912 = vmatpush3.bf16.msra.mxu0 %v15208_v12  ;;  %v15249_v12 = vld [vmem:[%s15765_s28 + $0x1338] sm:$0xff]  }
 0x250   : > { %13913 = vmatprep.subr.bf16.mxu0 %v15210_v14  ;;  %v15250_v14 = vld [vmem:[%s15765_s28 + $0x13b8] sm:$0xff]  }
 0x251   : > { %13934 = vmatpush3.bf16.msra.mxu1 %v15209_v13 }
 0x252   : > { %13935 = vmatprep.subr.bf16.mxu1 %v15211_v15 }
 0x253   : > { %13914 = vmatpush3.bf16.msra.mxu0 %v15212_v16  ;;  %v15251_v16 = vld [vmem:[%s15765_s28 + $0x1370] sm:$0xff]  }
 0x254   : > { %13943 = vmatprep.subr.bf16.mxu0 %v15215_v19 }
 0x255   : > { %13936 = vmatpush3.bf16.msra.mxu1 %v15213_v17  ;;  %v15252_v17 = vld [vmem:[%s15765_s28 + $0x13f0] sm:$0xff]  }
 0x256   : > { %v13651_v26 = vpop.f32.mrf.mxu0  ;;  %10768 = vmatmul.mubr.bf16.vlgmr.msra.gmra.mxu0 %v2741_v18  ;;  %13965 = vmatprep.subr.bf16.mxu1 %v15216_v20  ;;  %v15253_v20 = vld [vmem:[%s15765_s28 + $0x1330] sm:$0xff]  }
 0x257   : > { %13944 = vmatpush3.bf16.msra.mxu0 %v15217_v21  ;;  %v15254_v21 = vld [vmem:[%s15765_s28 + $0x13b0] sm:$0xff]  }
 0x258   : > { %v13673_v29 = vpop.f32.mrf.mxu1  ;;  %10808 = vmatmul.mubr.bf16.vlgmr.msra.gmra.mxu1 %v2757_v23  ;;  %v13652_v30 = vpop.f32.mrf.mxu0  ;;  %13945 = vmatprep.subr.bf16.mxu0 %v15219_v24  ;;  %v15255_v24 = vld [vmem:[%s15765_s28 + $0x1368] sm:$0xff]  }
 0x259   : > { %13966 = vmatpush3.bf16.msra.mxu1 %v15218_v22  ;;  %v13653_v32 = vadd.f32 %v13652_v30, %v13651_v26  ;;  %v15256_v26 = vld [vmem:[%s15765_s28 + $0x13e8] sm:$0xff]  }
 0x25a   : > { %v13674_v34 = vpop.f32.mrf.mxu1  ;;  %v13654_v36 = vpop.f32.mrf.mxu0  ;;  %13967 = vmatprep.subr.bf16.mxu1 %v15220_v25 }
 0x25b   : > { %v10290_v37 = vadd.f32 %v13653_v32, %v16463_v60  ;;  %v13675_v38 = vadd.f32 %v13674_v34, %v13673_v29  ;;  %13946 = vmatpush3.bf16.msra.mxu0 %v15221_v27  ;;  %v248_v60 = vld [vmem:[%s15760_s24 + $0x48] sm:$0xff]  ;;  %v15259_v36 = vld [vmem:[%s15765_s28 + $0x1360] sm:$0xff]  }
 0x25c   : > { %v13676_v40 = vpop.f32.mrf.mxu1  ;;  %v13655_v41 = vpop.f32.mrf.mxu0  ;;  %13947 = vmatprep.subr.bf16.mxu0 %v15223_v31  ;;  %v2767_v63 = vrot.slane %v248_v60, %v15803_v42  ;;  %v2760_v0 = vcombine.high %v248_v60, %v248_v60  ;;  %v15257_v29 = vld [vmem:[%s15765_s28 + $0x1328] sm:$0xff]   ;;  %v15282_v60 = vld [vmem:[%s15765_s28 + $0x1438] sm:$0xff]  }
 0x25d   : > { %v16500_v44 = vadd.f32 %v13675_v38, %v10290_v37  ;;  %13968 = vmatpush3.bf16.msra.mxu1 %v15222_v28  ;;  %v15258_v32 = vld [vmem:[%s15765_s28 + $0x13a8] sm:$0xff]   ;;  %v15260_v37 = vld [vmem:[%s15765_s28 + $0x13e0] sm:$0xff]   ;;  %v15263_v41 = vld [vmem:[%s15765_s28 + $0x1358] sm:$0xff]  }
 0x25e   : > { %v13677_v46 = vpop.f32.mrf.mxu1  ;;  %13969 = vmatprep.subr.bf16.mxu1 %v15224_v33  ;;  %v2775_v3 = vcombine.high %v2767_v63, %v2767_v63  ;;  %v16523_v4 = vrot.slane %v2760_v0, %v15803_v42  ;;  %v2783_v7 = vrot.slane %v2767_v63, %v15803_v42  ;;  %v15262_v40 = vld [vmem:[%s15765_s28 + $0x13a0] sm:$0xff]   ;;  %v15284_v0 = vld [vmem:[%s15765_s28 + $0x1470] sm:$0xff]  }
 0x25f   : > { %13948 = vmatpush3.bf16.msra.mxu0 %v15225_v35  ;;  %v15267_v46 = vld [vmem:[%s15765_s28 + $0x1350] sm:$0xff]  }
 0x260   : > { %13949 = vmatprep.subr.bf16.mxu0 %v15227_v43  ;;  %v2797_v6 = vrot.slane %v2775_v3, %v15803_v42  ;;  %v2776_v9 = vcombine.high %v16523_v4, %v16523_v4  ;;  %v2805_v15 = vcombine.high %v2783_v7, %v2783_v7  ;;  %v15264_v43 = vld [vmem:[%s15765_s28 + $0x13d8] sm:$0xff]   ;;  %v15286_v3 = vld [vmem:[%s15765_s28 + $0x1430] sm:$0xff]  }
 0x261   : > { %13970 = vmatpush3.bf16.msra.mxu1 %v15226_v39  ;;  %v15261_v39 = vld [vmem:[%s15765_s28 + $0x1320] sm:$0xff]  }
 0x262   : > { %13971 = vmatprep.subr.bf16.mxu1 %v15228_v45  ;;  %10847 = vmatprep.mubr.bf16.mxu0 %v2797_v6  ;;  %v2807_v11 = vcombine.high %v2797_v6, %v2797_v6  ;;  %v2804_v13 = vrot.slane %v2776_v9, %v15803_v42  ;;  %v15266_v45 = vld [vmem:[%s15765_s28 + $0x1398] sm:$0xff]   ;;  %v15289_v9 = vld [vmem:[%s15765_s28 + $0x14e8] sm:$0xff]  }
 0x263   : > { %13950 = vmatpush3.bf16.msra.mxu0 %v15229_v47  ;;  %v15268_v47 = vld [vmem:[%s15765_s28 + $0x13d0] sm:$0xff]  }
 0x264   : > { %13951 = vmatprep.subr.bf16.mxu0 %v15231_v49  ;;  %10887 = vmatprep.mubr.bf16.mxu1 %v2807_v11  ;;  %v2808_v18 = vcombine.high %v2804_v13, %v2804_v13  ;;  %v15270_v49 = vld [vmem:[%s15765_s28 + $0x1390] sm:$0xff]  }
 0x265   : > { %13972 = vmatpush3.bf16.msra.mxu1 %v15230_v48  ;;  %v15269_v48 = vld [vmem:[%s15765_s28 + $0x1310] sm:$0xff]  }
 0x266   : > { %13973 = vmatprep.subr.bf16.mxu1 %v15232_v50  ;;  %v15271_v50 = vld [vmem:[%s15765_s28 + $0x1348] sm:$0xff]  }
 0x267   : > { %13952 = vmatpush3.bf16.msra.mxu0 %v15233_v51  ;;  %v15272_v51 = vld [vmem:[%s15765_s28 + $0x13c8] sm:$0xff]  }
 0x268   : > { %13953 = vmatprep.subr.bf16.mxu0 %v15235_v53  ;;  %v15274_v53 = vld [vmem:[%s15765_s28 + $0x1388] sm:$0xff]  }
 0x269   : > { %13974 = vmatpush3.bf16.msra.mxu1 %v15234_v52  ;;  %v15273_v52 = vld [vmem:[%s15765_s28 + $0x1308] sm:$0xff]  }
 0x26a   : > { %13975 = vmatprep.subr.bf16.mxu1 %v15236_v54  ;;  %v15275_v54 = vld [vmem:[%s15765_s28 + $0x1340] sm:$0xff]  }
 0x26b   : > { %13954 = vmatpush3.bf16.msra.mxu0 %v15237_v55  ;;  %v15276_v55 = vld [vmem:[%s15765_s28 + $0x13c0] sm:$0xff]  }
 0x26c   : > { %13955 = vmatprep.subr.bf16.mxu0 %v15239_v57  ;;  %v15278_v57 = vld [vmem:[%s15765_s28 + $0x1380] sm:$0xff]  }
 0x26d   : > { %13976 = vmatpush3.bf16.msra.mxu1 %v15238_v56  ;;  %v15277_v56 = vld [vmem:[%s15765_s28 + $0x1300] sm:$0xff]  }
 0x26e   : > { %13977 = vmatprep.subr.bf16.mxu1 %v15240_v58  ;;  %v2790_v58 = vrot.slane %v16523_v4, %v15803_v42  ;;  %v15287_v4 = vld [vmem:[%s15765_s28 + $0x14b0] sm:$0xff]  }
 0x26f   : > { %13956 = vmatpush3.bf16.msra.mxu0 %v15241_v59  ;;  %v15280_v59 = vld [vmem:[%s15765_s28 + $0x1478] sm:$0xff]  }
 0x270   : > { %13957 = vmatprep.subr.bf16.mxu0 %v15243_v62  ;;  %v15283_v62 = vld [vmem:[%s15765_s28 + $0x14b8] sm:$0xff]   ;;  %v2806_v63 = vcombine.high %v2790_v58, %v2790_v58 }
 0x271   : > { %13978 = vmatpush3.bf16.msra.mxu1 %v15242_v61  ;;  %v15281_v61 = vld [vmem:[%s15765_s28 + $0x14f8] sm:$0xff]  }
 0x272   : > { %13979 = vmatprep.subr.bf16.mxu1 %v15244_v1  ;;  %v15285_v1 = vld [vmem:[%s15765_s28 + $0x14f0] sm:$0xff]  }
 0x273   : > { %13958 = vmatpush3.bf16.msra.mxu0 %v15245_v2 }
 0x274   : > { %13987 = vmatprep.subr.bf16.mxu0 %v15247_v8 }
 0x275   : > { %13980 = vmatpush3.bf16.msra.mxu1 %v15246_v5 }
 0x276   : > { %v13695_v19 = vpop.f32.mrf.mxu0  ;;  %10848 = vmatmul.mubr.bf16.vlgmr.msra.gmra.mxu0 %v2783_v7  ;;  %14009 = vmatprep.subr.bf16.mxu1 %v15248_v10  ;;  %v15288_v7 = vld [vmem:[%s15765_s28 + $0x1468] sm:$0xff]  }
 0x277   : > { %13988 = vmatpush3.bf16.msra.mxu0 %v15249_v12  ;;  %10927 = vmatprep.mubr.bf16.mxu0 %v2804_v13  ;;  %v15290_v12 = vld [vmem:[%s15765_s28 + $0x1428] sm:$0xff]  }
 0x278   : > { %v13717_v22 = vpop.f32.mrf.mxu1  ;;  %10888 = vmatmul.mubr.bf16.vlgmr.msra.gmra.mxu1 %v2805_v15  ;;  %v13696_v23 = vpop.f32.mrf.mxu0  ;;  %13989 = vmatprep.subr.bf16.mxu0 %v15251_v16  ;;  %v15291_v15 = vld [vmem:[%s15765_s28 + $0x14a8] sm:$0xff]  }
 0x279   : > { %14010 = vmatpush3.bf16.msra.mxu1 %v15250_v14  ;;  %v13697_v25 = vadd.f32 %v13696_v23, %v13695_v19  ;;  %10967 = vmatprep.mubr.bf16.mxu1 %v2808_v18  ;;  %v15292_v18 = vld [vmem:[%s15765_s28 + $0x1460] sm:$0xff]  }
 0x27a   : > { %v13718_v27 = vpop.f32.mrf.mxu1  ;;  %v13698_v28 = vpop.f32.mrf.mxu0  ;;  %14011 = vmatprep.subr.bf16.mxu1 %v15252_v17  ;;  %v15295_v23 = vld [vmem:[%s15765_s28 + $0x14a0] sm:$0xff]  }
 0x27b   : > { %v10370_v30 = vadd.f32 %v13697_v25, %v16500_v44  ;;  %v13719_v31 = vadd.f32 %v13718_v27, %v13717_v22  ;;  %13990 = vmatpush3.bf16.msra.mxu0 %v15253_v20  ;;  %v15265_v44 = vld [vmem:[%s15765_s28 + $0x1318] sm:$0xff]   ;;  %v15293_v20 = vld [vmem:[%s15765_s28 + $0x14e0] sm:$0xff]   ;;  %v15300_v28 = vld [vmem:[%s15765_s28 + $0x1450] sm:$0xff]  }
 0x27c   : > { %v13720_v33 = vpop.f32.mrf.mxu1  ;;  %v13699_v34 = vpop.f32.mrf.mxu0  ;;  %13991 = vmatprep.subr.bf16.mxu0 %v15255_v24  ;;  %v15294_v22 = vld [vmem:[%s15765_s28 + $0x1420] sm:$0xff]   ;;  %v15296_v24 = vld [vmem:[%s15765_s28 + $0x1458] sm:$0xff]  }
 0x27d   : > { %v16545_v35 = vadd.f32 %v13719_v31, %v10370_v30  ;;  %14012 = vmatpush3.bf16.msra.mxu1 %v15254_v21  ;;  %v15297_v25 = vld [vmem:[%s15765_s28 + $0x14d8] sm:$0xff]   ;;  %v15302_v30 = vld [vmem:[%s15765_s28 + $0x1410] sm:$0xff]   ;;  %v15305_v33 = vld [vmem:[%s15765_s28 + $0x14c8] sm:$0xff]  }
 0x27e   : > { %v13721_v38 = vpop.f32.mrf.mxu1  ;;  %14013 = vmatprep.subr.bf16.mxu1 %v15256_v26  ;;  %v15298_v26 = vld [vmem:[%s15765_s28 + $0x1418] sm:$0xff]   ;;  %v15303_v31 = vld [vmem:[%s15765_s28 + $0x1490] sm:$0xff]   ;;  %v15306_v34 = vld [vmem:[%s15765_s28 + $0x1408] sm:$0xff]  }
 0x27f   : > { %13992 = vmatpush3.bf16.msra.mxu0 %v15257_v29  ;;  %v15299_v27 = vld [vmem:[%s15765_s28 + $0x1498] sm:$0xff]   ;;  %v15301_v29 = vld [vmem:[%s15765_s28 + $0x14d0] sm:$0xff]  }
 0x280   : > { %13993 = vmatprep.subr.bf16.mxu0 %v15259_v36  ;;  %v15307_v36 = vld [vmem:[%s15765_s28 + $0x1488] sm:$0xff]  }
 0x281   : > { %14014 = vmatpush3.bf16.msra.mxu1 %v15258_v32  ;;  %v15304_v32 = vld [vmem:[%s15765_s28 + $0x1448] sm:$0xff]  }
 0x282   : > { %14015 = vmatprep.subr.bf16.mxu1 %v15260_v37  ;;  %v15308_v37 = vld [vmem:[%s15765_s28 + $0x1440] sm:$0xff]  }
 0x283   : > { %13994 = vmatpush3.bf16.msra.mxu0 %v15261_v39 }
 0x284   : > { %13995 = vmatprep.subr.bf16.mxu0 %v15263_v41  ;;  %v15310_v41 = vld [vmem:[%s15765_s28 + $0x1400] sm:$0xff]  }
 0x285   : > { %14016 = vmatpush3.bf16.msra.mxu1 %v15262_v40  ;;  %v15309_v40 = vld [vmem:[%s15765_s28 + $0x14c0] sm:$0xff]  }
 0x286   : > { %14017 = vmatprep.subr.bf16.mxu1 %v15264_v43 }
 0x287   : > { %13996 = vmatpush3.bf16.msra.mxu0 %v15265_v44 }
 0x288   : > { %13997 = vmatprep.subr.bf16.mxu0 %v15267_v46 }
 0x289   : > { %14018 = vmatpush3.bf16.msra.mxu1 %v15266_v45  ;;  %v15311_v45 = vld [vmem:[%s15765_s28 + $0x1480] sm:$0xff]  }
 0x28a   : > { %14019 = vmatprep.subr.bf16.mxu1 %v15268_v47 }
 0x28b   : > { %13998 = vmatpush3.bf16.msra.mxu0 %v15269_v48  ;;  %v15312_v48 = vld [vmem:[%s15765_s28 + $0x1578] sm:$0xff]  }
 0x28c   : > { %13999 = vmatprep.subr.bf16.mxu0 %v15271_v50  ;;  %v15313_v50 = vld [vmem:[%s15765_s28 + $0x15f8] sm:$0xff]  }
 0x28d   : > { %14020 = vmatpush3.bf16.msra.mxu1 %v15270_v49 }
 0x28e   : > { %14021 = vmatprep.subr.bf16.mxu1 %v15272_v51 }
 0x28f   : > { %14000 = vmatpush3.bf16.msra.mxu0 %v15273_v52  ;;  %v15314_v52 = vld [vmem:[%s15765_s28 + $0x1538] sm:$0xff]  }
 0x290   : > { %14001 = vmatprep.subr.bf16.mxu0 %v15275_v54  ;;  %v15315_v54 = vld [vmem:[%s15765_s28 + $0x15b8] sm:$0xff]  }
 0x291   : > { %14022 = vmatpush3.bf16.msra.mxu1 %v15274_v53 }
 0x292   : > { %14023 = vmatprep.subr.bf16.mxu1 %v15276_v55 }
 0x293   : > { %14002 = vmatpush3.bf16.msra.mxu0 %v15277_v56  ;;  %v15316_v56 = vld [vmem:[%s15765_s28 + $0x1570] sm:$0xff]  }
 0x294   : > { %14031 = vmatprep.subr.bf16.mxu0 %v15280_v59 }
 0x295   : > { %14024 = vmatpush3.bf16.msra.mxu1 %v15278_v57  ;;  %v15317_v57 = vld [vmem:[%s15765_s28 + $0x15f0] sm:$0xff]  }
 0x296   : > { %v13739_v2 = vpop.f32.mrf.mxu0  ;;  %10928 = vmatmul.mubr.bf16.vlgmr.msra.gmra.mxu0 %v2790_v58  ;;  %14053 = vmatprep.subr.bf16.mxu1 %v15281_v61  ;;  %v15318_v61 = vld [vmem:[%s15765_s28 + $0x1530] sm:$0xff]  }
 0x297   : > { %14032 = vmatpush3.bf16.msra.mxu0 %v15282_v60  ;;  %v15319_v60 = vld [vmem:[%s15765_s28 + $0x15b0] sm:$0xff]  }
 0x298   : > { %v13761_v5 = vpop.f32.mrf.mxu1  ;;  %10968 = vmatmul.mubr.bf16.vlgmr.msra.gmra.mxu1 %v2806_v63  ;;  %v13740_v6 = vpop.f32.mrf.mxu0  ;;  %14033 = vmatprep.subr.bf16.mxu0 %v15284_v0  ;;  %v15320_v0 = vld [vmem:[%s15765_s28 + $0x1568] sm:$0xff]  }
 0x299   : > { %14054 = vmatpush3.bf16.msra.mxu1 %v15283_v62  ;;  %v13741_v8 = vadd.f32 %v13740_v6, %v13739_v2  ;;  %v15321_v2 = vld [vmem:[%s15765_s28 + $0x15e8] sm:$0xff]  }
 0x29a   : > { %v13762_v10 = vpop.f32.mrf.mxu1  ;;  %v13742_v11 = vpop.f32.mrf.mxu0  ;;  %14055 = vmatprep.subr.bf16.mxu1 %v15285_v1 }
 0x29b   : > { %v10450_v13 = vadd.f32 %v13741_v8, %v16545_v35  ;;  %v13763_v14 = vadd.f32 %v13762_v10, %v13761_v5  ;;  %14034 = vmatpush3.bf16.msra.mxu0 %v15286_v3  ;;  %v249_v35 = vld [vmem:[%s15760_s24 + $0x50] sm:$0xff]  ;;  %v15322_v5 = vld [vmem:[%s15765_s28 + $0x1528] sm:$0xff]   ;;  %v15324_v11 = vld [vmem:[%s15765_s28 + $0x1560] sm:$0xff]  }
 0x29c   : > { %v13764_v16 = vpop.f32.mrf.mxu1  ;;  %v13743_v17 = vpop.f32.mrf.mxu0  ;;  %14035 = vmatprep.subr.bf16.mxu0 %v15288_v7  ;;  %v2816_v38 = vrot.slane %v249_v35, %v15803_v42  ;;  %v2809_v39 = vcombine.high %v249_v35, %v249_v35  ;;  %v15323_v8 = vld [vmem:[%s15765_s28 + $0x15a8] sm:$0xff]   ;;  %v15347_v35 = vld [vmem:[%s15765_s28 + $0x1638] sm:$0xff]  }
 0x29d   : > { %v16582_v19 = vadd.f32 %v13763_v14, %v10450_v13  ;;  %14056 = vmatpush3.bf16.msra.mxu1 %v15287_v4  ;;  %v15325_v13 = vld [vmem:[%s15765_s28 + $0x15e0] sm:$0xff]   ;;  %v15328_v17 = vld [vmem:[%s15765_s28 + $0x1558] sm:$0xff]  }
 0x29e   : > { %v13765_v21 = vpop.f32.mrf.mxu1  ;;  %14057 = vmatprep.subr.bf16.mxu1 %v15289_v9  ;;  %v2824_v43 = vcombine.high %v2816_v38, %v2816_v38  ;;  %v16605_v44 = vrot.slane %v2809_v39, %v15803_v42  ;;  %v2832_v47 = vrot.slane %v2816_v38, %v15803_v42  ;;  %v15327_v16 = vld [vmem:[%s15765_s28 + $0x15a0] sm:$0xff]   ;;  %v15349_v39 = vld [vmem:[%s15765_s28 + $0x1670] sm:$0xff]  }
 0x29f   : > { %14036 = vmatpush3.bf16.msra.mxu0 %v15290_v12  ;;  %v15332_v21 = vld [vmem:[%s15765_s28 + $0x1550] sm:$0xff]  }
 0x2a0   : > { %14037 = vmatprep.subr.bf16.mxu0 %v15292_v18  ;;  %v2846_v46 = vrot.slane %v2824_v43, %v15803_v42  ;;  %v2825_v49 = vcombine.high %v16605_v44, %v16605_v44  ;;  %v2854_v55 = vcombine.high %v2832_v47, %v2832_v47  ;;  %v15329_v18 = vld [vmem:[%s15765_s28 + $0x15d8] sm:$0xff]   ;;  %v15351_v43 = vld [vmem:[%s15765_s28 + $0x1630] sm:$0xff]  }
 0x2a1   : > { %14058 = vmatpush3.bf16.msra.mxu1 %v15291_v15  ;;  %v15326_v15 = vld [vmem:[%s15765_s28 + $0x1520] sm:$0xff]  }
 0x2a2   : > { %14059 = vmatprep.subr.bf16.mxu1 %v15293_v20  ;;  %11007 = vmatprep.mubr.bf16.mxu0 %v2846_v46  ;;  %v2856_v51 = vcombine.high %v2846_v46, %v2846_v46  ;;  %v2853_v53 = vrot.slane %v2825_v49, %v15803_v42  ;;  %v15331_v20 = vld [vmem:[%s15765_s28 + $0x1598] sm:$0xff]   ;;  %v15354_v49 = vld [vmem:[%s15765_s28 + $0x16e8] sm:$0xff]  }
 0x2a3   : > { %14038 = vmatpush3.bf16.msra.mxu0 %v15294_v22  ;;  %v15333_v22 = vld [vmem:[%s15765_s28 + $0x15d0] sm:$0xff]  }
 0x2a4   : > { %14039 = vmatprep.subr.bf16.mxu0 %v15296_v24  ;;  %11047 = vmatprep.mubr.bf16.mxu1 %v2856_v51  ;;  %v2857_v58 = vcombine.high %v2853_v53, %v2853_v53  ;;  %v15335_v24 = vld [vmem:[%s15765_s28 + $0x1590] sm:$0xff]  }
 0x2a5   : > { %14060 = vmatpush3.bf16.msra.mxu1 %v15295_v23  ;;  %v15334_v23 = vld [vmem:[%s15765_s28 + $0x1510] sm:$0xff]  }
 0x2a6   : > { %14061 = vmatprep.subr.bf16.mxu1 %v15297_v25  ;;  %v15336_v25 = vld [vmem:[%s15765_s28 + $0x1548] sm:$0xff]  }
 0x2a7   : > { %14040 = vmatpush3.bf16.msra.mxu0 %v15298_v26  ;;  %v15337_v26 = vld [vmem:[%s15765_s28 + $0x15c8] sm:$0xff]  }
 0x2a8   : > { %14041 = vmatprep.subr.bf16.mxu0 %v15300_v28  ;;  %v15339_v28 = vld [vmem:[%s15765_s28 + $0x1588] sm:$0xff]  }
 0x2a9   : > { %14062 = vmatpush3.bf16.msra.mxu1 %v15299_v27  ;;  %v15338_v27 = vld [vmem:[%s15765_s28 + $0x1508] sm:$0xff]  }
 0x2aa   : > { %14063 = vmatprep.subr.bf16.mxu1 %v15301_v29  ;;  %v15340_v29 = vld [vmem:[%s15765_s28 + $0x1540] sm:$0xff]  }
 0x2ab   : > { %14042 = vmatpush3.bf16.msra.mxu0 %v15302_v30  ;;  %v15341_v30 = vld [vmem:[%s15765_s28 + $0x15c0] sm:$0xff]  }
 0x2ac   : > { %14043 = vmatprep.subr.bf16.mxu0 %v15304_v32  ;;  %v15343_v32 = vld [vmem:[%s15765_s28 + $0x1580] sm:$0xff]  }
 0x2ad   : > { %14064 = vmatpush3.bf16.msra.mxu1 %v15303_v31  ;;  %v15342_v31 = vld [vmem:[%s15765_s28 + $0x1500] sm:$0xff]  }
 0x2ae   : > { %14065 = vmatprep.subr.bf16.mxu1 %v15305_v33  ;;  %v2839_v33 = vrot.slane %v16605_v44, %v15803_v42  ;;  %v15352_v44 = vld [vmem:[%s15765_s28 + $0x16b0] sm:$0xff]  }
 0x2af   : > { %14044 = vmatpush3.bf16.msra.mxu0 %v15306_v34  ;;  %v15345_v34 = vld [vmem:[%s15765_s28 + $0x1678] sm:$0xff]  }
 0x2b0   : > { %14045 = vmatprep.subr.bf16.mxu0 %v15308_v37  ;;  %v15348_v37 = vld [vmem:[%s15765_s28 + $0x16b8] sm:$0xff]   ;;  %v2855_v38 = vcombine.high %v2839_v33, %v2839_v33 }
 0x2b1   : > { %14066 = vmatpush3.bf16.msra.mxu1 %v15307_v36  ;;  %v15346_v36 = vld [vmem:[%s15765_s28 + $0x16f8] sm:$0xff]  }
 0x2b2   : > { %14067 = vmatprep.subr.bf16.mxu1 %v15309_v40  ;;  %v15350_v40 = vld [vmem:[%s15765_s28 + $0x16f0] sm:$0xff]  }
 0x2b3   : > { %14046 = vmatpush3.bf16.msra.mxu0 %v15310_v41 }
 0x2b4   : > { %14075 = vmatprep.subr.bf16.mxu0 %v15312_v48 }
 0x2b5   : > { %14068 = vmatpush3.bf16.msra.mxu1 %v15311_v45 }
 0x2b6   : > { %v13783_v59 = vpop.f32.mrf.mxu0  ;;  %11008 = vmatmul.mubr.bf16.vlgmr.msra.gmra.mxu0 %v2832_v47  ;;  %14097 = vmatprep.subr.bf16.mxu1 %v15313_v50  ;;  %v15353_v47 = vld [vmem:[%s15765_s28 + $0x1668] sm:$0xff]  }
 0x2b7   : > { %14076 = vmatpush3.bf16.msra.mxu0 %v15314_v52  ;;  %11087 = vmatprep.mubr.bf16.mxu0 %v2853_v53  ;;  %v15355_v52 = vld [vmem:[%s15765_s28 + $0x1628] sm:$0xff]  }
 0x2b8   : > { %v13805_v62 = vpop.f32.mrf.mxu1  ;;  %11048 = vmatmul.mubr.bf16.vlgmr.msra.gmra.mxu1 %v2854_v55  ;;  %v13784_v63 = vpop.f32.mrf.mxu0  ;;  %14077 = vmatprep.subr.bf16.mxu0 %v15316_v56  ;;  %v15356_v55 = vld [vmem:[%s15765_s28 + $0x16a8] sm:$0xff]  }
 0x2b9   : > { %14098 = vmatpush3.bf16.msra.mxu1 %v15315_v54  ;;  %v13785_v1 = vadd.f32 %v13784_v63, %v13783_v59  ;;  %11127 = vmatprep.mubr.bf16.mxu1 %v2857_v58  ;;  %v15357_v58 = vld [vmem:[%s15765_s28 + $0x1660] sm:$0xff]  }
 0x2ba   : > { %v13806_v3 = vpop.f32.mrf.mxu1  ;;  %v13786_v4 = vpop.f32.mrf.mxu0  ;;  %14099 = vmatprep.subr.bf16.mxu1 %v15317_v57  ;;  %v15360_v63 = vld [vmem:[%s15765_s28 + $0x16a0] sm:$0xff]  }
 0x2bb   : > { %v10530_v6 = vadd.f32 %v13785_v1, %v16582_v19  ;;  %v13807_v7 = vadd.f32 %v13806_v3, %v13805_v62  ;;  %14078 = vmatpush3.bf16.msra.mxu0 %v15318_v61  ;;  %v15330_v19 = vld [vmem:[%s15765_s28 + $0x1518] sm:$0xff]   ;;  %v15358_v61 = vld [vmem:[%s15765_s28 + $0x16e0] sm:$0xff]   ;;  %v15365_v4 = vld [vmem:[%s15765_s28 + $0x1650] sm:$0xff]  }
 0x2bc   : > { %v13808_v9 = vpop.f32.mrf.mxu1  ;;  %v13787_v10 = vpop.f32.mrf.mxu0  ;;  %14079 = vmatprep.subr.bf16.mxu0 %v15320_v0  ;;  %v15359_v62 = vld [vmem:[%s15765_s28 + $0x1620] sm:$0xff]   ;;  %v15361_v0 = vld [vmem:[%s15765_s28 + $0x1658] sm:$0xff]  }
 0x2bd   : > { %v16627_v12 = vadd.f32 %v13807_v7, %v10530_v6  ;;  %14100 = vmatpush3.bf16.msra.mxu1 %v15319_v60  ;;  %v15362_v1 = vld [vmem:[%s15765_s28 + $0x16d8] sm:$0xff]   ;;  %v15367_v6 = vld [vmem:[%s15765_s28 + $0x1610] sm:$0xff]   ;;  %v15370_v9 = vld [vmem:[%s15765_s28 + $0x16c8] sm:$0xff]  }
 0x2be   : > { %v13809_v14 = vpop.f32.mrf.mxu1  ;;  %14101 = vmatprep.subr.bf16.mxu1 %v15321_v2  ;;  %v15363_v2 = vld [vmem:[%s15765_s28 + $0x1618] sm:$0xff]   ;;  %v15368_v7 = vld [vmem:[%s15765_s28 + $0x1690] sm:$0xff]   ;;  %v15371_v10 = vld [vmem:[%s15765_s28 + $0x1608] sm:$0xff]  }
 0x2bf   : > { %14080 = vmatpush3.bf16.msra.mxu0 %v15322_v5  ;;  %v15364_v3 = vld [vmem:[%s15765_s28 + $0x1698] sm:$0xff]   ;;  %v15366_v5 = vld [vmem:[%s15765_s28 + $0x16d0] sm:$0xff]  }
 0x2c0   : > { %14081 = vmatprep.subr.bf16.mxu0 %v15324_v11  ;;  %v15372_v11 = vld [vmem:[%s15765_s28 + $0x1688] sm:$0xff]  }
 0x2c1   : > { %14102 = vmatpush3.bf16.msra.mxu1 %v15323_v8  ;;  %v15369_v8 = vld [vmem:[%s15765_s28 + $0x1648] sm:$0xff]  }
 0x2c2   : > { %14103 = vmatprep.subr.bf16.mxu1 %v15325_v13  ;;  %v15373_v13 = vld [vmem:[%s15765_s28 + $0x1640] sm:$0xff]  }
 0x2c3   : > { %14082 = vmatpush3.bf16.msra.mxu0 %v15326_v15 }
 0x2c4   : > { %14083 = vmatprep.subr.bf16.mxu0 %v15328_v17  ;;  %v15375_v17 = vld [vmem:[%s15765_s28 + $0x1600] sm:$0xff]  }
 0x2c5   : > { %14104 = vmatpush3.bf16.msra.mxu1 %v15327_v16  ;;  %v15374_v16 = vld [vmem:[%s15765_s28 + $0x16c0] sm:$0xff]  }
 0x2c6   : > { %14105 = vmatprep.subr.bf16.mxu1 %v15329_v18 }
 0x2c7   : > { %14084 = vmatpush3.bf16.msra.mxu0 %v15330_v19 }
 0x2c8   : > { %14085 = vmatprep.subr.bf16.mxu0 %v15332_v21 }
 0x2c9   : > { %14106 = vmatpush3.bf16.msra.mxu1 %v15331_v20  ;;  %v15376_v20 = vld [vmem:[%s15765_s28 + $0x1680] sm:$0xff]  }
 0x2ca   : > { %14107 = vmatprep.subr.bf16.mxu1 %v15333_v22 }
 0x2cb   : > { %14086 = vmatpush3.bf16.msra.mxu0 %v15334_v23  ;;  %v15377_v23 = vld [vmem:[%s15765_s28 + $0x1778] sm:$0xff]  }
 0x2cc   : > { %14087 = vmatprep.subr.bf16.mxu0 %v15336_v25  ;;  %v15378_v25 = vld [vmem:[%s15765_s28 + $0x17f8] sm:$0xff]  }
 0x2cd   : > { %14108 = vmatpush3.bf16.msra.mxu1 %v15335_v24 }
 0x2ce   : > { %14109 = vmatprep.subr.bf16.mxu1 %v15337_v26 }
 0x2cf   : > { %14088 = vmatpush3.bf16.msra.mxu0 %v15338_v27  ;;  %v15379_v27 = vld [vmem:[%s15765_s28 + $0x1738] sm:$0xff]  }
 0x2d0   : > { %14089 = vmatprep.subr.bf16.mxu0 %v15340_v29  ;;  %v15380_v29 = vld [vmem:[%s15765_s28 + $0x17b8] sm:$0xff]  }
 0x2d1   : > { %14110 = vmatpush3.bf16.msra.mxu1 %v15339_v28 }
 0x2d2   : > { %14111 = vmatprep.subr.bf16.mxu1 %v15341_v30 }
 0x2d3   : > { %14090 = vmatpush3.bf16.msra.mxu0 %v15342_v31  ;;  %v15381_v31 = vld [vmem:[%s15765_s28 + $0x1770] sm:$0xff]  }
 0x2d4   : > { %14119 = vmatprep.subr.bf16.mxu0 %v15345_v34 }
 0x2d5   : > { %14112 = vmatpush3.bf16.msra.mxu1 %v15343_v32  ;;  %v15382_v32 = vld [vmem:[%s15765_s28 + $0x17f0] sm:$0xff]  }
 0x2d6   : > { %v13827_v41 = vpop.f32.mrf.mxu0  ;;  %11088 = vmatmul.mubr.bf16.vlgmr.msra.gmra.mxu0 %v2839_v33  ;;  %14141 = vmatprep.subr.bf16.mxu1 %v15346_v36  ;;  %v15383_v36 = vld [vmem:[%s15765_s28 + $0x1730] sm:$0xff]  }
 0x2d7   : > { %14120 = vmatpush3.bf16.msra.mxu0 %v15347_v35  ;;  %v15384_v35 = vld [vmem:[%s15765_s28 + $0x17b0] sm:$0xff]  }
 0x2d8   : > { %v13849_v45 = vpop.f32.mrf.mxu1  ;;  %11128 = vmatmul.mubr.bf16.vlgmr.msra.gmra.mxu1 %v2855_v38  ;;  %v13828_v46 = vpop.f32.mrf.mxu0  ;;  %14121 = vmatprep.subr.bf16.mxu0 %v15349_v39  ;;  %v15385_v39 = vld [vmem:[%s15765_s28 + $0x1768] sm:$0xff]  }
 0x2d9   : > { %14142 = vmatpush3.bf16.msra.mxu1 %v15348_v37  ;;  %v13829_v48 = vadd.f32 %v13828_v46, %v13827_v41  ;;  %v15386_v41 = vld [vmem:[%s15765_s28 + $0x17e8] sm:$0xff]  }
 0x2da   : > { %v13850_v50 = vpop.f32.mrf.mxu1  ;;  %v13830_v51 = vpop.f32.mrf.mxu0  ;;  %14143 = vmatprep.subr.bf16.mxu1 %v15350_v40 }
 0x2db   : > { %v10610_v53 = vadd.f32 %v13829_v48, %v16627_v12  ;;  %v13851_v54 = vadd.f32 %v13850_v50, %v13849_v45  ;;  %14122 = vmatpush3.bf16.msra.mxu0 %v15351_v43  ;;  %v250_v12 = vld [vmem:[%s15760_s24 + $0x58] sm:$0xff]  ;;  %v15387_v45 = vld [vmem:[%s15765_s28 + $0x1728] sm:$0xff]   ;;  %v15389_v51 = vld [vmem:[%s15765_s28 + $0x1760] sm:$0xff]  }
 0x2dc   : > { %v13852_v56 = vpop.f32.mrf.mxu1  ;;  %v13831_v57 = vpop.f32.mrf.mxu0  ;;  %14123 = vmatprep.subr.bf16.mxu0 %v15353_v47  ;;  %v2865_v14 = vrot.slane %v250_v12, %v15803_v42  ;;  %v2858_v15 = vcombine.high %v250_v12, %v250_v12  ;;  %v15388_v48 = vld [vmem:[%s15765_s28 + $0x17a8] sm:$0xff]   ;;  %v15412_v12 = vld [vmem:[%s15765_s28 + $0x1838] sm:$0xff]  }
 0x2dd   : > { %v16664_v59 = vadd.f32 %v13851_v54, %v10610_v53  ;;  %14144 = vmatpush3.bf16.msra.mxu1 %v15352_v44  ;;  %v15390_v53 = vld [vmem:[%s15765_s28 + $0x17e0] sm:$0xff]   ;;  %v15393_v57 = vld [vmem:[%s15765_s28 + $0x1758] sm:$0xff]  }
 0x2de   : > { %v13853_v60 = vpop.f32.mrf.mxu1  ;;  %14145 = vmatprep.subr.bf16.mxu1 %v15354_v49  ;;  %v2873_v18 = vcombine.high %v2865_v14, %v2865_v14  ;;  %v16687_v19 = vrot.slane %v2858_v15, %v15803_v42  ;;  %v2881_v22 = vrot.slane %v2865_v14, %v15803_v42  ;;  %v15392_v56 = vld [vmem:[%s15765_s28 + $0x17a0] sm:$0xff]   ;;  %v15414_v15 = vld [vmem:[%s15765_s28 + $0x1870] sm:$0xff]  }
 0x2df   : > { %14124 = vmatpush3.bf16.msra.mxu0 %v15355_v52  ;;  %v15397_v60 = vld [vmem:[%s15765_s28 + $0x1750] sm:$0xff]  }
 0x2e0   : > { %14125 = vmatprep.subr.bf16.mxu0 %v15357_v58  ;;  %v2895_v21 = vrot.slane %v2873_v18, %v15803_v42  ;;  %v2874_v24 = vcombine.high %v16687_v19, %v16687_v19  ;;  %v2903_v30 = vcombine.high %v2881_v22, %v2881_v22  ;;  %v15394_v58 = vld [vmem:[%s15765_s28 + $0x17d8] sm:$0xff]   ;;  %v15416_v18 = vld [vmem:[%s15765_s28 + $0x1830] sm:$0xff]  }
 0x2e1   : > { %14146 = vmatpush3.bf16.msra.mxu1 %v15356_v55  ;;  %v15391_v55 = vld [vmem:[%s15765_s28 + $0x1720] sm:$0xff]  }
 0x2e2   : > { %14147 = vmatprep.subr.bf16.mxu1 %v15358_v61  ;;  %11167 = vmatprep.mubr.bf16.mxu0 %v2895_v21  ;;  %v2905_v26 = vcombine.high %v2895_v21, %v2895_v21  ;;  %v2902_v28 = vrot.slane %v2874_v24, %v15803_v42  ;;  %v15396_v61 = vld [vmem:[%s15765_s28 + $0x1798] sm:$0xff]   ;;  %v15419_v24 = vld [vmem:[%s15765_s28 + $0x18e8] sm:$0xff]  }
 0x2e3   : > { %14126 = vmatpush3.bf16.msra.mxu0 %v15359_v62  ;;  %v15398_v62 = vld [vmem:[%s15765_s28 + $0x17d0] sm:$0xff]  }
 0x2e4   : > { %14127 = vmatprep.subr.bf16.mxu0 %v15361_v0  ;;  %11207 = vmatprep.mubr.bf16.mxu1 %v2905_v26  ;;  %v2906_v33 = vcombine.high %v2902_v28, %v2902_v28  ;;  %v15400_v0 = vld [vmem:[%s15765_s28 + $0x1790] sm:$0xff]  }
 0x2e5   : > { %14148 = vmatpush3.bf16.msra.mxu1 %v15360_v63  ;;  %v15399_v63 = vld [vmem:[%s15765_s28 + $0x1710] sm:$0xff]  }
 0x2e6   : > { %14149 = vmatprep.subr.bf16.mxu1 %v15362_v1  ;;  %v15401_v1 = vld [vmem:[%s15765_s28 + $0x1748] sm:$0xff]  }
 0x2e7   : > { %14128 = vmatpush3.bf16.msra.mxu0 %v15363_v2  ;;  %v15402_v2 = vld [vmem:[%s15765_s28 + $0x17c8] sm:$0xff]  }
 0x2e8   : > { %14129 = vmatprep.subr.bf16.mxu0 %v15365_v4  ;;  %v15404_v4 = vld [vmem:[%s15765_s28 + $0x1788] sm:$0xff]  }
 0x2e9   : > { %14150 = vmatpush3.bf16.msra.mxu1 %v15364_v3  ;;  %v15403_v3 = vld [vmem:[%s15765_s28 + $0x1708] sm:$0xff]  }
 0x2ea   : > { %14151 = vmatprep.subr.bf16.mxu1 %v15366_v5  ;;  %v15405_v5 = vld [vmem:[%s15765_s28 + $0x1740] sm:$0xff]  }
 0x2eb   : > { %14130 = vmatpush3.bf16.msra.mxu0 %v15367_v6  ;;  %v15406_v6 = vld [vmem:[%s15765_s28 + $0x17c0] sm:$0xff]  }
 0x2ec   : > { %14131 = vmatprep.subr.bf16.mxu0 %v15369_v8  ;;  %v15408_v8 = vld [vmem:[%s15765_s28 + $0x1780] sm:$0xff]  }
 0x2ed   : > { %14152 = vmatpush3.bf16.msra.mxu1 %v15368_v7  ;;  %v15407_v7 = vld [vmem:[%s15765_s28 + $0x1700] sm:$0xff]  }
 0x2ee   : > { %14153 = vmatprep.subr.bf16.mxu1 %v15370_v9  ;;  %v2888_v9 = vrot.slane %v16687_v19, %v15803_v42  ;;  %v15417_v19 = vld [vmem:[%s15765_s28 + $0x18b0] sm:$0xff]  }
 0x2ef   : > { %14132 = vmatpush3.bf16.msra.mxu0 %v15371_v10  ;;  %v15410_v10 = vld [vmem:[%s15765_s28 + $0x1878] sm:$0xff]  }
 0x2f0   : > { %14133 = vmatprep.subr.bf16.mxu0 %v15373_v13  ;;  %v15413_v13 = vld [vmem:[%s15765_s28 + $0x18b8] sm:$0xff]   ;;  %v2904_v14 = vcombine.high %v2888_v9, %v2888_v9 }
 0x2f1   : > { %14154 = vmatpush3.bf16.msra.mxu1 %v15372_v11  ;;  %v15411_v11 = vld [vmem:[%s15765_s28 + $0x18f8] sm:$0xff]  }
 0x2f2   : > { %14155 = vmatprep.subr.bf16.mxu1 %v15374_v16  ;;  %v15415_v16 = vld [vmem:[%s15765_s28 + $0x18f0] sm:$0xff]  }
 0x2f3   : > { %14134 = vmatpush3.bf16.msra.mxu0 %v15375_v17 }
 0x2f4   : > { %14163 = vmatprep.subr.bf16.mxu0 %v15377_v23 }
 0x2f5   : > { %14156 = vmatpush3.bf16.msra.mxu1 %v15376_v20 }
 0x2f6   : > { %v13871_v34 = vpop.f32.mrf.mxu0  ;;  %11168 = vmatmul.mubr.bf16.vlgmr.msra.gmra.mxu0 %v2881_v22  ;;  %14185 = vmatprep.subr.bf16.mxu1 %v15378_v25  ;;  %v15418_v22 = vld [vmem:[%s15765_s28 + $0x1868] sm:$0xff]  }
 0x2f7   : > { %14164 = vmatpush3.bf16.msra.mxu0 %v15379_v27  ;;  %11247 = vmatprep.mubr.bf16.mxu0 %v2902_v28  ;;  %v15420_v27 = vld [vmem:[%s15765_s28 + $0x1828] sm:$0xff]  }
 0x2f8   : > { %v13893_v37 = vpop.f32.mrf.mxu1  ;;  %11208 = vmatmul.mubr.bf16.vlgmr.msra.gmra.mxu1 %v2903_v30  ;;  %v13872_v38 = vpop.f32.mrf.mxu0  ;;  %14165 = vmatprep.subr.bf16.mxu0 %v15381_v31  ;;  %v15421_v30 = vld [vmem:[%s15765_s28 + $0x18a8] sm:$0xff]  }
 0x2f9   : > { %14186 = vmatpush3.bf16.msra.mxu1 %v15380_v29  ;;  %v13873_v40 = vadd.f32 %v13872_v38, %v13871_v34  ;;  %11287 = vmatprep.mubr.bf16.mxu1 %v2906_v33  ;;  %v15422_v33 = vld [vmem:[%s15765_s28 + $0x1860] sm:$0xff]  }
 0x2fa   : > { %v13894_v43 = vpop.f32.mrf.mxu1  ;;  %v13874_v44 = vpop.f32.mrf.mxu0  ;;  %14187 = vmatprep.subr.bf16.mxu1 %v15382_v32  ;;  %v15425_v38 = vld [vmem:[%s15765_s28 + $0x18a0] sm:$0xff]  }
 0x2fb   : > { %v10690_v46 = vadd.f32 %v13873_v40, %v16664_v59  ;;  %v13895_v47 = vadd.f32 %v13894_v43, %v13893_v37  ;;  %14166 = vmatpush3.bf16.msra.mxu0 %v15383_v36  ;;  %v15395_v59 = vld [vmem:[%s15765_s28 + $0x1718] sm:$0xff]   ;;  %v15423_v36 = vld [vmem:[%s15765_s28 + $0x18e0] sm:$0xff]   ;;  %v15430_v44 = vld [vmem:[%s15765_s28 + $0x1850] sm:$0xff]  }
 0x2fc   : > { %v13896_v49 = vpop.f32.mrf.mxu1  ;;  %v13875_v50 = vpop.f32.mrf.mxu0  ;;  %14167 = vmatprep.subr.bf16.mxu0 %v15385_v39  ;;  %v15424_v37 = vld [vmem:[%s15765_s28 + $0x1820] sm:$0xff]   ;;  %v15426_v39 = vld [vmem:[%s15765_s28 + $0x1858] sm:$0xff]  }
 0x2fd   : > { %v16709_v52 = vadd.f32 %v13895_v47, %v10690_v46  ;;  %14188 = vmatpush3.bf16.msra.mxu1 %v15384_v35  ;;  %v15427_v40 = vld [vmem:[%s15765_s28 + $0x18d8] sm:$0xff]   ;;  %v15432_v46 = vld [vmem:[%s15765_s28 + $0x1810] sm:$0xff]   ;;  %v15435_v49 = vld [vmem:[%s15765_s28 + $0x18c8] sm:$0xff]  }
 0x2fe   : > { %v13897_v54 = vpop.f32.mrf.mxu1  ;;  %14189 = vmatprep.subr.bf16.mxu1 %v15386_v41  ;;  %v15428_v41 = vld [vmem:[%s15765_s28 + $0x1818] sm:$0xff]   ;;  %v15433_v47 = vld [vmem:[%s15765_s28 + $0x1890] sm:$0xff]   ;;  %v15436_v50 = vld [vmem:[%s15765_s28 + $0x1808] sm:$0xff]  }
 0x2ff   : > { %14168 = vmatpush3.bf16.msra.mxu0 %v15387_v45  ;;  %v15429_v43 = vld [vmem:[%s15765_s28 + $0x1898] sm:$0xff]   ;;  %v15431_v45 = vld [vmem:[%s15765_s28 + $0x18d0] sm:$0xff]   ;;  %v15439_v54 = vld [vmem:[%s15765_s28 + $0x18c0] sm:$0xff]  }
 0x300   : > { %14169 = vmatprep.subr.bf16.mxu0 %v15389_v51  ;;  %v15437_v51 = vld [vmem:[%s15765_s28 + $0x1888] sm:$0xff]  }
 0x301   : > { %14190 = vmatpush3.bf16.msra.mxu1 %v15388_v48  ;;  %v15434_v48 = vld [vmem:[%s15765_s28 + $0x1848] sm:$0xff]  }
 0x302   : > { %14191 = vmatprep.subr.bf16.mxu1 %v15390_v53  ;;  %v251_v53 = vld [vmem:[%s15760_s24 + $0x60] sm:$0xff] }
 0x303   : > { %14170 = vmatpush3.bf16.msra.mxu0 %v15391_v55  ;;  %v2914_v55 = vrot.slane %v251_v53, %v15803_v42 }
 0x304   : > { %14171 = vmatprep.subr.bf16.mxu0 %v15393_v57  ;;  %v15440_v57 = vld [vmem:[%s15765_s28 + $0x1800] sm:$0xff]  }
 0x305   : > { %14192 = vmatpush3.bf16.msra.mxu1 %v15392_v56  ;;  %v2907_v56 = vcombine.high %v251_v53, %v251_v53  ;;  %v15478_v53 = vld [vmem:[%s15765_s28 + $0x1ab8] sm:$0xff]  }
 0x306   : > { %14193 = vmatprep.subr.bf16.mxu1 %v15394_v58  ;;  %v15441_v58 = vld [vmem:[%s15765_s28 + $0x1880] sm:$0xff]  }
 0x307   : > { %14172 = vmatpush3.bf16.msra.mxu0 %v15395_v59  ;;  %v2922_v59 = vcombine.high %v2914_v55, %v2914_v55 }
 0x308   : > { %14173 = vmatprep.subr.bf16.mxu0 %v15397_v60  ;;  %v2930_v60 = vrot.slane %v2914_v55, %v15803_v42  ;;  %v15479_v55 = vld [vmem:[%s15765_s28 + $0x1a70] sm:$0xff]  }
 0x309   : > { %14194 = vmatpush3.bf16.msra.mxu1 %v15396_v61  ;;  %v16770_v61 = vrot.slane %v2907_v56, %v15803_v42  ;;  %v15480_v56 = vld [vmem:[%s15765_s28 + $0x1af0] sm:$0xff]  }
 0x30a   : > { %14195 = vmatprep.subr.bf16.mxu1 %v15398_v62  ;;  %v15442_v62 = vld [vmem:[%s15765_s28 + $0x1978] sm:$0xff]  }
 0x30b   : > { %14174 = vmatpush3.bf16.msra.mxu0 %v15399_v63  ;;  %v2944_v63 = vrot.slane %v2922_v59, %v15803_v42  ;;  %v15482_v59 = vld [vmem:[%s15765_s28 + $0x1ab0] sm:$0xff]  }
 0x30c   : > { %14175 = vmatprep.subr.bf16.mxu0 %v15401_v1  ;;  %v2923_v1 = vcombine.high %v16770_v61, %v16770_v61 }
 0x30d   : > { %14196 = vmatpush3.bf16.msra.mxu1 %v15400_v0  ;;  %v15443_v0 = vld [vmem:[%s15765_s28 + $0x19f8] sm:$0xff]  }
 0x30e   : > { %14197 = vmatprep.subr.bf16.mxu1 %v15402_v2  ;;  %v15444_v2 = vld [vmem:[%s15765_s28 + $0x1938] sm:$0xff]  }
 0x30f   : > { %14176 = vmatpush3.bf16.msra.mxu0 %v15403_v3  ;;  %v2954_v3 = vcombine.high %v2944_v63, %v2944_v63 }
 0x310   : > { %14177 = vmatprep.subr.bf16.mxu0 %v15405_v5  ;;  %v2951_v5 = vrot.slane %v2923_v1, %v15803_v42 }
 0x311   : > { %14198 = vmatpush3.bf16.msra.mxu1 %v15404_v4  ;;  %v15445_v4 = vld [vmem:[%s15765_s28 + $0x19b8] sm:$0xff]  }
 0x312   : > { %14199 = vmatprep.subr.bf16.mxu1 %v15406_v6  ;;  %v2952_v6 = vcombine.high %v2930_v60, %v2930_v60 }
 0x313   : > { %14178 = vmatpush3.bf16.msra.mxu0 %v15407_v7  ;;  %v15446_v7 = vld [vmem:[%s15765_s28 + $0x1970] sm:$0xff]  }
 0x314   : > { %14207 = vmatprep.subr.bf16.mxu0 %v15410_v10 }
 0x315   : > { %14200 = vmatpush3.bf16.msra.mxu1 %v15408_v8  ;;  %v15447_v8 = vld [vmem:[%s15765_s28 + $0x19f0] sm:$0xff]  }
 0x316   : > { %v13915_v17 = vpop.f32.mrf.mxu0  ;;  %11248 = vmatmul.mubr.bf16.vlgmr.msra.gmra.mxu0 %v2888_v9  ;;  %14229 = vmatprep.subr.bf16.mxu1 %v15411_v11  ;;  %v2955_v9 = vcombine.high %v2951_v5, %v2951_v5  ;;  %v15448_v11 = vld [vmem:[%s15765_s28 + $0x1930] sm:$0xff]  }
 0x317   : > { %14208 = vmatpush3.bf16.msra.mxu0 %v15412_v12  ;;  %11327 = vmatprep.mubr.bf16.mxu0 %v2944_v63  ;;  %v15449_v12 = vld [vmem:[%s15765_s28 + $0x19b0] sm:$0xff]  }
 0x318   : > { %v13937_v20 = vpop.f32.mrf.mxu1  ;;  %11288 = vmatmul.mubr.bf16.vlgmr.msra.gmra.mxu1 %v2904_v14  ;;  %v13916_v21 = vpop.f32.mrf.mxu0  ;;  %14209 = vmatprep.subr.bf16.mxu0 %v15414_v15  ;;  %v15450_v15 = vld [vmem:[%s15765_s28 + $0x1968] sm:$0xff]  }
 0x319   : > { %14230 = vmatpush3.bf16.msra.mxu1 %v15413_v13  ;;  %v13917_v23 = vadd.f32 %v13916_v21, %v13915_v17  ;;  %11367 = vmatprep.mubr.bf16.mxu1 %v2954_v3  ;;  %v15451_v17 = vld [vmem:[%s15765_s28 + $0x19e8] sm:$0xff]  }
 0x31a   : > { %v13938_v25 = vpop.f32.mrf.mxu1  ;;  %v13918_v26 = vpop.f32.mrf.mxu0  ;;  %14231 = vmatprep.subr.bf16.mxu1 %v15415_v16  ;;  %v15485_v3 = vld [vmem:[%s15765_s28 + $0x1a28] sm:$0xff]  }
 0x31b   : > { %v10770_v28 = vadd.f32 %v13917_v23, %v16709_v52  ;;  %v13939_v29 = vadd.f32 %v13938_v25, %v13937_v20  ;;  %14210 = vmatpush3.bf16.msra.mxu0 %v15416_v18  ;;  %v15438_v52 = vld [vmem:[%s15765_s28 + $0x1840] sm:$0xff]   ;;  %v15452_v20 = vld [vmem:[%s15765_s28 + $0x1928] sm:$0xff]  }
 0x31c   : > { %v13940_v31 = vpop.f32.mrf.mxu1  ;;  %v13919_v32 = vpop.f32.mrf.mxu0  ;;  %14211 = vmatprep.subr.bf16.mxu0 %v15418_v22  ;;  %v15453_v23 = vld [vmem:[%s15765_s28 + $0x19a8] sm:$0xff]   ;;  %v15454_v26 = vld [vmem:[%s15765_s28 + $0x1960] sm:$0xff]  }
 0x31d   : > { %v16746_v34 = vadd.f32 %v13939_v29, %v10770_v28  ;;  %14232 = vmatpush3.bf16.msra.mxu1 %v15417_v19  ;;  %v15455_v28 = vld [vmem:[%s15765_s28 + $0x19e0] sm:$0xff]   ;;  %v15458_v32 = vld [vmem:[%s15765_s28 + $0x1958] sm:$0xff]  }
 0x31e   : > { %v13941_v35 = vpop.f32.mrf.mxu1  ;;  %14233 = vmatprep.subr.bf16.mxu1 %v15419_v24  ;;  %v15457_v31 = vld [vmem:[%s15765_s28 + $0x19a0] sm:$0xff]  }
 0x31f   : > { %14212 = vmatpush3.bf16.msra.mxu0 %v15420_v27  ;;  %v15462_v35 = vld [vmem:[%s15765_s28 + $0x1950] sm:$0xff]  }
 0x320   : > { %14213 = vmatprep.subr.bf16.mxu0 %v15422_v33  ;;  %v15459_v33 = vld [vmem:[%s15765_s28 + $0x19d8] sm:$0xff]  }
 0x321   : > { %14234 = vmatpush3.bf16.msra.mxu1 %v15421_v30  ;;  %v15456_v30 = vld [vmem:[%s15765_s28 + $0x1920] sm:$0xff]  }
 0x322   : > { %14235 = vmatprep.subr.bf16.mxu1 %v15423_v36  ;;  %v15461_v36 = vld [vmem:[%s15765_s28 + $0x1998] sm:$0xff]  }
 0x323   : > { %14214 = vmatpush3.bf16.msra.mxu0 %v15424_v37  ;;  %v15463_v37 = vld [vmem:[%s15765_s28 + $0x19d0] sm:$0xff]  }
 0x324   : > { %14215 = vmatprep.subr.bf16.mxu0 %v15426_v39  ;;  %v15465_v39 = vld [vmem:[%s15765_s28 + $0x1990] sm:$0xff]  }
 0x325   : > { %14236 = vmatpush3.bf16.msra.mxu1 %v15425_v38  ;;  %v15464_v38 = vld [vmem:[%s15765_s28 + $0x1910] sm:$0xff]  }
 0x326   : > { %14237 = vmatprep.subr.bf16.mxu1 %v15427_v40  ;;  %v15466_v40 = vld [vmem:[%s15765_s28 + $0x1948] sm:$0xff]  }
 0x327   : > { %14216 = vmatpush3.bf16.msra.mxu0 %v15428_v41  ;;  %v15467_v41 = vld [vmem:[%s15765_s28 + $0x19c8] sm:$0xff]  }
 0x328   : > { %14217 = vmatprep.subr.bf16.mxu0 %v15430_v44  ;;  %v15469_v44 = vld [vmem:[%s15765_s28 + $0x1988] sm:$0xff]  }
 0x329   : > { %14238 = vmatpush3.bf16.msra.mxu1 %v15429_v43  ;;  %v15468_v43 = vld [vmem:[%s15765_s28 + $0x1908] sm:$0xff]  }
 0x32a   : > { %14239 = vmatprep.subr.bf16.mxu1 %v15431_v45  ;;  %v15470_v45 = vld [vmem:[%s15765_s28 + $0x1940] sm:$0xff]  }
 0x32b   : > { %14218 = vmatpush3.bf16.msra.mxu0 %v15432_v46  ;;  %v15471_v46 = vld [vmem:[%s15765_s28 + $0x19c0] sm:$0xff]  }
 0x32c   : > { %14219 = vmatprep.subr.bf16.mxu0 %v15434_v48  ;;  %v15473_v48 = vld [vmem:[%s15765_s28 + $0x1980] sm:$0xff]  }
 0x32d   : > { %14240 = vmatpush3.bf16.msra.mxu1 %v15433_v47  ;;  %v15472_v47 = vld [vmem:[%s15765_s28 + $0x1900] sm:$0xff]  }
 0x32e   : > { %14241 = vmatprep.subr.bf16.mxu1 %v15435_v49  ;;  %v2937_v49 = vrot.slane %v16770_v61, %v15803_v42 }
 0x32f   : > { %14220 = vmatpush3.bf16.msra.mxu0 %v15436_v50  ;;  %v15475_v50 = vld [vmem:[%s15765_s28 + $0x1a78] sm:$0xff]  }
 0x330   : > { %14221 = vmatprep.subr.bf16.mxu0 %v15438_v52  ;;  %v15477_v52 = vld [vmem:[%s15765_s28 + $0x1a38] sm:$0xff]  }
 0x331   : > { %14242 = vmatpush3.bf16.msra.mxu1 %v15437_v51  ;;  %v15476_v51 = vld [vmem:[%s15765_s28 + $0x1af8] sm:$0xff]  }
 0x332   : > { %14243 = vmatprep.subr.bf16.mxu1 %v15439_v54  ;;  %v2953_v54 = vcombine.high %v2937_v49, %v2937_v49 }
 0x333   : > { %14222 = vmatpush3.bf16.msra.mxu0 %v15440_v57 }
 0x334   : > { %14251 = vmatprep.subr.bf16.mxu0 %v15442_v62  ;;  %v15483_v62 = vld [vmem:[%s15765_s28 + $0x1a68] sm:$0xff]  }
 0x335   : > { %14244 = vmatpush3.bf16.msra.mxu1 %v15441_v58  ;;  %v15481_v58 = vld [vmem:[%s15765_s28 + $0x1a30] sm:$0xff]  }
 0x336   : > { %v13959_v10 = vpop.f32.mrf.mxu0  ;;  %11328 = vmatmul.mubr.bf16.vlgmr.msra.gmra.mxu0 %v2930_v60  ;;  %14273 = vmatprep.subr.bf16.mxu1 %v15443_v0  ;;  %v15484_v0 = vld [vmem:[%s15765_s28 + $0x1ae8] sm:$0xff]  }
 0x337   : > { %14252 = vmatpush3.bf16.msra.mxu0 %v15444_v2  ;;  %11407 = vmatprep.mubr.bf16.mxu0 %v2951_v5 }
 0x338   : > { %v13981_v13 = vpop.f32.mrf.mxu1  ;;  %11368 = vmatmul.mubr.bf16.vlgmr.msra.gmra.mxu1 %v2952_v6  ;;  %v13960_v14 = vpop.f32.mrf.mxu0  ;;  %14253 = vmatprep.subr.bf16.mxu0 %v15446_v7  ;;  %v15486_v6 = vld [vmem:[%s15765_s28 + $0x1aa8] sm:$0xff]  }
 0x339   : > { %14274 = vmatpush3.bf16.msra.mxu1 %v15445_v4  ;;  %v13961_v16 = vadd.f32 %v13960_v14, %v13959_v10  ;;  %11447 = vmatprep.mubr.bf16.mxu1 %v2955_v9  ;;  %v15487_v9 = vld [vmem:[%s15765_s28 + $0x1a60] sm:$0xff]  }
 0x33a   : > { %v13982_v18 = vpop.f32.mrf.mxu1  ;;  %v13962_v19 = vpop.f32.mrf.mxu0  ;;  %14275 = vmatprep.subr.bf16.mxu1 %v15447_v8  ;;  %v15490_v14 = vld [vmem:[%s15765_s28 + $0x1aa0] sm:$0xff]  }
 0x33b   : > { %v10850_v21 = vadd.f32 %v13961_v16, %v16746_v34  ;;  %v13983_v22 = vadd.f32 %v13982_v18, %v13981_v13  ;;  %14254 = vmatpush3.bf16.msra.mxu0 %v15448_v11  ;;  %v15460_v34 = vld [vmem:[%s15765_s28 + $0x1918] sm:$0xff]   ;;  %v15488_v11 = vld [vmem:[%s15765_s28 + $0x1ae0] sm:$0xff]   ;;  %v15495_v19 = vld [vmem:[%s15765_s28 + $0x1a50] sm:$0xff]  }
 0x33c   : > { %v13984_v24 = vpop.f32.mrf.mxu1  ;;  %v13963_v25 = vpop.f32.mrf.mxu0  ;;  %14255 = vmatprep.subr.bf16.mxu0 %v15450_v15  ;;  %v15489_v13 = vld [vmem:[%s15765_s28 + $0x1a20] sm:$0xff]   ;;  %v15491_v15 = vld [vmem:[%s15765_s28 + $0x1a58] sm:$0xff]  }
 0x33d   : > { %v16791_v27 = vadd.f32 %v13983_v22, %v10850_v21  ;;  %14276 = vmatpush3.bf16.msra.mxu1 %v15449_v12  ;;  %v15492_v16 = vld [vmem:[%s15765_s28 + $0x1ad8] sm:$0xff]   ;;  %v15497_v21 = vld [vmem:[%s15765_s28 + $0x1a10] sm:$0xff]   ;;  %v15500_v24 = vld [vmem:[%s15765_s28 + $0x1ac8] sm:$0xff]  }
 0x33e   : > { %v13985_v29 = vpop.f32.mrf.mxu1  ;;  %14277 = vmatprep.subr.bf16.mxu1 %v15451_v17  ;;  %v15493_v17 = vld [vmem:[%s15765_s28 + $0x1a18] sm:$0xff]   ;;  %v15498_v22 = vld [vmem:[%s15765_s28 + $0x1a90] sm:$0xff]   ;;  %v15501_v25 = vld [vmem:[%s15765_s28 + $0x1a08] sm:$0xff]  }
 0x33f   : > { %14256 = vmatpush3.bf16.msra.mxu0 %v15452_v20  ;;  %v15494_v18 = vld [vmem:[%s15765_s28 + $0x1a98] sm:$0xff]   ;;  %v15496_v20 = vld [vmem:[%s15765_s28 + $0x1ad0] sm:$0xff]   ;;  %v15504_v29 = vld [vmem:[%s15765_s28 + $0x1ac0] sm:$0xff]  }
 0x340   : > { %14257 = vmatprep.subr.bf16.mxu0 %v15454_v26  ;;  %v15502_v26 = vld [vmem:[%s15765_s28 + $0x1a88] sm:$0xff]  }
 0x341   : > { %14278 = vmatpush3.bf16.msra.mxu1 %v15453_v23  ;;  %v15499_v23 = vld [vmem:[%s15765_s28 + $0x1a48] sm:$0xff]  }
 0x342   : > { %14279 = vmatprep.subr.bf16.mxu1 %v15455_v28  ;;  %v252_v28 = vld [vmem:[%s15760_s24 + $0x68] sm:$0xff] }
 0x343   : > { %14258 = vmatpush3.bf16.msra.mxu0 %v15456_v30  ;;  %v2963_v30 = vrot.slane %v252_v28, %v15803_v42 }
 0x344   : > { %14259 = vmatprep.subr.bf16.mxu0 %v15458_v32  ;;  %v15505_v32 = vld [vmem:[%s15765_s28 + $0x1a00] sm:$0xff]  }
 0x345   : > { %14280 = vmatpush3.bf16.msra.mxu1 %v15457_v31  ;;  %v2956_v31 = vcombine.high %v252_v28, %v252_v28  ;;  %v15543_v28 = vld [vmem:[%s15765_s28 + $0x1cb8] sm:$0xff]  }
 0x346   : > { %14281 = vmatprep.subr.bf16.mxu1 %v15459_v33  ;;  %v15506_v33 = vld [vmem:[%s15765_s28 + $0x1a80] sm:$0xff]  }
 0x347   : > { %14260 = vmatpush3.bf16.msra.mxu0 %v15460_v34  ;;  %v2971_v34 = vcombine.high %v2963_v30, %v2963_v30 }
 0x348   : > { %14261 = vmatprep.subr.bf16.mxu0 %v15462_v35  ;;  %v2979_v35 = vrot.slane %v2963_v30, %v15803_v42  ;;  %v15544_v30 = vld [vmem:[%s15765_s28 + $0x1c70] sm:$0xff]  }
 0x349   : > { %14282 = vmatpush3.bf16.msra.mxu1 %v15461_v36  ;;  %v16852_v36 = vrot.slane %v2956_v31, %v15803_v42  ;;  %v15545_v31 = vld [vmem:[%s15765_s28 + $0x1cf0] sm:$0xff]  }
 0x34a   : > { %14283 = vmatprep.subr.bf16.mxu1 %v15463_v37  ;;  %v15507_v37 = vld [vmem:[%s15765_s28 + $0x1b78] sm:$0xff]  }
 0x34b   : > { %14262 = vmatpush3.bf16.msra.mxu0 %v15464_v38  ;;  %v2993_v38 = vrot.slane %v2971_v34, %v15803_v42  ;;  %v15547_v34 = vld [vmem:[%s15765_s28 + $0x1cb0] sm:$0xff]  }
 0x34c   : > { %14263 = vmatprep.subr.bf16.mxu0 %v15466_v40  ;;  %v2972_v40 = vcombine.high %v16852_v36, %v16852_v36 }
 0x34d   : > { %14284 = vmatpush3.bf16.msra.mxu1 %v15465_v39  ;;  %v15508_v39 = vld [vmem:[%s15765_s28 + $0x1bf8] sm:$0xff]  }
 0x34e   : > { %14285 = vmatprep.subr.bf16.mxu1 %v15467_v41  ;;  %v15509_v41 = vld [vmem:[%s15765_s28 + $0x1b38] sm:$0xff]  }
 0x34f   : > { %14264 = vmatpush3.bf16.msra.mxu0 %v15468_v43  ;;  %v3003_v43 = vcombine.high %v2993_v38, %v2993_v38 }
 0x350   : > { %14265 = vmatprep.subr.bf16.mxu0 %v15470_v45  ;;  %v3000_v45 = vrot.slane %v2972_v40, %v15803_v42 }
 0x351   : > { %14286 = vmatpush3.bf16.msra.mxu1 %v15469_v44  ;;  %v15510_v44 = vld [vmem:[%s15765_s28 + $0x1bb8] sm:$0xff]  }
 0x352   : > { %14287 = vmatprep.subr.bf16.mxu1 %v15471_v46  ;;  %v3001_v46 = vcombine.high %v2979_v35, %v2979_v35 }
 0x353   : > { %14266 = vmatpush3.bf16.msra.mxu0 %v15472_v47  ;;  %v15511_v47 = vld [vmem:[%s15765_s28 + $0x1b70] sm:$0xff]  }
 0x354   : > { %14295 = vmatprep.subr.bf16.mxu0 %v15475_v50 }
 0x355   : > { %14288 = vmatpush3.bf16.msra.mxu1 %v15473_v48  ;;  %v15512_v48 = vld [vmem:[%s15765_s28 + $0x1bf0] sm:$0xff]  }
 0x356   : > { %v14003_v57 = vpop.f32.mrf.mxu0  ;;  %11408 = vmatmul.mubr.bf16.vlgmr.msra.gmra.mxu0 %v2937_v49  ;;  %14317 = vmatprep.subr.bf16.mxu1 %v15476_v51  ;;  %v3004_v49 = vcombine.high %v3000_v45, %v3000_v45  ;;  %v15513_v51 = vld [vmem:[%s15765_s28 + $0x1b30] sm:$0xff]  }
 0x357   : > { %14296 = vmatpush3.bf16.msra.mxu0 %v15477_v52  ;;  %11487 = vmatprep.mubr.bf16.mxu0 %v2993_v38  ;;  %v15514_v52 = vld [vmem:[%s15765_s28 + $0x1bb0] sm:$0xff]  }
 0x358   : > { %v14025_v61 = vpop.f32.mrf.mxu1  ;;  %11448 = vmatmul.mubr.bf16.vlgmr.msra.gmra.mxu1 %v2953_v54  ;;  %v14004_v60 = vpop.f32.mrf.mxu0  ;;  %14297 = vmatprep.subr.bf16.mxu0 %v15479_v55  ;;  %v15515_v55 = vld [vmem:[%s15765_s28 + $0x1b68] sm:$0xff]  }
 0x359   : > { %14318 = vmatpush3.bf16.msra.mxu1 %v15478_v53  ;;  %v14005_v63 = vadd.f32 %v14004_v60, %v14003_v57  ;;  %11527 = vmatprep.mubr.bf16.mxu1 %v3003_v43  ;;  %v15516_v57 = vld [vmem:[%s15765_s28 + $0x1be8] sm:$0xff]  }
 0x35a   : > { %v14026_v1 = vpop.f32.mrf.mxu1  ;;  %v14006_v2 = vpop.f32.mrf.mxu0  ;;  %14319 = vmatprep.subr.bf16.mxu1 %v15480_v56  ;;  %v15550_v43 = vld [vmem:[%s15765_s28 + $0x1c28] sm:$0xff]  }
 0x35b   : > { %v10930_v4 = vadd.f32 %v14005_v63, %v16791_v27  ;;  %v14027_v5 = vadd.f32 %v14026_v1, %v14025_v61  ;;  %14298 = vmatpush3.bf16.msra.mxu0 %v15481_v58  ;;  %v15503_v27 = vld [vmem:[%s15765_s28 + $0x1a40] sm:$0xff]   ;;  %v15517_v61 = vld [vmem:[%s15765_s28 + $0x1b28] sm:$0xff]  }
 0x35c   : > { %v14028_v7 = vpop.f32.mrf.mxu1  ;;  %v14007_v8 = vpop.f32.mrf.mxu0  ;;  %14299 = vmatprep.subr.bf16.mxu0 %v15483_v62  ;;  %v15518_v63 = vld [vmem:[%s15765_s28 + $0x1ba8] sm:$0xff]   ;;  %v15519_v2 = vld [vmem:[%s15765_s28 + $0x1b60] sm:$0xff]  }
 0x35d   : > { %v16828_v10 = vadd.f32 %v14027_v5, %v10930_v4  ;;  %14320 = vmatpush3.bf16.msra.mxu1 %v15482_v59  ;;  %v15520_v4 = vld [vmem:[%s15765_s28 + $0x1be0] sm:$0xff]   ;;  %v15523_v8 = vld [vmem:[%s15765_s28 + $0x1b58] sm:$0xff]  }
 0x35e   : > { %v14029_v12 = vpop.f32.mrf.mxu1  ;;  %14321 = vmatprep.subr.bf16.mxu1 %v15484_v0  ;;  %v15522_v7 = vld [vmem:[%s15765_s28 + $0x1ba0] sm:$0xff]  }
 0x35f   : > { %14300 = vmatpush3.bf16.msra.mxu0 %v15485_v3  ;;  %v15527_v12 = vld [vmem:[%s15765_s28 + $0x1b50] sm:$0xff]  }
 0x360   : > { %14301 = vmatprep.subr.bf16.mxu0 %v15487_v9  ;;  %v15524_v9 = vld [vmem:[%s15765_s28 + $0x1bd8] sm:$0xff]  }
 0x361   : > { %14322 = vmatpush3.bf16.msra.mxu1 %v15486_v6  ;;  %v15521_v6 = vld [vmem:[%s15765_s28 + $0x1b20] sm:$0xff]  }
 0x362   : > { %14323 = vmatprep.subr.bf16.mxu1 %v15488_v11  ;;  %v15526_v11 = vld [vmem:[%s15765_s28 + $0x1b98] sm:$0xff]  }
 0x363   : > { %14302 = vmatpush3.bf16.msra.mxu0 %v15489_v13  ;;  %v15528_v13 = vld [vmem:[%s15765_s28 + $0x1bd0] sm:$0xff]  }
 0x364   : > { %14303 = vmatprep.subr.bf16.mxu0 %v15491_v15  ;;  %v15530_v15 = vld [vmem:[%s15765_s28 + $0x1b90] sm:$0xff]  }
 0x365   : > { %14324 = vmatpush3.bf16.msra.mxu1 %v15490_v14  ;;  %v15529_v14 = vld [vmem:[%s15765_s28 + $0x1b10] sm:$0xff]  }
 0x366   : > { %14325 = vmatprep.subr.bf16.mxu1 %v15492_v16  ;;  %v15531_v16 = vld [vmem:[%s15765_s28 + $0x1b48] sm:$0xff]  }
 0x367   : > { %14304 = vmatpush3.bf16.msra.mxu0 %v15493_v17  ;;  %v15532_v17 = vld [vmem:[%s15765_s28 + $0x1bc8] sm:$0xff]  }
 0x368   : > { %14305 = vmatprep.subr.bf16.mxu0 %v15495_v19  ;;  %v15534_v19 = vld [vmem:[%s15765_s28 + $0x1b88] sm:$0xff]  }
 0x369   : > { %14326 = vmatpush3.bf16.msra.mxu1 %v15494_v18  ;;  %v15533_v18 = vld [vmem:[%s15765_s28 + $0x1b08] sm:$0xff]  }
 0x36a   : > { %14327 = vmatprep.subr.bf16.mxu1 %v15496_v20  ;;  %v15535_v20 = vld [vmem:[%s15765_s28 + $0x1b40] sm:$0xff]  }
 0x36b   : > { %14306 = vmatpush3.bf16.msra.mxu0 %v15497_v21  ;;  %v15536_v21 = vld [vmem:[%s15765_s28 + $0x1bc0] sm:$0xff]  }
 0x36c   : > { %14307 = vmatprep.subr.bf16.mxu0 %v15499_v23  ;;  %v15538_v23 = vld [vmem:[%s15765_s28 + $0x1b80] sm:$0xff]  }
 0x36d   : > { %14328 = vmatpush3.bf16.msra.mxu1 %v15498_v22  ;;  %v15537_v22 = vld [vmem:[%s15765_s28 + $0x1b00] sm:$0xff]  }
 0x36e   : > { %14329 = vmatprep.subr.bf16.mxu1 %v15500_v24  ;;  %v2986_v24 = vrot.slane %v16852_v36, %v15803_v42 }
 0x36f   : > { %14308 = vmatpush3.bf16.msra.mxu0 %v15501_v25  ;;  %v15540_v25 = vld [vmem:[%s15765_s28 + $0x1c78] sm:$0xff]  }
 0x370   : > { %14309 = vmatprep.subr.bf16.mxu0 %v15503_v27  ;;  %v15542_v27 = vld [vmem:[%s15765_s28 + $0x1c38] sm:$0xff]  }
 0x371   : > { %14330 = vmatpush3.bf16.msra.mxu1 %v15502_v26  ;;  %v15541_v26 = vld [vmem:[%s15765_s28 + $0x1cf8] sm:$0xff]  }
 0x372   : > { %14331 = vmatprep.subr.bf16.mxu1 %v15504_v29  ;;  %v3002_v29 = vcombine.high %v2986_v24, %v2986_v24 }
 0x373   : > { %14310 = vmatpush3.bf16.msra.mxu0 %v15505_v32 }
 0x374   : > { %14339 = vmatprep.subr.bf16.mxu0 %v15507_v37  ;;  %v15548_v37 = vld [vmem:[%s15765_s28 + $0x1c68] sm:$0xff]  }
 0x375   : > { %14332 = vmatpush3.bf16.msra.mxu1 %v15506_v33  ;;  %v15546_v33 = vld [vmem:[%s15765_s28 + $0x1c30] sm:$0xff]  }
 0x376   : > { %v14047_v50 = vpop.f32.mrf.mxu0  ;;  %11488 = vmatmul.mubr.bf16.vlgmr.msra.gmra.mxu0 %v2979_v35  ;;  %14361 = vmatprep.subr.bf16.mxu1 %v15508_v39  ;;  %v15549_v39 = vld [vmem:[%s15765_s28 + $0x1ce8] sm:$0xff]  }
 0x377   : > { %14340 = vmatpush3.bf16.msra.mxu0 %v15509_v41  ;;  %11567 = vmatprep.mubr.bf16.mxu0 %v3000_v45 }
 0x378   : > { %v14069_v53 = vpop.f32.mrf.mxu1  ;;  %11528 = vmatmul.mubr.bf16.vlgmr.msra.gmra.mxu1 %v3001_v46  ;;  %v14048_v54 = vpop.f32.mrf.mxu0  ;;  %14341 = vmatprep.subr.bf16.mxu0 %v15511_v47  ;;  %v15551_v46 = vld [vmem:[%s15765_s28 + $0x1ca8] sm:$0xff]  }
 0x379   : > { %14362 = vmatpush3.bf16.msra.mxu1 %v15510_v44  ;;  %v14049_v56 = vadd.f32 %v14048_v54, %v14047_v50  ;;  %11607 = vmatprep.mubr.bf16.mxu1 %v3004_v49  ;;  %v15552_v49 = vld [vmem:[%s15765_s28 + $0x1c60] sm:$0xff]  }
 0x37a   : > { %v14070_v58 = vpop.f32.mrf.mxu1  ;;  %v14050_v59 = vpop.f32.mrf.mxu0  ;;  %14363 = vmatprep.subr.bf16.mxu1 %v15512_v48  ;;  %v15555_v54 = vld [vmem:[%s15765_s28 + $0x1ca0] sm:$0xff]  }
 0x37b   : > { %v11010_v60 = vadd.f32 %v14049_v56, %v16828_v10  ;;  %v14071_v62 = vadd.f32 %v14070_v58, %v14069_v53  ;;  %14342 = vmatpush3.bf16.msra.mxu0 %v15513_v51  ;;  %v15525_v10 = vld [vmem:[%s15765_s28 + $0x1b18] sm:$0xff]   ;;  %v15553_v51 = vld [vmem:[%s15765_s28 + $0x1ce0] sm:$0xff]   ;;  %v15560_v59 = vld [vmem:[%s15765_s28 + $0x1c50] sm:$0xff]  }
 0x37c   : > { %v14072_v0 = vpop.f32.mrf.mxu1  ;;  %v14051_v1 = vpop.f32.mrf.mxu0  ;;  %14343 = vmatprep.subr.bf16.mxu0 %v15515_v55  ;;  %v15554_v53 = vld [vmem:[%s15765_s28 + $0x1c20] sm:$0xff]   ;;  %v15556_v55 = vld [vmem:[%s15765_s28 + $0x1c58] sm:$0xff]  }
 0x37d   : > { %v16873_v3 = vadd.f32 %v14071_v62, %v11010_v60  ;;  %14364 = vmatpush3.bf16.msra.mxu1 %v15514_v52  ;;  %v15557_v56 = vld [vmem:[%s15765_s28 + $0x1cd8] sm:$0xff]   ;;  %v15562_v60 = vld [vmem:[%s15765_s28 + $0x1c10] sm:$0xff]   ;;  %v15565_v0 = vld [vmem:[%s15765_s28 + $0x1cc8] sm:$0xff]  }
 0x37e   : > { %v14073_v5 = vpop.f32.mrf.mxu1  ;;  %14365 = vmatprep.subr.bf16.mxu1 %v15516_v57  ;;  %v15558_v57 = vld [vmem:[%s15765_s28 + $0x1c18] sm:$0xff]   ;;  %v15563_v62 = vld [vmem:[%s15765_s28 + $0x1c90] sm:$0xff]   ;;  %v15566_v1 = vld [vmem:[%s15765_s28 + $0x1c08] sm:$0xff]  }
 0x37f   : > { %14344 = vmatpush3.bf16.msra.mxu0 %v15517_v61  ;;  %v15559_v58 = vld [vmem:[%s15765_s28 + $0x1c98] sm:$0xff]   ;;  %v15561_v61 = vld [vmem:[%s15765_s28 + $0x1cd0] sm:$0xff]   ;;  %v15569_v5 = vld [vmem:[%s15765_s28 + $0x1cc0] sm:$0xff]  }
 0x380   : > { %14345 = vmatprep.subr.bf16.mxu0 %v15519_v2  ;;  %v15567_v2 = vld [vmem:[%s15765_s28 + $0x1c88] sm:$0xff]  }
 0x381   : > { %14366 = vmatpush3.bf16.msra.mxu1 %v15518_v63  ;;  %v15564_v63 = vld [vmem:[%s15765_s28 + $0x1c48] sm:$0xff]  }
 0x382   : > { %14367 = vmatprep.subr.bf16.mxu1 %v15520_v4  ;;  %v253_v4 = vld [vmem:[%s15760_s24 + $0x70] sm:$0xff] }
 0x383   : > { %14346 = vmatpush3.bf16.msra.mxu0 %v15521_v6  ;;  %v3012_v6 = vrot.slane %v253_v4, %v15803_v42 }
 0x384   : > { %14347 = vmatprep.subr.bf16.mxu0 %v15523_v8  ;;  %v15570_v8 = vld [vmem:[%s15765_s28 + $0x1c00] sm:$0xff]  }
 0x385   : > { %14368 = vmatpush3.bf16.msra.mxu1 %v15522_v7  ;;  %v3005_v7 = vcombine.high %v253_v4, %v253_v4  ;;  %v15608_v4 = vld [vmem:[%s15765_s28 + $0x1eb8] sm:$0xff]  }
 0x386   : > { %14369 = vmatprep.subr.bf16.mxu1 %v15524_v9  ;;  %v15571_v9 = vld [vmem:[%s15765_s28 + $0x1c80] sm:$0xff]  }
 0x387   : > { %14348 = vmatpush3.bf16.msra.mxu0 %v15525_v10  ;;  %v3020_v10 = vcombine.high %v3012_v6, %v3012_v6 }
 0x388   : > { %14349 = vmatprep.subr.bf16.mxu0 %v15527_v12  ;;  %v3028_v12 = vrot.slane %v3012_v6, %v15803_v42  ;;  %v15609_v6 = vld [vmem:[%s15765_s28 + $0x1e70] sm:$0xff]  }
 0x389   : > { %14370 = vmatpush3.bf16.msra.mxu1 %v15526_v11  ;;  %v16934_v11 = vrot.slane %v3005_v7, %v15803_v42  ;;  %v15610_v7 = vld [vmem:[%s15765_s28 + $0x1ef0] sm:$0xff]  }
 0x38a   : > { %14371 = vmatprep.subr.bf16.mxu1 %v15528_v13  ;;  %v15572_v13 = vld [vmem:[%s15765_s28 + $0x1d78] sm:$0xff]  }
 0x38b   : > { %14350 = vmatpush3.bf16.msra.mxu0 %v15529_v14  ;;  %v3042_v14 = vrot.slane %v3020_v10, %v15803_v42  ;;  %v15612_v10 = vld [vmem:[%s15765_s28 + $0x1eb0] sm:$0xff]  }
 0x38c   : > { %14351 = vmatprep.subr.bf16.mxu0 %v15531_v16  ;;  %v3021_v16 = vcombine.high %v16934_v11, %v16934_v11 }
 0x38d   : > { %14372 = vmatpush3.bf16.msra.mxu1 %v15530_v15  ;;  %v15573_v15 = vld [vmem:[%s15765_s28 + $0x1df8] sm:$0xff]  }
 0x38e   : > { %14373 = vmatprep.subr.bf16.mxu1 %v15532_v17  ;;  %v15574_v17 = vld [vmem:[%s15765_s28 + $0x1d38] sm:$0xff]  }
 0x38f   : > { %14352 = vmatpush3.bf16.msra.mxu0 %v15533_v18  ;;  %v3052_v18 = vcombine.high %v3042_v14, %v3042_v14 }
 0x390   : > { %14353 = vmatprep.subr.bf16.mxu0 %v15535_v20  ;;  %v3049_v20 = vrot.slane %v3021_v16, %v15803_v42 }
 0x391   : > { %14374 = vmatpush3.bf16.msra.mxu1 %v15534_v19  ;;  %v15575_v19 = vld [vmem:[%s15765_s28 + $0x1db8] sm:$0xff]  }
 0x392   : > { %14375 = vmatprep.subr.bf16.mxu1 %v15536_v21  ;;  %v3050_v21 = vcombine.high %v3028_v12, %v3028_v12 }
 0x393   : > { %14354 = vmatpush3.bf16.msra.mxu0 %v15537_v22  ;;  %v15576_v22 = vld [vmem:[%s15765_s28 + $0x1d70] sm:$0xff]  }
 0x394   : > { %14383 = vmatprep.subr.bf16.mxu0 %v15540_v25 }
 0x395   : > { %14376 = vmatpush3.bf16.msra.mxu1 %v15538_v23  ;;  %v15577_v23 = vld [vmem:[%s15765_s28 + $0x1df0] sm:$0xff]  }
 0x396   : > { %v14091_v32 = vpop.f32.mrf.mxu0  ;;  %11568 = vmatmul.mubr.bf16.vlgmr.msra.gmra.mxu0 %v2986_v24  ;;  %14405 = vmatprep.subr.bf16.mxu1 %v15541_v26  ;;  %v3053_v24 = vcombine.high %v3049_v20, %v3049_v20  ;;  %v15578_v26 = vld [vmem:[%s15765_s28 + $0x1d30] sm:$0xff]  }
 0x397   : > { %14384 = vmatpush3.bf16.msra.mxu0 %v15542_v27  ;;  %11647 = vmatprep.mubr.bf16.mxu0 %v3042_v14  ;;  %v15579_v27 = vld [vmem:[%s15765_s28 + $0x1db0] sm:$0xff]  }
 0x398   : > { %v14113_v36 = vpop.f32.mrf.mxu1  ;;  %11608 = vmatmul.mubr.bf16.vlgmr.msra.gmra.mxu1 %v3002_v29  ;;  %v14092_v35 = vpop.f32.mrf.mxu0  ;;  %14385 = vmatprep.subr.bf16.mxu0 %v15544_v30  ;;  %v15580_v30 = vld [vmem:[%s15765_s28 + $0x1d68] sm:$0xff]  }
 0x399   : > { %14406 = vmatpush3.bf16.msra.mxu1 %v15543_v28  ;;  %v14093_v38 = vadd.f32 %v14092_v35, %v14091_v32  ;;  %11687 = vmatprep.mubr.bf16.mxu1 %v3052_v18  ;;  %v15581_v32 = vld [vmem:[%s15765_s28 + $0x1de8] sm:$0xff]  }
 0x39a   : > { %v14114_v40 = vpop.f32.mrf.mxu1  ;;  %v14094_v41 = vpop.f32.mrf.mxu0  ;;  %14407 = vmatprep.subr.bf16.mxu1 %v15545_v31  ;;  %v15615_v18 = vld [vmem:[%s15765_s28 + $0x1e28] sm:$0xff]  }
 0x39b   : > { %v11090_v44 = vadd.f32 %v14093_v38, %v16873_v3  ;;  %v14115_v45 = vadd.f32 %v14114_v40, %v14113_v36  ;;  %14386 = vmatpush3.bf16.msra.mxu0 %v15546_v33  ;;  %v15568_v3 = vld [vmem:[%s15765_s28 + $0x1c40] sm:$0xff]   ;;  %v15582_v36 = vld [vmem:[%s15765_s28 + $0x1d28] sm:$0xff]  }
 0x39c   : > { %v14116_v47 = vpop.f32.mrf.mxu1  ;;  %v14095_v48 = vpop.f32.mrf.mxu0  ;;  %14387 = vmatprep.subr.bf16.mxu0 %v15548_v37  ;;  %v15583_v38 = vld [vmem:[%s15765_s28 + $0x1da8] sm:$0xff]   ;;  %v15584_v41 = vld [vmem:[%s15765_s28 + $0x1d60] sm:$0xff]  }
 0x39d   : > { %v16910_v50 = vadd.f32 %v14115_v45, %v11090_v44  ;;  %14408 = vmatpush3.bf16.msra.mxu1 %v15547_v34  ;;  %v15585_v44 = vld [vmem:[%s15765_s28 + $0x1de0] sm:$0xff]   ;;  %v15588_v48 = vld [vmem:[%s15765_s28 + $0x1d58] sm:$0xff]  }
 0x39e   : > { %v14117_v52 = vpop.f32.mrf.mxu1  ;;  %14409 = vmatprep.subr.bf16.mxu1 %v15549_v39  ;;  %v15587_v47 = vld [vmem:[%s15765_s28 + $0x1da0] sm:$0xff]  }
 0x39f   : > { %14388 = vmatpush3.bf16.msra.mxu0 %v15550_v43  ;;  %v15592_v52 = vld [vmem:[%s15765_s28 + $0x1d50] sm:$0xff]  }
 0x3a0   : > { %14389 = vmatprep.subr.bf16.mxu0 %v15552_v49  ;;  %v15589_v49 = vld [vmem:[%s15765_s28 + $0x1dd8] sm:$0xff]  }
 0x3a1   : > { %14410 = vmatpush3.bf16.msra.mxu1 %v15551_v46  ;;  %v15586_v46 = vld [vmem:[%s15765_s28 + $0x1d20] sm:$0xff]  }
 0x3a2   : > { %14411 = vmatprep.subr.bf16.mxu1 %v15553_v51  ;;  %v15591_v51 = vld [vmem:[%s15765_s28 + $0x1d98] sm:$0xff]  }
 0x3a3   : > { %14390 = vmatpush3.bf16.msra.mxu0 %v15554_v53  ;;  %v15593_v53 = vld [vmem:[%s15765_s28 + $0x1dd0] sm:$0xff]  }
 0x3a4   : > { %14391 = vmatprep.subr.bf16.mxu0 %v15556_v55  ;;  %v15595_v55 = vld [vmem:[%s15765_s28 + $0x1d90] sm:$0xff]  }
 0x3a5   : > { %14412 = vmatpush3.bf16.msra.mxu1 %v15555_v54  ;;  %v15594_v54 = vld [vmem:[%s15765_s28 + $0x1d10] sm:$0xff]  }
 0x3a6   : > { %14413 = vmatprep.subr.bf16.mxu1 %v15557_v56  ;;  %v15596_v56 = vld [vmem:[%s15765_s28 + $0x1d48] sm:$0xff]  }
 0x3a7   : > { %14392 = vmatpush3.bf16.msra.mxu0 %v15558_v57  ;;  %v15597_v57 = vld [vmem:[%s15765_s28 + $0x1dc8] sm:$0xff]  }
 0x3a8   : > { %14393 = vmatprep.subr.bf16.mxu0 %v15560_v59  ;;  %v15599_v59 = vld [vmem:[%s15765_s28 + $0x1d88] sm:$0xff]  }
 0x3a9   : > { %14414 = vmatpush3.bf16.msra.mxu1 %v15559_v58  ;;  %v15598_v58 = vld [vmem:[%s15765_s28 + $0x1d08] sm:$0xff]  }
 0x3aa   : > { %14415 = vmatprep.subr.bf16.mxu1 %v15561_v61  ;;  %v15600_v61 = vld [vmem:[%s15765_s28 + $0x1d40] sm:$0xff]  }
 0x3ab   : > { %14394 = vmatpush3.bf16.msra.mxu0 %v15562_v60  ;;  %v15601_v60 = vld [vmem:[%s15765_s28 + $0x1dc0] sm:$0xff]  }
 0x3ac   : > { %14395 = vmatprep.subr.bf16.mxu0 %v15564_v63  ;;  %v15603_v63 = vld [vmem:[%s15765_s28 + $0x1d80] sm:$0xff]  }
 0x3ad   : > { %14416 = vmatpush3.bf16.msra.mxu1 %v15563_v62  ;;  %v15602_v62 = vld [vmem:[%s15765_s28 + $0x1d00] sm:$0xff]  }
 0x3ae   : > { %14417 = vmatprep.subr.bf16.mxu1 %v15565_v0  ;;  %v3035_v0 = vrot.slane %v16934_v11, %v15803_v42 }
 0x3af   : > { %14396 = vmatpush3.bf16.msra.mxu0 %v15566_v1  ;;  %v15605_v1 = vld [vmem:[%s15765_s28 + $0x1e78] sm:$0xff]  }
 0x3b0   : > { %14397 = vmatprep.subr.bf16.mxu0 %v15568_v3  ;;  %v15607_v3 = vld [vmem:[%s15765_s28 + $0x1e38] sm:$0xff]  }
 0x3b1   : > { %14418 = vmatpush3.bf16.msra.mxu1 %v15567_v2  ;;  %v15606_v2 = vld [vmem:[%s15765_s28 + $0x1ef8] sm:$0xff]  }
 0x3b2   : > { %14419 = vmatprep.subr.bf16.mxu1 %v15569_v5  ;;  %v3051_v5 = vcombine.high %v3035_v0, %v3035_v0 }
 0x3b3   : > { %14398 = vmatpush3.bf16.msra.mxu0 %v15570_v8 }
 0x3b4   : > { %14427 = vmatprep.subr.bf16.mxu0 %v15572_v13  ;;  %v15613_v13 = vld [vmem:[%s15765_s28 + $0x1e68] sm:$0xff]  }
 0x3b5   : > { %14420 = vmatpush3.bf16.msra.mxu1 %v15571_v9  ;;  %v15611_v9 = vld [vmem:[%s15765_s28 + $0x1e30] sm:$0xff]  }
 0x3b6   : > { %v14135_v25 = vpop.f32.mrf.mxu0  ;;  %11648 = vmatmul.mubr.bf16.vlgmr.msra.gmra.mxu0 %v3028_v12  ;;  %14449 = vmatprep.subr.bf16.mxu1 %v15573_v15  ;;  %v15614_v15 = vld [vmem:[%s15765_s28 + $0x1ee8] sm:$0xff]  }
 0x3b7   : > { %14428 = vmatpush3.bf16.msra.mxu0 %v15574_v17  ;;  %11727 = vmatprep.mubr.bf16.mxu0 %v3049_v20 }
 0x3b8   : > { %v14157_v28 = vpop.f32.mrf.mxu1  ;;  %11688 = vmatmul.mubr.bf16.vlgmr.msra.gmra.mxu1 %v3050_v21  ;;  %v14136_v29 = vpop.f32.mrf.mxu0  ;;  %14429 = vmatprep.subr.bf16.mxu0 %v15576_v22  ;;  %v15616_v21 = vld [vmem:[%s15765_s28 + $0x1ea8] sm:$0xff]  }
 0x3b9   : > { %14450 = vmatpush3.bf16.msra.mxu1 %v15575_v19  ;;  %v14137_v31 = vadd.f32 %v14136_v29, %v14135_v25  ;;  %11767 = vmatprep.mubr.bf16.mxu1 %v3053_v24  ;;  %v15617_v24 = vld [vmem:[%s15765_s28 + $0x1e60] sm:$0xff]  }
 0x3ba   : > { %v14158_v33 = vpop.f32.mrf.mxu1  ;;  %v14138_v34 = vpop.f32.mrf.mxu0  ;;  %14451 = vmatprep.subr.bf16.mxu1 %v15577_v23  ;;  %v15620_v29 = vld [vmem:[%s15765_s28 + $0x1ea0] sm:$0xff]  }
 0x3bb   : > { %v11170_v35 = vadd.f32 %v14137_v31, %v16910_v50  ;;  %v14159_v37 = vadd.f32 %v14158_v33, %v14157_v28  ;;  %14430 = vmatpush3.bf16.msra.mxu0 %v15578_v26  ;;  %v15590_v50 = vld [vmem:[%s15765_s28 + $0x1d18] sm:$0xff]   ;;  %v15618_v26 = vld [vmem:[%s15765_s28 + $0x1ee0] sm:$0xff]   ;;  %v15625_v34 = vld [vmem:[%s15765_s28 + $0x1e50] sm:$0xff]  }
 0x3bc   : > { %v14160_v39 = vpop.f32.mrf.mxu1  ;;  %v14139_v40 = vpop.f32.mrf.mxu0  ;;  %14431 = vmatprep.subr.bf16.mxu0 %v15580_v30  ;;  %v15619_v28 = vld [vmem:[%s15765_s28 + $0x1e20] sm:$0xff]   ;;  %v15621_v30 = vld [vmem:[%s15765_s28 + $0x1e58] sm:$0xff]  }
 0x3bd   : > { %v16955_v43 = vadd.f32 %v14159_v37, %v11170_v35  ;;  %14452 = vmatpush3.bf16.msra.mxu1 %v15579_v27  ;;  %v15622_v31 = vld [vmem:[%s15765_s28 + $0x1ed8] sm:$0xff]   ;;  %v15627_v35 = vld [vmem:[%s15765_s28 + $0x1e10] sm:$0xff]   ;;  %v15630_v39 = vld [vmem:[%s15765_s28 + $0x1ec8] sm:$0xff]  }
 0x3be   : > { %v14161_v45 = vpop.f32.mrf.mxu1  ;;  %14453 = vmatprep.subr.bf16.mxu1 %v15581_v32  ;;  %v15623_v32 = vld [vmem:[%s15765_s28 + $0x1e18] sm:$0xff]   ;;  %v15628_v37 = vld [vmem:[%s15765_s28 + $0x1e90] sm:$0xff]   ;;  %v15631_v40 = vld [vmem:[%s15765_s28 + $0x1e08] sm:$0xff]  }
 0x3bf   : > { %14432 = vmatpush3.bf16.msra.mxu0 %v15582_v36  ;;  %v15624_v33 = vld [vmem:[%s15765_s28 + $0x1e98] sm:$0xff]   ;;  %v15626_v36 = vld [vmem:[%s15765_s28 + $0x1ed0] sm:$0xff]   ;;  %v15634_v45 = vld [vmem:[%s15765_s28 + $0x1ec0] sm:$0xff]  }
 0x3c0   : > { %14433 = vmatprep.subr.bf16.mxu0 %v15584_v41  ;;  %v15632_v41 = vld [vmem:[%s15765_s28 + $0x1e88] sm:$0xff]  }
 0x3c1   : > { %14454 = vmatpush3.bf16.msra.mxu1 %v15583_v38  ;;  %v15629_v38 = vld [vmem:[%s15765_s28 + $0x1e48] sm:$0xff]  }
 0x3c2   : > { %14455 = vmatprep.subr.bf16.mxu1 %v15585_v44  ;;  %v254_v44 = vld [vmem:[%s15760_s24 + $0x78] sm:$0xff] }
 0x3c3   : > { %14434 = vmatpush3.bf16.msra.mxu0 %v15586_v46  ;;  %v3061_v46 = vrot.slane %v254_v44, %v15803_v42 }
 0x3c4   : > { %14435 = vmatprep.subr.bf16.mxu0 %v15588_v48  ;;  %v15635_v48 = vld [vmem:[%s15765_s28 + $0x1e00] sm:$0xff]  }
 0x3c5   : > { %14456 = vmatpush3.bf16.msra.mxu1 %v15587_v47  ;;  %v3054_v47 = vcombine.high %v254_v44, %v254_v44 }
 0x3c6   : > { %14457 = vmatprep.subr.bf16.mxu1 %v15589_v49  ;;  %v3069_v49 = vcombine.high %v3061_v46, %v3061_v46 }
 0x3c7   : > { %14436 = vmatpush3.bf16.msra.mxu0 %v15590_v50  ;;  %v3077_v50 = vrot.slane %v3061_v46, %v15803_v42 }
 0x3c8   : > { %14437 = vmatprep.subr.bf16.mxu0 %v15592_v52  ;;  %v17017_v52 = vrot.slane %v3054_v47, %v15803_v42 }
 0x3c9   : > { %14458 = vmatpush3.bf16.msra.mxu1 %v15591_v51  ;;  %v15637_v51 = vld [vmem:[%s15765_s28 + $0x1f78] sm:$0xff]  }
 0x3ca   : > { %14459 = vmatprep.subr.bf16.mxu1 %v15593_v53  ;;  %v15636_v53 = vld [vmem:[%s15765_s28 + $0x1e80] sm:$0xff]  }
 0x3cb   : > { %14438 = vmatpush3.bf16.msra.mxu0 %v15594_v54  ;;  %v3091_v54 = vrot.slane %v3069_v49, %v15803_v42 }
 0x3cc   : > { %14439 = vmatprep.subr.bf16.mxu0 %v15596_v56  ;;  %v3070_v56 = vcombine.high %v17017_v52, %v17017_v52 }
 0x3cd   : > { %14460 = vmatpush3.bf16.msra.mxu1 %v15595_v55  ;;  %v15638_v55 = vld [vmem:[%s15765_s28 + $0x1ff8] sm:$0xff]  }
 0x3ce   : > { %14461 = vmatprep.subr.bf16.mxu1 %v15597_v57  ;;  %v15639_v57 = vld [vmem:[%s15765_s28 + $0x1f38] sm:$0xff]  }
 0x3cf   : > { %14440 = vmatpush3.bf16.msra.mxu0 %v15598_v58  ;;  %v3101_v58 = vcombine.high %v3091_v54, %v3091_v54 }
 0x3d0   : > { %14441 = vmatprep.subr.bf16.mxu0 %v15600_v61  ;;  %v15641_v61 = vld [vmem:[%s15765_s28 + $0x1f70] sm:$0xff]  }
 0x3d1   : > { %14462 = vmatpush3.bf16.msra.mxu1 %v15599_v59  ;;  %v3099_v59 = vcombine.high %v3077_v50, %v3077_v50 }
 0x3d2   : > { %14463 = vmatprep.subr.bf16.mxu1 %v15601_v60  ;;  %v3098_v60 = vrot.slane %v3070_v56, %v15803_v42 }
 0x3d3   : > { %14442 = vmatpush3.bf16.msra.mxu0 %v15602_v62  ;;  %v15640_v62 = vld [vmem:[%s15765_s28 + $0x1fb8] sm:$0xff]  }
 0x3d4   : > { %14471 = vmatprep.subr.bf16.mxu0 %v15605_v1  ;;  %v3102_v1 = vcombine.high %v3098_v60, %v3098_v60 }
 0x3d5   : > { %14464 = vmatpush3.bf16.msra.mxu1 %v15603_v63 }
 0x3d6   : > { %v14179_v8 = vpop.f32.mrf.mxu0  ;;  %11728 = vmatmul.mubr.bf16.vlgmr.msra.gmra.mxu0 %v3035_v0  ;;  %14493 = vmatprep.subr.bf16.mxu1 %v15606_v2  ;;  %v15642_v0 = vld [vmem:[%s15765_s28 + $0x1ff0] sm:$0xff]  }
 0x3d7   : > { %14472 = vmatpush3.bf16.msra.mxu0 %v15607_v3  ;;  %11807 = vmatprep.mubr.bf16.mxu0 %v3091_v54  ;;  %v15643_v2 = vld [vmem:[%s15765_s28 + $0x1f30] sm:$0xff]  }
 0x3d8   : > { %v14201_v11 = vpop.f32.mrf.mxu1  ;;  %11768 = vmatmul.mubr.bf16.vlgmr.msra.gmra.mxu1 %v3051_v5  ;;  %v14180_v12 = vpop.f32.mrf.mxu0  ;;  %14473 = vmatprep.subr.bf16.mxu0 %v15609_v6  ;;  %v15645_v5 = vld [vmem:[%s15765_s28 + $0x1f68] sm:$0xff]  }
 0x3d9   : > { %14494 = vmatpush3.bf16.msra.mxu1 %v15608_v4  ;;  %v14181_v14 = vadd.f32 %v14180_v12, %v14179_v8  ;;  %11847 = vmatprep.mubr.bf16.mxu1 %v3101_v58 }
 0x3da   : > { %v14202_v16 = vpop.f32.mrf.mxu1  ;;  %v14182_v17 = vpop.f32.mrf.mxu0  ;;  %14495 = vmatprep.subr.bf16.mxu1 %v15610_v7  ;;  %v15644_v7 = vld [vmem:[%s15765_s28 + $0x1fb0] sm:$0xff]  }
 0x3db   : > { %v11250_v19 = vadd.f32 %v14181_v14, %v16955_v43  ;;  %v14203_v20 = vadd.f32 %v14202_v16, %v14201_v11  ;;  %14474 = vmatpush3.bf16.msra.mxu0 %v15611_v9  ;;  %v15633_v43 = vld [vmem:[%s15765_s28 + $0x1e40] sm:$0xff]  }
 0x3dc   : > { %v14204_v22 = vpop.f32.mrf.mxu1  ;;  %v14183_v23 = vpop.f32.mrf.mxu0  ;;  %14475 = vmatprep.subr.bf16.mxu0 %v15613_v13  ;;  %v15647_v13 = vld [vmem:[%s15765_s28 + $0x1f28] sm:$0xff]   ;;  %v15649_v16 = vld [vmem:[%s15765_s28 + $0x1f60] sm:$0xff]  }
 0x3dd   : > { %v16992_v25 = vadd.f32 %v14203_v20, %v11250_v19  ;;  %14496 = vmatpush3.bf16.msra.mxu1 %v15612_v10  ;;  %v15646_v10 = vld [vmem:[%s15765_s28 + $0x1fe8] sm:$0xff]   ;;  %v15650_v20 = vld [vmem:[%s15765_s28 + $0x1fe0] sm:$0xff]   ;;  %v15653_v22 = vld [vmem:[%s15765_s28 + $0x1f58] sm:$0xff]  }
 0x3de   : > { %v14205_v27 = vpop.f32.mrf.mxu1  ;;  %14497 = vmatprep.subr.bf16.mxu1 %v15614_v15  ;;  %v15652_v23 = vld [vmem:[%s15765_s28 + $0x1fa0] sm:$0xff]  }
 0x3df   : > { %14476 = vmatpush3.bf16.msra.mxu0 %v15615_v18  ;;  %v15648_v18 = vld [vmem:[%s15765_s28 + $0x1fa8] sm:$0xff]   ;;  %v15656_v27 = vld [vmem:[%s15765_s28 + $0x1f98] sm:$0xff]  }
 0x3e0   : > { %14477 = vmatprep.subr.bf16.mxu0 %v15617_v24  ;;  %v15654_v24 = vld [vmem:[%s15765_s28 + $0x1fd8] sm:$0xff]  }
 0x3e1   : > { %14498 = vmatpush3.bf16.msra.mxu1 %v15616_v21  ;;  %v15651_v21 = vld [vmem:[%s15765_s28 + $0x1f20] sm:$0xff]  }
 0x3e2   : > { %14499 = vmatprep.subr.bf16.mxu1 %v15618_v26  ;;  %v15657_v26 = vld [vmem:[%s15765_s28 + $0x1f50] sm:$0xff]  }
 0x3e3   : > { %14478 = vmatpush3.bf16.msra.mxu0 %v15619_v28  ;;  %v15658_v28 = vld [vmem:[%s15765_s28 + $0x1fd0] sm:$0xff]  }
 0x3e4   : > { %14479 = vmatprep.subr.bf16.mxu0 %v15621_v30  ;;  %v15661_v30 = vld [vmem:[%s15765_s28 + $0x1f48] sm:$0xff]  }
 0x3e5   : > { %14500 = vmatpush3.bf16.msra.mxu1 %v15620_v29  ;;  %v15659_v29 = vld [vmem:[%s15765_s28 + $0x1f10] sm:$0xff]  }
 0x3e6   : > { %14501 = vmatprep.subr.bf16.mxu1 %v15622_v31  ;;  %v15660_v31 = vld [vmem:[%s15765_s28 + $0x1f90] sm:$0xff]  }
 0x3e7   : > { %14480 = vmatpush3.bf16.msra.mxu0 %v15623_v32  ;;  %v15662_v32 = vld [vmem:[%s15765_s28 + $0x1fc8] sm:$0xff]  }
 0x3e8   : > { %14481 = vmatprep.subr.bf16.mxu0 %v15625_v34  ;;  %v15665_v34 = vld [vmem:[%s15765_s28 + $0x1f40] sm:$0xff]  }
 0x3e9   : > { %14502 = vmatpush3.bf16.msra.mxu1 %v15624_v33  ;;  %v15663_v33 = vld [vmem:[%s15765_s28 + $0x1f08] sm:$0xff]  }
 0x3ea   : > { %14503 = vmatprep.subr.bf16.mxu1 %v15626_v36  ;;  %v15664_v36 = vld [vmem:[%s15765_s28 + $0x1f88] sm:$0xff]  }
 0x3eb   : > { %14482 = vmatpush3.bf16.msra.mxu0 %v15627_v35  ;;  %v15666_v35 = vld [vmem:[%s15765_s28 + $0x1fc0] sm:$0xff]  }
 0x3ec   : > { %14483 = vmatprep.subr.bf16.mxu0 %v15629_v38  ;;  %v3084_v38 = vrot.slane %v17017_v52, %v15803_v42 }
 0x3ed   : > { %14504 = vmatpush3.bf16.msra.mxu1 %v15628_v37  ;;  %v15667_v37 = vld [vmem:[%s15765_s28 + $0x1f00] sm:$0xff]  }
 0x3ee   : > { %14505 = vmatprep.subr.bf16.mxu1 %v15630_v39  ;;  %v15668_v39 = vld [vmem:[%s15765_s28 + $0x1f80] sm:$0xff]  }
 0x3ef   : > { %14484 = vmatpush3.bf16.msra.mxu0 %v15631_v40  ;;  %v3100_v40 = vcombine.high %v3084_v38, %v3084_v38 }
 0x3f0   : > { %14485 = vmatprep.subr.bf16.mxu0 %v15633_v43 }
 0x3f1   : > { %14506 = vmatpush3.bf16.msra.mxu1 %v15632_v41 }
 0x3f2   : > { %14507 = vmatprep.subr.bf16.mxu1 %v15634_v45 }
 0x3f3   : > { %14486 = vmatpush3.bf16.msra.mxu0 %v15635_v48 }
 0x3f4   : > { %14515 = vmatprep.subr.bf16.mxu0 %v15637_v51 }
 0x3f5   : > { %14508 = vmatpush3.bf16.msra.mxu1 %v15636_v53 }
 0x3f6   : > { %v14223_v63 = vpop.f32.mrf.mxu0  ;;  %11808 = vmatmul.mubr.bf16.vlgmr.msra.gmra.mxu0 %v3077_v50  ;;  %14537 = vmatprep.subr.bf16.mxu1 %v15638_v55 }
 0x3f7   : > { %14516 = vmatpush3.bf16.msra.mxu0 %v15639_v57  ;;  %11887 = vmatprep.mubr.bf16.mxu0 %v3098_v60 }
 0x3f8   : > { %v14245_v3 = vpop.f32.mrf.mxu1  ;;  %11848 = vmatmul.mubr.bf16.vlgmr.msra.gmra.mxu1 %v3099_v59  ;;  %v14224_v4 = vpop.f32.mrf.mxu0  ;;  %14517 = vmatprep.subr.bf16.mxu0 %v15641_v61 }
 0x3f9   : > { %14538 = vmatpush3.bf16.msra.mxu1 %v15640_v62  ;;  %v14225_v6 = vadd.f32 %v14224_v4, %v14223_v63  ;;  %11927 = vmatprep.mubr.bf16.mxu1 %v3102_v1 }
 0x3fa   : > { %v14246_v8 = vpop.f32.mrf.mxu1  ;;  %v14226_v9 = vpop.f32.mrf.mxu0  ;;  %14539 = vmatprep.subr.bf16.mxu1 %v15642_v0 }
 0x3fb   : > { %v11330_v11 = vadd.f32 %v14225_v6, %v16992_v25  ;;  %v14247_v12 = vadd.f32 %v14246_v8, %v14245_v3  ;;  %14518 = vmatpush3.bf16.msra.mxu0 %v15643_v2  ;;  %v15655_v25 = vld [vmem:[%s15765_s28 + $0x1f18] sm:$0xff]  }
 0x3fc   : > { %v14248_v14 = vpop.f32.mrf.mxu1  ;;  %v14227_v15 = vpop.f32.mrf.mxu0  ;;  %14519 = vmatprep.subr.bf16.mxu0 %v15645_v5 }
 0x3fd   : > { %v11370_v17 = vadd.f32 %v14247_v12, %v11330_v11  ;;  %14540 = vmatpush3.bf16.msra.mxu1 %v15644_v7 }
 0x3fe   : > { %v14249_v19 = vpop.f32.mrf.mxu1  ;;  %14541 = vmatprep.subr.bf16.mxu1 %v15646_v10 }
 0x3ff   : > { %14520 = vmatpush3.bf16.msra.mxu0 %v15647_v13 }
 0x400   : > { %14521 = vmatprep.subr.bf16.mxu0 %v15649_v16 }
 0x401   : > { %14542 = vmatpush3.bf16.msra.mxu1 %v15648_v18 }
 0x402   : > { %14543 = vmatprep.subr.bf16.mxu1 %v15650_v20 }
 0x403   : > { %14522 = vmatpush3.bf16.msra.mxu0 %v15651_v21 }
 0x404   : > { %14523 = vmatprep.subr.bf16.mxu0 %v15653_v22 }
 0x405   : > { %14544 = vmatpush3.bf16.msra.mxu1 %v15652_v23 }
 0x406   : > { %14545 = vmatprep.subr.bf16.mxu1 %v15654_v24 }
 0x407   : > { %14524 = vmatpush3.bf16.msra.mxu0 %v15655_v25 }
 0x408   : > { %14525 = vmatprep.subr.bf16.mxu0 %v15657_v26 }
 0x409   : > { %14546 = vmatpush3.bf16.msra.mxu1 %v15656_v27 }
 0x40a   : > { %14547 = vmatprep.subr.bf16.mxu1 %v15658_v28 }
 0x40b   : > { %14526 = vmatpush3.bf16.msra.mxu0 %v15659_v29 }
 0x40c   : > { %14527 = vmatprep.subr.bf16.mxu0 %v15661_v30 }
 0x40d   : > { %14548 = vmatpush3.bf16.msra.mxu1 %v15660_v31 }
 0x40e   : > { %14549 = vmatprep.subr.bf16.mxu1 %v15662_v32 }
 0x40f   : > { %14528 = vmatpush3.bf16.msra.mxu0 %v15663_v33 }
 0x410   : > { %14529 = vmatprep.subr.bf16.mxu0 %v15665_v34 }
 0x411   : > { %14550 = vmatpush3.bf16.msra.mxu1 %v15664_v36 }
 0x412   : > { %14551 = vmatprep.subr.bf16.mxu1 %v15666_v35 }
 0x413   : > { %14530 = vmatpush3.bf16.msra.mxu0 %v15667_v37 }
 0x415   : > { %14552 = vmatpush3.bf16.msra.mxu1 %v15668_v39 }
 0x416   : > { %v14267_v41 = vpop.f32.mrf.mxu0  ;;  %11888 = vmatmul.mubr.bf16.vlgmr.msra.gmra.mxu0 %v3084_v38 }
 0x418   : > { %v14289_v43 = vpop.f32.mrf.mxu1  ;;  %11928 = vmatmul.mubr.bf16.vlgmr.msra.gmra.mxu1 %v3100_v40  ;;  %v14268_v44 = vpop.f32.mrf.mxu0 }
 0x419   : > { %v14269_v45 = vadd.f32 %v14268_v44, %v14267_v41 }
 0x41a   : > { %v14290_v46 = vpop.f32.mrf.mxu1  ;;  %v14270_v47 = vpop.f32.mrf.mxu0 }
 0x41b   : > { %v11410_v48 = vadd.f32 %v14269_v45, %v11370_v17  ;;  %v14291_v49 = vadd.f32 %v14290_v46, %v14289_v43 }
 0x41c   : > { %v14292_v50 = vpop.f32.mrf.mxu1  ;;  %v14271_v51 = vpop.f32.mrf.mxu0 }
 0x41d   : > { %v11450_v53 = vadd.f32 %v14291_v49, %v11410_v48 }
 0x41e   : > { %v14293_v42 = vpop.f32.mrf.mxu1 }
 0x436   : > { %v14311_v52 = vpop.f32.mrf.mxu0 }
 0x438   : > { %v14333_v54 = vpop.f32.mrf.mxu1  ;;  %v14312_v55 = vpop.f32.mrf.mxu0 }
 0x439   : > { %v14313_v56 = vadd.f32 %v14312_v55, %v14311_v52 }
 0x43a   : > { %v14334_v57 = vpop.f32.mrf.mxu1  ;;  %v14314_v58 = vpop.f32.mrf.mxu0 }
 0x43b   : > { %v11490_v59 = vadd.f32 %v14313_v56, %v11450_v53  ;;  %v14335_v61 = vadd.f32 %v14334_v57, %v14333_v54  ;;  %v238_v57 = vld [vmem:[#allocation2] sm:$0x3] }
 0x43c   : > { %v14336_v60 = vpop.f32.mrf.mxu1  ;;  %v14315_v62 = vpop.f32.mrf.mxu0 }
 0x43d   : > { %v11530_v63 = vadd.f32 %v14335_v61, %v11490_v59 }
 0x43e   : > { %v14337_v0 = vpop.f32.mrf.mxu1 }
 0x456   : > { %v14355_v1 = vpop.f32.mrf.mxu0 }
 0x458   : > { %v14377_v2 = vpop.f32.mrf.mxu1  ;;  %v14356_v3 = vpop.f32.mrf.mxu0 }
 0x459   : > { %v14357_v4 = vadd.f32 %v14356_v3, %v14355_v1 }
 0x45a   : > { %v14378_v5 = vpop.f32.mrf.mxu1  ;;  %v14358_v6 = vpop.f32.mrf.mxu0 }
 0x45b   : > { %v11570_v7 = vadd.f32 %v14357_v4, %v11530_v63  ;;  %v14379_v8 = vadd.f32 %v14378_v5, %v14377_v2 }
 0x45c   : > { %v14380_v9 = vpop.f32.mrf.mxu1  ;;  %v14359_v10 = vpop.f32.mrf.mxu0 }
 0x45d   : > { %v11610_v11 = vadd.f32 %v14379_v8, %v11570_v7 }
 0x45e   : > { %v14381_v12 = vpop.f32.mrf.mxu1 }
 0x476   : > { %v14399_v13 = vpop.f32.mrf.mxu0 }
 0x478   : > { %v14421_v14 = vpop.f32.mrf.mxu1  ;;  %v14400_v15 = vpop.f32.mrf.mxu0 }
 0x479   : > { %v14401_v16 = vadd.f32 %v14400_v15, %v14399_v13 }
 0x47a   : > { %v14422_v17 = vpop.f32.mrf.mxu1  ;;  %v14402_v18 = vpop.f32.mrf.mxu0 }
 0x47b   : > { %v11650_v19 = vadd.f32 %v14401_v16, %v11610_v11  ;;  %v14423_v20 = vadd.f32 %v14422_v17, %v14421_v14 }
 0x47c   : > { %v14424_v21 = vpop.f32.mrf.mxu1  ;;  %v14403_v22 = vpop.f32.mrf.mxu0 }
 0x47d   : > { %v11690_v23 = vadd.f32 %v14423_v20, %v11650_v19 }
 0x47e   : > { %v14425_v24 = vpop.f32.mrf.mxu1 }
 0x496   : > { %v14443_v25 = vpop.f32.mrf.mxu0 }
 0x498   : > { %v14465_v26 = vpop.f32.mrf.mxu1  ;;  %v14444_v27 = vpop.f32.mrf.mxu0 }
 0x499   : > { %v14445_v41 = vadd.f32 %v14444_v27, %v14443_v25 }
 0x49a   : > { %v14466_v28 = vpop.f32.mrf.mxu1  ;;  %v14446_v29 = vpop.f32.mrf.mxu0 }
 0x49b   : > { %v11730_v43 = vadd.f32 %v14445_v41, %v11690_v23  ;;  %v14467_v44 = vadd.f32 %v14466_v28, %v14465_v26 }
 0x49c   : > { %v14468_v30 = vpop.f32.mrf.mxu1  ;;  %v14447_v31 = vpop.f32.mrf.mxu0 }
 0x49d   : > { %v11770_v46 = vadd.f32 %v14467_v44, %v11730_v43 }
 0x49e   : > { %v14469_v32 = vpop.f32.mrf.mxu1 }
 0x4b6   : > { %v14487_v33 = vpop.f32.mrf.mxu0 }
 0x4b8   : > { %v14509_v34 = vpop.f32.mrf.mxu1  ;;  %v14488_v36 = vpop.f32.mrf.mxu0 }
 0x4b9   : > { %v14489_v45 = vadd.f32 %v14488_v36, %v14487_v33 }
 0x4ba   : > { %v14510_v35 = vpop.f32.mrf.mxu1  ;;  %v14490_v37 = vpop.f32.mrf.mxu0 }
 0x4bb   : > { %v11810_v47 = vadd.f32 %v14489_v45, %v11770_v46  ;;  %v14511_v48 = vadd.f32 %v14510_v35, %v14509_v34 }
 0x4bc   : > { %v14512_v38 = vpop.f32.mrf.mxu1  ;;  %v14491_v39 = vpop.f32.mrf.mxu0 }
 0x4bd   : > { %v11850_v53 = vadd.f32 %v14511_v48, %v11810_v47 }
 0x4be   : > { %v14513_v40 = vpop.f32.mrf.mxu1 }
 0x4d6   : > { %v14531_v49 = vpop.f32.mrf.mxu0 }
 0x4d8   : > { %v14553_v50 = vpop.f32.mrf.mxu1  ;;  %v14532_v51 = vpop.f32.mrf.mxu0 }
 0x4d9   : > { %v14533_v42 = vadd.f32 %v14532_v51, %v14531_v49 }
 0x4da   : > { %v14554_v52 = vpop.f32.mrf.mxu1  ;;  %v14534_v54 = vpop.f32.mrf.mxu0 }
 0x4db   : > { %v11890_v55 = vadd.f32 %v14533_v42, %v11850_v53  ;;  %v14555_v56 = vadd.f32 %v14554_v52, %v14553_v50 }
 0x4dc   : > { %v14556_v58 = vpop.f32.mrf.mxu1  ;;  %v14535_v59 = vpop.f32.mrf.mxu0 }
 0x4dd   : > { %v11930_v61 = vadd.f32 %v14555_v56, %v11890_v55  ;;  %11940 = sbr.rel (%p13144_p6) target bundleno = 1791 (0x6ff), region = 48 }
 0x4de   : > { %v14557_v60 = vpop.f32.mrf.mxu1 }
 0x4df   : > { %v11935_v62 = vadd.f32 %v11930_v61, %v238_v57 }
 0x4e1   : > { %11936 = vst [vmem:[#allocation2] sm:$0x3] %v11935_v62 }
 0x4e2   : > { %v11966_v63 = vld [vmem:[%s17134_s3 + $0x78] sm:$0xff]  ;;  %v15712_v0 = vmov 0.0   ;;  %v11965_v1 = vld [vmem:[%s17134_s3 + $0x70] sm:$0xff]  ;;  %vm15713_vm0 = vmmov 0   ;;  %v11964_v2 = vld [vmem:[%s17134_s3 + $0x68] sm:$0xff]  ;;  %vm12044_vm1 = vcmask 74752  }
 0x4e3   : > { %14576 = vmatprep.subr.mxu0 %v15712_v0  ;;  %14608 = vmatprep.mubr.msk.f32.mxu0 %vm15713_vm0, %v15712_v0  ;;  %v11963_v3 = vld [vmem:[%s17134_s3 + $0x60] sm:$0xff]  ;;  %v11962_v4 = vld [vmem:[%s17134_s3 + $0x58] sm:$0xff]  ;;  %v11961_v5 = vld [vmem:[%s17134_s3 + $0x50] sm:$0xff] }
 0x4e4   : > { %14577 = vmatpush3.msra.mxu0 %v11966_v63  ;;  %v11960_v6 = vld [vmem:[%s17134_s3 + $0x48] sm:$0xff]  ;;  %v11959_v7 = vld [vmem:[%s17134_s3 + $0x40] sm:$0xff]  ;;  %v11958_v8 = vld [vmem:[%s17134_s3 + $0x38] sm:$0xff] }
 0x4e5   : > { %14578 = vmatprep.subr.mxu0 %v15712_v0  ;;  %v11957_v9 = vld [vmem:[%s17134_s3 + $0x30] sm:$0xff]  ;;  %v11956_v10 = vld [vmem:[%s17134_s3 + $0x28] sm:$0xff]  ;;  %v11955_v11 = vld [vmem:[%s17134_s3 + $0x20] sm:$0xff] }
 0x4e6   : > { %14579 = vmatpush3.msra.mxu0 %v11965_v1  ;;  %v13145_v13 = vld [vmem:[%s17133_s2] ss:$0 sm:$0xff]  ;;  %v11954_v14 = vld [vmem:[%s17134_s3 + $0x18] sm:$0xff]  ;;  %v11953_v15 = vld [vmem:[%s17134_s3 + $0x10] sm:$0xff] }
 0x4e7   : > { %14580 = vmatprep.subr.mxu0 %v15712_v0  ;;  %v11952_v17 = vld [vmem:[%s17134_s3 + $0x8] sm:$0xff]  ;;  %v11951_v18 = vld [vmem:[%s17134_s3] sm:$0xff] }
 0x4e8   : > { %14581 = vmatpush3.msra.mxu0 %v11964_v2  ;;  %v11941_v12 = vld [vmem:[#allocation2] sm:$0x3] }
 0x4e9   : > { %14582 = vmatprep.subr.mxu0 %v15712_v0  ;;  %v11949_v16 = vadd.f32 %v13145_v13, %v11941_v12  ;;  %v13146_v20 = vld [vmem:[%s17135_s4] ss:$0 sm:$0xff] }
 0x4ea   : > { %14583 = vmatpush3.msra.mxu0 %v11963_v3 }
 0x4eb   : > { %14584 = vmatprep.subr.mxu0 %v15712_v0  ;;  %v11950_v19 = vmax.f32 %v11949_v16, 0.0 }
 0x4ec   : > { %14585 = vmatpush3.msra.mxu0 %v11962_v4 }
 0x4ed   : > { %14586 = vmatprep.subr.mxu0 %v15712_v0 }
 0x4ee   : > { %14587 = vmatpush3.msra.mxu0 %v11961_v5 }
 0x4ef   : > { %14588 = vmatprep.subr.mxu0 %v15712_v0 }
 0x4f0   : > { %14589 = vmatpush3.msra.mxu0 %v11960_v6 }
 0x4f1   : > { %14590 = vmatprep.subr.mxu0 %v15712_v0 }
 0x4f2   : > { %14591 = vmatpush3.msra.mxu0 %v11959_v7 }
 0x4f3   : > { %14592 = vmatprep.subr.mxu0 %v15712_v0 }
 0x4f4   : > { %14593 = vmatpush3.msra.mxu0 %v11958_v8 }
 0x4f5   : > { %14594 = vmatprep.subr.mxu0 %v15712_v0 }
 0x4f6   : > { %14595 = vmatpush3.msra.mxu0 %v11957_v9 }
 0x4f7   : > { %14596 = vmatprep.subr.mxu0 %v15712_v0 }
 0x4f8   : > { %14597 = vmatpush3.msra.mxu0 %v11956_v10 }
 0x4f9   : > { %14598 = vmatprep.subr.mxu0 %v15712_v0 }
 0x4fa   : > { %14599 = vmatpush3.msra.mxu0 %v11955_v11 }
 0x4fb   : > { %14600 = vmatprep.subr.mxu0 %v15712_v0 }
 0x4fc   : > { %14601 = vmatpush3.msra.mxu0 %v11954_v14 }
 0x4fd   : > { %14602 = vmatprep.subr.mxu0 %v15712_v0 }
 0x4fe   : > { %14603 = vmatpush3.msra.mxu0 %v11953_v15 }
 0x4ff   : > { %14604 = vmatprep.subr.mxu0 %v15712_v0 }
 0x500   : > { %14605 = vmatpush3.msra.mxu0 %v11952_v17 }
 0x501   : > { %14606 = vmatprep.subr.mxu0 %v15712_v0 }
 0x502   : > { %14607 = vmatpush3.msra.mxu0 %v11951_v18 }
 0x503   : > { %14609 = vmatmul.mubr.f32.vlgmr.msra.gmra.mxu0 %v11950_v19 }
 0x5c3   : > { %v12040_v21 = vpop.f32.mrf.mxu0 }
 0x5c4   : > { %v12041_v22 = vadd.f32 %v13146_v20, %v12040_v21 }
 0x5c5   : > { %v14610_v23 = vpop.f32.mrf.mxu0 }
 0x5c6   : > { %v12045_v24 = vsel %vm12044_vm1, %v12041_v22, -inf }
 0x5c7   : > { %12046 = vmax.xlane.f32.xlu0 %v12045_v24 }
 0x650   : > { %v12047_v25 = vpop.xlane.xlu0 %12046 }
 0x651   : > { %v12048_v26 = vsub.f32 %v12041_v22, %v12047_v25 }
 0x653   : > { %v12049_v27 = vmul.f32 1.442695, %v12048_v26 }
 0x655   : > { %15670 = vpow2.f32 %v12049_v27 }
 0x662   : > { %v15671_v28 = vpop.eup %15670 }
 0x663   : > { %v12051_v29 = vsel %vm12044_vm1, %v15671_v28, 0.0 }
 0x664   : > { %12052 = vadd.xlane.f32.xlu0 %v12051_v29 }
 0x6ed   : > { %v12053_v30 = vpop.xlane.xlu0 %12052 }
 0x6ee   : > { %15672 = vrcp.f32 %v12053_v30 }
 0x6fb   : > { %v15673_v31 = vpop.eup %15672 }
 0x6fc   : > { %v12055_v32 = vmul.f32 %v15673_v31, %v15671_v28 }
 0x6fe   : > { %12056 = vst.msk [vmem:[#allocation3] sm:$0x3] %vm12044_vm1, %v12055_v32 }
 0x6ff PF: > { %p14615_p7 = scmp.eq.s32.totalorder %s15751_s19, 1  ;;  %s15714_s17 = smov [#allocation3]  }
 0x700   : > { %s12064_s20 = sshll.u32 %s15714_s17, 4  ;;  %s12065_s20 = int_to_ptr.vmem [resolvable:$true] %s12064_s20 }
 0x701   : > { %s15674_s21 = scalar_lea.vmem %s12065_s20, 32  ;;  %p15681_p11 = scmp.lt.s32.totalorder %s12065_s20, %s12065_s20 }
 0x702   : > { %p15675_p8 = scmp.ne.s32.totalorder %s12065_s20, %s15674_s21  ;;  %p15682_p12 = scmp.lt.s32.totalorder %s15674_s21, %s15674_s21 }
 0x704   : > { %p15676_p9 = pnand %p15675_p8, %p14615_p7  ;;  %p15683_p13 = por %p15682_p12, %p15681_p11 }
 0x706   : > { %p15677_p10 = pneg %p15676_p9 }
 0x708   : > { %p15684_p0 = pnand %p15683_p13, %p15677_p10 }
 0x70a   : > { %15687 = shalt.err (!%p15684_p0)
}
 0x70b   : > { %14612 = dma.vmem_to_hbm [thread:$0]  (%p14615_p7), %s12065_s20, 32, %s17136_s5, [#allocation4]  }
 0x70c   : > { %15703 = dma.done.wait (%p14615_p7), [#allocation4], 32  }
 0x70d   : > { %15705 = vsyncadd (%p14615_p7), [#allocation4], 4294967264 }
 0x70e PF: > { %s16_s18 = sadd.s32 1, %s15708_s18  }
 0x70f   : > { %p13_p1 = scmp.ge.s32.totalorder %s16_s18, 4  }
 0x711   :  { %15 = sbr.rel (!%p13_p1) target bundleno = 1 (0x1), region = 78 }
 0x716   :  { %12077 = vsyncpa [#allocation4], 1 }
 0x717   :  { %12079 = vsyncpa [#allocation4 + $0x1], 1 }

</bundles_post_ra>
